<compile_context>
chip_gen: v7x
topology: tpu7x:2x2x1
jax: 0.10.0
libtpu: 0.0.40
codegen_flags: <defaults>
</compile_context>

<pallas_src>
import functools

import jax
import jax.numpy as jnp
from jax.experimental import pallas as pl
from jax.experimental.pallas import tpu as pltpu


# -----------------------------------------------------------------------------
# Kernel
# -----------------------------------------------------------------------------
def _lstm2_rec_kernel(gx0_ref,   # (t_blk, Bp, 4Zp) layer-0 pre-activations, gate order (i,f,o,g)
                      w0s_ref,   # (Zp, 8Zp)        [Whh0^T | Wih1^T], gate-permuted/padded
                      whh1_ref,  # (Zp, 4Zp)        Whh1^T, gate-permuted/padded
                      b1_ref,    # (1, 4Zp)         b_ih1 + b_hh1 (f32), gate-permuted/padded
                      out_ref,   # (Bp, Zp)         final top-layer hidden == lstm_out[:, -1, :]
                      h0_s, c0_s, h1_s, c1_s,       # (Bp, Zp)  f32 state scratch
                      g0r_s,                        # (Bp, 4Zp) f32, pipelined h0 @ Whh0^T
                      *, s_real, masked):
    blk = pl.program_id(0)
    t_blk, bp = gx0_ref.shape[0], gx0_ref.shape[1]
    zp = h0_s.shape[-1]

    @pl.when(blk == 0)
    def _init():
        for r in (h0_s, c0_s, h1_s, c1_s, g0r_s):
            r[...] = jnp.zeros_like(r)

    # Resident weights: loaded once, reused by every timestep in this block.
    w0s = w0s_ref[...]
    whh1 = whh1_ref[...]
    wdt = w0s.dtype
    # Hoisted bias broadcast (JAX does not CSE broadcast_in_dim inside loops).
    b1b = jnp.broadcast_to(b1_ref[...].astype(jnp.float32), (bp, 4 * zp))

    def gates_to_hc(g, c):
        # Gate order (i, f, o, g): one wide sigmoid over 3Zp lanes + one tanh.
        sig = jax.nn.sigmoid(g[:, :3 * zp])
        i_g = sig[:, 0 * zp:1 * zp]
        f_g = sig[:, 1 * zp:2 * zp]
        o_g = sig[:, 2 * zp:3 * zp]
        g_g = jnp.tanh(g[:, 3 * zp:])
        c_new = f_g * c + i_g * g_g
        return o_g * jnp.tanh(c_new), c_new

    def step(t, carry):
        h0, c0, h1, c1, g0r = carry
        # Depends only on the previous h1: can issue while layer-0's activation
        # chain is still in flight.
        g1_rec = jnp.dot(h1.astype(wdt), whh1, preferred_element_type=jnp.float32)
        # Layer 0: the recurrent contribution g0r was produced by the previous
        # step's stacked dot (software pipelining of h0 @ Whh0^T).
        g0 = gx0_ref[t].astype(jnp.float32) + g0r
        nh0, nc0 = gates_to_hc(g0, c0)
        # One h0-dependent dot feeds BOTH layer-0's next recurrent step and
        # layer-1's input gates (no lane concat, shorter dependency chain).
        big = jnp.dot(nh0.astype(wdt), w0s, preferred_element_type=jnp.float32)
        ng0r = big[:, :4 * zp]
        g1 = big[:, 4 * zp:] + g1_rec + b1b
        nh1, nc1 = gates_to_hc(g1, c1)
        if masked:  # only traced when the time axis was padded
            valid = (blk * t_blk + t) < s_real
            nh0 = jnp.where(valid, nh0, h0)
            nc0 = jnp.where(valid, nc0, c0)
            nh1 = jnp.where(valid, nh1, h1)
            nc1 = jnp.where(valid, nc1, c1)
        return nh0, nc0, nh1, nc1, ng0r

    # Full unroll only while the live h/c/gate temporaries fit comfortably in
    # the 64-vreg file; otherwise a modest unroll (v5e has a single vst slot,
    # so spills land on the critical recurrence).
    state_vregs = max(1, bp // 8) * max(1, zp // 128)
    if state_vregs <= 4 and t_blk <= 16:
        unroll = True
    elif t_blk % 4 == 0:
        unroll = 4
    elif t_blk % 2 == 0:
        unroll = 2
    else:
        unroll = 1

    h0, c0, h1, c1, g0r = jax.lax.fori_loop(
        0, t_blk, step,
        (h0_s[...], c0_s[...], h1_s[...], c1_s[...], g0r_s[...]),
        unroll=unroll)

    h0_s[...] = h0
    c0_s[...] = c0
    h1_s[...] = h1
    c1_s[...] = c1
    g0r_s[...] = g0r

    @pl.when(blk == pl.num_programs(0) - 1)
    def _finalize():
        out_ref[...] = h1      # == lstm_out[:, -1, :]


# -----------------------------------------------------------------------------
# Weight preparation (gate permutation + lane/sublane padding)
# -----------------------------------------------------------------------------
def _permute_pad_gates(w, z, zp):
    """Leading 4z axis in PyTorch gate order (i,f,g,o) -> 4zp in (i,f,o,g),
    each gate block zero-padded from z to zp."""
    blocks = [w[0 * z:1 * z], w[1 * z:2 * z], w[3 * z:4 * z], w[2 * z:3 * z]]
    pad = [(0, zp - z)] + [(0, 0)] * (w.ndim - 1)
    return jnp.concatenate([jnp.pad(b, pad) for b in blocks], axis=0)


def _prep_recurrent(w, z, zp, dtype):
    """(4z, z) -> (zp, 4zp): transposed, gate-permuted/padded, input rows padded."""
    wp = _permute_pad_gates(w, z, zp).T              # (z, 4zp)
    return jnp.pad(wp, ((0, zp - z), (0, 0))).astype(dtype)


# -----------------------------------------------------------------------------
# Forward wrapper
# -----------------------------------------------------------------------------
@functools.partial(jax.jit,
                   static_argnames=("z_dim", "weight_dtype", "gx0_dtype", "max_t_blk"))
def lstm_embed_forward(x_tokens, params, *, z_dim,
                       weight_dtype=jnp.float32, gx0_dtype=jnp.float32,
                       max_t_blk=64):
    """x_tokens: (B, S) int32 token ids.  Returns (B, z_dim) float32."""
    B, S = x_tokens.shape
    Z = z_dim
    H = params["embedding"].shape[1]
    Bp = -(-B // 8) * 8          # f32 sublane tile
    Zp = -(-Z // 128) * 128      # lane tile

    # ---- Kernel-resident weights (gate-permuted, padded, weight_dtype). ----
    whh0_p = _prep_recurrent(params["whh0"], Z, Zp, weight_dtype)    # (Zp, 4Zp)
    wih1_p = _prep_recurrent(params["wih1"], Z, Zp, weight_dtype)    # (Zp, 4Zp)
    whh1_p = _prep_recurrent(params["whh1"], Z, Zp, weight_dtype)    # (Zp, 4Zp)
    w0stack = jnp.concatenate([whh0_p, wih1_p], axis=1)              # (Zp, 8Zp)
    b1_p = _permute_pad_gates(params["bih1"] + params["bhh1"], Z, Zp
                              ).reshape(1, 4 * Zp).astype(jnp.float32)

    # ---- Hoisted layer-0 input projection: one (S*Bp, H) x (H, 4Zp) GEMM. ----
    wih0_p = _permute_pad_gates(params["wih0"], Z, Zp)               # (4Zp, H)
    b0_p = _permute_pad_gates(params["bih0"] + params["bhh0"], Z, Zp)  # (4Zp,)
    # Embedding gather stays in the XLA wrapper (no efficient Pallas gather here).
    emb = jnp.take(params["embedding"], x_tokens, axis=0)            # (B, S, H)
    emb = jnp.transpose(emb, (1, 0, 2))                              # (S, B, H)
    emb = jnp.pad(emb, ((0, 0), (0, Bp - B), (0, 0))).astype(jnp.float32)
    gx0 = jnp.dot(emb.reshape(S * Bp, H), wih0_p.T,
                  preferred_element_type=jnp.float32) + b0_p
    gx0 = gx0.reshape(S, Bp, 4 * Zp).astype(gx0_dtype)               # (S, Bp, 4Zp)

    # ---- VMEM budgeting: t_blk from a conservative cross-generation budget. ----
    wbytes = jnp.dtype(weight_dtype).itemsize
    sbytes = jnp.dtype(gx0_dtype).itemsize
    weights_vmem = (8 * Zp * Zp + 4 * Zp * Zp) * wbytes + 4 * Zp * 4   # single-buffered
    state_vmem = (4 * Bp * Zp + Bp * 4 * Zp) * 4
    out_vmem = 2 * Bp * Zp * 4
    budget = 48 * 1024 * 1024            # conservative: fits v7x's 64 MiB VMEM
    per_t = 2 * Bp * 4 * Zp * sbytes     # double-buffered slab bytes per timestep
    avail = budget - weights_vmem - state_vmem - out_vmem
    t_blk_cap = max(1, min(int(max_t_blk), (avail // per_t) if avail > 0 else 1))

    # Minimal-padding block split of the time axis (never t_blk = 1 fallback).
    n_blk = -(-S // t_blk_cap)
    t_blk = -(-S // n_blk)
    s_pad = n_blk * t_blk
    masked = s_pad != S
    if masked:
        gx0 = jnp.pad(gx0, ((0, s_pad - S), (0, 0), (0, 0)))

    need = weights_vmem + 2 * (t_blk * Bp * 4 * Zp * sbytes) + state_vmem + out_vmem
    vmem_limit = int(min(64 << 20, max(2 * need + (2 << 20), 32 << 20)))

    # Constant-index (resident) operands: single-buffer to halve their VMEM and
    # skip the redundant startup DMA.
    def resident(shape):
        return pl.BlockSpec(shape, lambda i: (0,) * len(shape),
                            pipeline_mode=pl.Buffered(buffer_count=1))

    kernel = functools.partial(_lstm2_rec_kernel, s_real=S, masked=masked)

    out = pl.pallas_call(
        kernel,
        out_shape=jax.ShapeDtypeStruct((Bp, Zp), jnp.float32),
        grid_spec=pltpu.PrefetchScalarGridSpec(
            num_scalar_prefetch=0,
            grid=(n_blk,),
            in_specs=[
                # Streamed pre-activation slab (double-buffered by default).
                pl.BlockSpec((t_blk, Bp, 4 * Zp), lambda i: (i, 0, 0)),
                resident((Zp, 8 * Zp)),      # [Whh0^T | Wih1^T]
                resident((Zp, 4 * Zp)),      # Whh1^T
                resident((1, 4 * Zp)),       # b1
            ],
            out_specs=pl.BlockSpec((Bp, Zp), lambda i: (0, 0)),   # resident output
            scratch_shapes=[pltpu.VMEM((Bp, Zp), jnp.float32) for _ in range(4)]
                          + [pltpu.VMEM((Bp, 4 * Zp), jnp.float32)],
        ),
        compiler_params=pltpu.CompilerParams(
            dimension_semantics=("arbitrary",),   # time recurrence is sequential
            vmem_limit_bytes=vmem_limit,
        ),
    )(gx0, w0stack, whh1_p, b1_p)

    return out[:B, :Z]


# -----------------------------------------------------------------------------
# Parameter init + pure-JAX reference (PyTorch semantics)
# -----------------------------------------------------------------------------
def init_params(key, vocab_size, hidden_dim, z_dim):
    ks = jax.random.split(key, 9)
    k = 1.0 / jnp.sqrt(z_dim)
    u = lambda kk, shape: jax.random.uniform(kk, shape, jnp.float32, -k, k)
    return {
        "embedding": jax.random.normal(ks[0], (vocab_size, hidden_dim), jnp.float32),
        "wih0": u(ks[1], (4 * z_dim, hidden_dim)),
        "whh0": u(ks[2], (4 * z_dim, z_dim)),
        "bih0": u(ks[3], (4 * z_dim,)),
        "bhh0": u(ks[4], (4 * z_dim,)),
        "wih1": u(ks[5], (4 * z_dim, z_dim)),
        "whh1": u(ks[6], (4 * z_dim, z_dim)),
        "bih1": u(ks[7], (4 * z_dim,)),
        "bhh1": u(ks[8], (4 * z_dim,)),
    }


def _reference_forward(x_tokens, params, z_dim):
    """nn.Embedding + 2-layer nn.LSTM(batch_first), zero (h0, c0); last hidden."""
    emb = jnp.take(params["embedding"], x_tokens, axis=0)  # (B, S, H)
    B, S, _ = emb.shape
    Z = z_dim

    def cell(x, h, c, wih, whh, bih, bhh):
        g = x @ wih.T + bih + h @ whh.T + bhh
        i = jax.nn.sigmoid(g[:, 0 * Z:1 * Z])
        f = jax.nn.sigmoid(g[:, 1 * Z:2 * Z])
        gg = jnp.tanh(g[:, 2 * Z:3 * Z])
        o = jax.nn.sigmoid(g[:, 3 * Z:4 * Z])
        c = f * c + i * gg
        h = o * jnp.tanh(c)
        return h, c

    h0 = c0 = h1 = c1 = jnp.zeros((B, Z), jnp.float32)
    for t in range(S):
        x_t = emb[:, t, :]
        h0, c0 = cell(x_t, h0, c0, params["wih0"], params["whh0"],
                      params["bih0"], params["bhh0"])
        h1, c1 = cell(h0, h1, c1, params["wih1"], params["whh1"],
                      params["bih1"], params["bhh1"])
    return h1


if __name__ == "__main__":
    key = jax.random.PRNGKey(0)
    k_tok, k_par, k2_tok, k2_par = jax.random.split(key, 4)

    # --- Config 1: base demo shapes ------------------------------------------
    B, S = 2, 8
    vocab, H, Z = 50, 32, 32
    x = jax.random.randint(k_tok, (B, S), 0, vocab, dtype=jnp.int32)
    params = init_params(k_par, vocab, H, Z)
    ref = _reference_forward(x, params, Z)

    out = jax.block_until_ready(lstm_embed_forward(x, params, z_dim=Z))
    assert out.shape == (B, Z), out.shape
    err = float(jnp.max(jnp.abs(out - ref)))
    assert err < 1e-4, f"f32 max abs err {err}"

    # bf16 weights + f32 pre-activation slab (accuracy-safe middle option).
    out_w16 = jax.block_until_ready(
        lstm_embed_forward(x, params, z_dim=Z, weight_dtype=jnp.bfloat16))
    err_w16 = float(jnp.max(jnp.abs(out_w16 - ref)))
    assert err_w16 < 1e-1, f"bf16-weight max abs err {err_w16}"

    # Full bf16 (weights + slab): halves DMA / resident VMEM, 2x MXU rate.
    out_b16 = jax.block_until_ready(
        lstm_embed_forward(x, params, z_dim=Z,
                           weight_dtype=jnp.bfloat16, gx0_dtype=jnp.bfloat16))
    err_b16 = float(jnp.max(jnp.abs(out_b16 - ref)))
    assert err_b16 < 1e-1, f"bf16 max abs err {err_b16}"

    # --- Config 2: awkward shapes (off-tile B/Z, forced time padding + mask) --
    B2, S2, vocab2, H2, Z2 = 3, 10, 37, 16, 20
    x2 = jax.random.randint(k2_tok, (B2, S2), 0, vocab2, dtype=jnp.int32)
    params2 = init_params(k2_par, vocab2, H2, Z2)
    ref2 = _reference_forward(x2, params2, Z2)
    out2 = jax.block_until_ready(
        lstm_embed_forward(x2, params2, z_dim=Z2, max_t_blk=4))
    assert out2.shape == (B2, Z2), out2.shape
    err2 = float(jnp.max(jnp.abs(out2 - ref2)))
    assert err2 < 1e-4, f"padded-path f32 max abs err {err2}"

    print("KERNEL_OK")
</pallas_src>

<mosaic_0001>
module attributes {stable_mosaic.version = 11 : i64} {
  func.func @_lstm2_rec_kernel(%arg0: i32, %arg1: memref<8x8x512xf32, #tpu.memory_space<vmem>>, %arg2: memref<128x1024xf32, #tpu.memory_space<vmem>>, %arg3: memref<128x512xf32, #tpu.memory_space<vmem>>, %arg4: memref<1x512xf32, #tpu.memory_space<vmem>>, %arg5: memref<8x128xf32, #tpu.memory_space<vmem>>, %arg6: memref<8x128xf32, #tpu.memory_space<vmem>>, %arg7: memref<8x128xf32, #tpu.memory_space<vmem>>, %arg8: memref<8x128xf32, #tpu.memory_space<vmem>>, %arg9: memref<8x128xf32, #tpu.memory_space<vmem>>, %arg10: memref<8x512xf32, #tpu.memory_space<vmem>>) attributes {dimension_semantics = [#tpu.dimension_semantics<arbitrary>], iteration_bounds = array<i64: 1>, scalar_prefetch = 0 : i64, scratch_operands = 5 : i64, tpu.core_type = #tpu.core_type<tc>, window_params = [{transform_indices = @transform_0, window_bounds = array<i64: 8, 8, 512>}, {pipeline_mode = #tpu.pipeline_mode<synchronous>, transform_indices = @transform_1, window_bounds = array<i64: 128, 1024>}, {pipeline_mode = #tpu.pipeline_mode<synchronous>, transform_indices = @transform_2, window_bounds = array<i64: 128, 512>}, {pipeline_mode = #tpu.pipeline_mode<synchronous>, transform_indices = @transform_3, window_bounds = array<i64: 1, 512>}, {pipeline_mode = #tpu.pipeline_mode<synchronous>, transform_indices = @transform_4, window_bounds = array<i64: 8, 128>}]} {
    %c0_i32 = arith.constant 0 : i32
    %0 = arith.cmpi eq, %arg0, %c0_i32 : i32
    %1 = arith.extui %0 : i1 to i32
    %c0_i32_0 = arith.constant 0 : i32
    %2 = arith.cmpi ne, %1, %c0_i32_0 : i32
    scf.if %2 {
      %cst_76 = arith.constant 0.000000e+00 : f32
      %357 = vector.broadcast %cst_76 : f32 to vector<8x128xf32>
      %c0_77 = arith.constant 0 : index
      %c0_78 = arith.constant 0 : index
      %358 = vector.load %arg6[%c0_77, %c0_78] : memref<8x128xf32, #tpu.memory_space<vmem>>, vector<8x128xf32>
      tpu.vector_store %arg6[%c0_77, %c0_78], %357 {strides = array<i32>} : memref<8x128xf32, #tpu.memory_space<vmem>>, vector<8x128xf32>,
      %cst_79 = arith.constant 0.000000e+00 : f32
      %359 = vector.broadcast %cst_79 : f32 to vector<8x128xf32>
      %c0_80 = arith.constant 0 : index
      %c0_81 = arith.constant 0 : index
      %360 = vector.load %arg7[%c0_80, %c0_81] : memref<8x128xf32, #tpu.memory_space<vmem>>, vector<8x128xf32>
      tpu.vector_store %arg7[%c0_80, %c0_81], %359 {strides = array<i32>} : memref<8x128xf32, #tpu.memory_space<vmem>>, vector<8x128xf32>,
      %cst_82 = arith.constant 0.000000e+00 : f32
      %361 = vector.broadcast %cst_82 : f32 to vector<8x128xf32>
      %c0_83 = arith.constant 0 : index
      %c0_84 = arith.constant 0 : index
      %362 = vector.load %arg8[%c0_83, %c0_84] : memref<8x128xf32, #tpu.memory_space<vmem>>, vector<8x128xf32>
      tpu.vector_store %arg8[%c0_83, %c0_84], %361 {strides = array<i32>} : memref<8x128xf32, #tpu.memory_space<vmem>>, vector<8x128xf32>,
      %cst_85 = arith.constant 0.000000e+00 : f32
      %363 = vector.broadcast %cst_85 : f32 to vector<8x128xf32>
      %c0_86 = arith.constant 0 : index
      %c0_87 = arith.constant 0 : index
      %364 = vector.load %arg9[%c0_86, %c0_87] : memref<8x128xf32, #tpu.memory_space<vmem>>, vector<8x128xf32>
      tpu.vector_store %arg9[%c0_86, %c0_87], %363 {strides = array<i32>} : memref<8x128xf32, #tpu.memory_space<vmem>>, vector<8x128xf32>,
      %cst_88 = arith.constant 0.000000e+00 : f32
      %365 = vector.broadcast %cst_88 : f32 to vector<8x512xf32>
      %c0_89 = arith.constant 0 : index
      %c0_90 = arith.constant 0 : index
      %366 = vector.load %arg10[%c0_89, %c0_90] : memref<8x512xf32, #tpu.memory_space<vmem>>, vector<8x512xf32>
      tpu.vector_store %arg10[%c0_89, %c0_90], %365 {strides = array<i32>} : memref<8x512xf32, #tpu.memory_space<vmem>>, vector<8x512xf32>,
    } else {
    }
    %c0 = arith.constant 0 : index
    %c0_1 = arith.constant 0 : index
    %3 = vector.load %arg2[%c0, %c0_1] : memref<128x1024xf32, #tpu.memory_space<vmem>>, vector<128x1024xf32>
    %c0_2 = arith.constant 0 : index
    %c0_3 = arith.constant 0 : index
    %4 = vector.load %arg3[%c0_2, %c0_3] : memref<128x512xf32, #tpu.memory_space<vmem>>, vector<128x512xf32>
    %c0_4 = arith.constant 0 : index
    %c0_5 = arith.constant 0 : index
    %5 = vector.load %arg4[%c0_4, %c0_5] : memref<1x512xf32, #tpu.memory_space<vmem>>, vector<1x512xf32>
    %6 = vector.shape_cast %5 : vector<1x512xf32> to vector<1x512xf32>
    %7 = vector.broadcast %6 : vector<1x512xf32> to vector<8x512xf32>
    %c0_6 = arith.constant 0 : index
    %c0_7 = arith.constant 0 : index
    %8 = vector.load %arg6[%c0_6, %c0_7] : memref<8x128xf32, #tpu.memory_space<vmem>>, vector<8x128xf32>
    %c0_8 = arith.constant 0 : index
    %c0_9 = arith.constant 0 : index
    %9 = vector.load %arg7[%c0_8, %c0_9] : memref<8x128xf32, #tpu.memory_space<vmem>>, vector<8x128xf32>
    %c0_10 = arith.constant 0 : index
    %c0_11 = arith.constant 0 : index
    %10 = vector.load %arg8[%c0_10, %c0_11] : memref<8x128xf32, #tpu.memory_space<vmem>>, vector<8x128xf32>
    %c0_12 = arith.constant 0 : index
    %c0_13 = arith.constant 0 : index
    %11 = vector.load %arg9[%c0_12, %c0_13] : memref<8x128xf32, #tpu.memory_space<vmem>>, vector<8x128xf32>
    %c0_14 = arith.constant 0 : index
    %c0_15 = arith.constant 0 : index
    %12 = vector.load %arg10[%c0_14, %c0_15] : memref<8x512xf32, #tpu.memory_space<vmem>>, vector<8x512xf32>
    %c0_i32_16 = arith.constant 0 : i32
    %cst = arith.constant dense<0.000000e+00> : vector<8x512xf32>
    %13 = tpu.matmul %10, %4, %cst {dimension_numbers = #tpu.dot_dimension_numbers<[1], [0], [0], [1], [0, 0, 1, 1], [], []>} : vector<8x128xf32>, vector<128x512xf32>, vector<8x512xf32> -> vector<8x512xf32>
    %14 = arith.index_cast %c0_i32_16 : i32 to index
    %c0_17 = arith.constant 0 : index
    %c0_18 = arith.constant 0 : index
    %15 = vector.load %arg1[%14, %c0_17, %c0_18] : memref<8x8x512xf32, #tpu.memory_space<vmem>>, vector<1x8x512xf32>
    %16 = vector.shape_cast %15 : vector<1x8x512xf32> to vector<8x512xf32>
    %17 = arith.addf %16, %12 : vector<8x512xf32>
    %18 = vector.extract_strided_slice %17 {offsets = [0, 0], sizes = [8, 384], strides = [1, 1]} : vector<8x512xf32> to vector<8x384xf32>
    %19 = arith.negf %18 : vector<8x384xf32>
    %20 = math.exp %19 : vector<8x384xf32>
    %cst_19 = arith.constant 1.000000e+00 : f32
    %21 = vector.broadcast %cst_19 : f32 to vector<8x384xf32>
    %22 = arith.addf %21, %20 : vector<8x384xf32>
    %23 = arith.divf %21, %22 : vector<8x384xf32>
    %24 = vector.extract_strided_slice %23 {offsets = [0, 0], sizes = [8, 128], strides = [1, 1]} : vector<8x384xf32> to vector<8x128xf32>
    %25 = vector.extract_strided_slice %23 {offsets = [0, 128], sizes = [8, 128], strides = [1, 1]} : vector<8x384xf32> to vector<8x128xf32>
    %26 = vector.extract_strided_slice %23 {offsets = [0, 256], sizes = [8, 128], strides = [1, 1]} : vector<8x384xf32> to vector<8x128xf32>
    %27 = vector.extract_strided_slice %17 {offsets = [0, 384], sizes = [8, 128], strides = [1, 1]} : vector<8x512xf32> to vector<8x128xf32>
    %28 = math.tanh %27 : vector<8x128xf32>
    %29 = arith.mulf %25, %9 : vector<8x128xf32>
    %30 = arith.mulf %24, %28 : vector<8x128xf32>
    %31 = arith.addf %29, %30 : vector<8x128xf32>
    %32 = math.tanh %31 : vector<8x128xf32>
    %33 = arith.mulf %26, %32 : vector<8x128xf32>
    %cst_20 = arith.constant dense<0.000000e+00> : vector<8x1024xf32>
    %34 = tpu.matmul %33, %3, %cst_20 {dimension_numbers = #tpu.dot_dimension_numbers<[1], [0], [0], [1], [0, 0, 1, 1], [], []>} : vector<8x128xf32>, vector<128x1024xf32>, vector<8x1024xf32> -> vector<8x1024xf32>
    %35 = vector.extract_strided_slice %34 {offsets = [0, 0], sizes = [8, 512], strides = [1, 1]} : vector<8x1024xf32> to vector<8x512xf32>
    %36 = vector.extract_strided_slice %34 {offsets = [0, 512], sizes = [8, 512], strides = [1, 1]} : vector<8x1024xf32> to vector<8x512xf32>
    %37 = arith.addf %36, %13 : vector<8x512xf32>
    %38 = arith.addf %37, %7 : vector<8x512xf32>
    %39 = vector.extract_strided_slice %38 {offsets = [0, 0], sizes = [8, 384], strides = [1, 1]} : vector<8x512xf32> to vector<8x384xf32>
    %40 = arith.negf %39 : vector<8x384xf32>
    %41 = math.exp %40 : vector<8x384xf32>
    %cst_21 = arith.constant 1.000000e+00 : f32
    %42 = vector.broadcast %cst_21 : f32 to vector<8x384xf32>
    %43 = arith.addf %42, %41 : vector<8x384xf32>
    %44 = arith.divf %42, %43 : vector<8x384xf32>
    %45 = vector.extract_strided_slice %44 {offsets = [0, 0], sizes = [8, 128], strides = [1, 1]} : vector<8x384xf32> to vector<8x128xf32>
    %46 = vector.extract_strided_slice %44 {offsets = [0, 128], sizes = [8, 128], strides = [1, 1]} : vector<8x384xf32> to vector<8x128xf32>
    %47 = vector.extract_strided_slice %44 {offsets = [0, 256], sizes = [8, 128], strides = [1, 1]} : vector<8x384xf32> to vector<8x128xf32>
    %48 = vector.extract_strided_slice %38 {offsets = [0, 384], sizes = [8, 128], strides = [1, 1]} : vector<8x512xf32> to vector<8x128xf32>
    %49 = math.tanh %48 : vector<8x128xf32>
    %50 = arith.mulf %46, %11 : vector<8x128xf32>
    %51 = arith.mulf %45, %49 : vector<8x128xf32>
    %52 = arith.addf %50, %51 : vector<8x128xf32>
    %53 = math.tanh %52 : vector<8x128xf32>
    %54 = arith.mulf %47, %53 : vector<8x128xf32>
    %c1_i32 = arith.constant 1 : i32
    %cst_22 = arith.constant dense<0.000000e+00> : vector<8x512xf32>
    %55 = tpu.matmul %54, %4, %cst_22 {dimension_numbers = #tpu.dot_dimension_numbers<[1], [0], [0], [1], [0, 0, 1, 1], [], []>} : vector<8x128xf32>, vector<128x512xf32>, vector<8x512xf32> -> vector<8x512xf32>
    %56 = arith.index_cast %c1_i32 : i32 to index
    %c0_23 = arith.constant 0 : index
    %c0_24 = arith.constant 0 : index
    %57 = vector.load %arg1[%56, %c0_23, %c0_24] : memref<8x8x512xf32, #tpu.memory_space<vmem>>, vector<1x8x512xf32>
    %58 = vector.shape_cast %57 : vector<1x8x512xf32> to vector<8x512xf32>
    %59 = arith.addf %58, %35 : vector<8x512xf32>
    %60 = vector.extract_strided_slice %59 {offsets = [0, 0], sizes = [8, 384], strides = [1, 1]} : vector<8x512xf32> to vector<8x384xf32>
    %61 = arith.negf %60 : vector<8x384xf32>
    %62 = math.exp %61 : vector<8x384xf32>
    %cst_25 = arith.constant 1.000000e+00 : f32
    %63 = vector.broadcast %cst_25 : f32 to vector<8x384xf32>
    %64 = arith.addf %63, %62 : vector<8x384xf32>
    %65 = arith.divf %63, %64 : vector<8x384xf32>
    %66 = vector.extract_strided_slice %65 {offsets = [0, 0], sizes = [8, 128], strides = [1, 1]} : vector<8x384xf32> to vector<8x128xf32>
    %67 = vector.extract_strided_slice %65 {offsets = [0, 128], sizes = [8, 128], strides = [1, 1]} : vector<8x384xf32> to vector<8x128xf32>
    %68 = vector.extract_strided_slice %65 {offsets = [0, 256], sizes = [8, 128], strides = [1, 1]} : vector<8x384xf32> to vector<8x128xf32>
    %69 = vector.extract_strided_slice %59 {offsets = [0, 384], sizes = [8, 128], strides = [1, 1]} : vector<8x512xf32> to vector<8x128xf32>
    %70 = math.tanh %69 : vector<8x128xf32>
    %71 = arith.mulf %67, %31 : vector<8x128xf32>
    %72 = arith.mulf %66, %70 : vector<8x128xf32>
    %73 = arith.addf %71, %72 : vector<8x128xf32>
    %74 = math.tanh %73 : vector<8x128xf32>
    %75 = arith.mulf %68, %74 : vector<8x128xf32>
    %cst_26 = arith.constant dense<0.000000e+00> : vector<8x1024xf32>
    %76 = tpu.matmul %75, %3, %cst_26 {dimension_numbers = #tpu.dot_dimension_numbers<[1], [0], [0], [1], [0, 0, 1, 1], [], []>} : vector<8x128xf32>, vector<128x1024xf32>, vector<8x1024xf32> -> vector<8x1024xf32>
    %77 = vector.extract_strided_slice %76 {offsets = [0, 0], sizes = [8, 512], strides = [1, 1]} : vector<8x1024xf32> to vector<8x512xf32>
    %78 = vector.extract_strided_slice %76 {offsets = [0, 512], sizes = [8, 512], strides = [1, 1]} : vector<8x1024xf32> to vector<8x512xf32>
    %79 = arith.addf %78, %55 : vector<8x512xf32>
    %80 = arith.addf %79, %7 : vector<8x512xf32>
    %81 = vector.extract_strided_slice %80 {offsets = [0, 0], sizes = [8, 384], strides = [1, 1]} : vector<8x512xf32> to vector<8x384xf32>
    %82 = arith.negf %81 : vector<8x384xf32>
    %83 = math.exp %82 : vector<8x384xf32>
    %cst_27 = arith.constant 1.000000e+00 : f32
    %84 = vector.broadcast %cst_27 : f32 to vector<8x384xf32>
    %85 = arith.addf %84, %83 : vector<8x384xf32>
    %86 = arith.divf %84, %85 : vector<8x384xf32>
    %87 = vector.extract_strided_slice %86 {offsets = [0, 0], sizes = [8, 128], strides = [1, 1]} : vector<8x384xf32> to vector<8x128xf32>
    %88 = vector.extract_strided_slice %86 {offsets = [0, 128], sizes = [8, 128], strides = [1, 1]} : vector<8x384xf32> to vector<8x128xf32>
    %89 = vector.extract_strided_slice %86 {offsets = [0, 256], sizes = [8, 128], strides = [1, 1]} : vector<8x384xf32> to vector<8x128xf32>
    %90 = vector.extract_strided_slice %80 {offsets = [0, 384], sizes = [8, 128], strides = [1, 1]} : vector<8x512xf32> to vector<8x128xf32>
    %91 = math.tanh %90 : vector<8x128xf32>
    %92 = arith.mulf %88, %52 : vector<8x128xf32>
    %93 = arith.mulf %87, %91 : vector<8x128xf32>
    %94 = arith.addf %92, %93 : vector<8x128xf32>
    %95 = math.tanh %94 : vector<8x128xf32>
    %96 = arith.mulf %89, %95 : vector<8x128xf32>
    %c2_i32 = arith.constant 2 : i32
    %cst_28 = arith.constant dense<0.000000e+00> : vector<8x512xf32>
    %97 = tpu.matmul %96, %4, %cst_28 {dimension_numbers = #tpu.dot_dimension_numbers<[1], [0], [0], [1], [0, 0, 1, 1], [], []>} : vector<8x128xf32>, vector<128x512xf32>, vector<8x512xf32> -> vector<8x512xf32>
    %98 = arith.index_cast %c2_i32 : i32 to index
    %c0_29 = arith.constant 0 : index
    %c0_30 = arith.constant 0 : index
    %99 = vector.load %arg1[%98, %c0_29, %c0_30] : memref<8x8x512xf32, #tpu.memory_space<vmem>>, vector<1x8x512xf32>
    %100 = vector.shape_cast %99 : vector<1x8x512xf32> to vector<8x512xf32>
    %101 = arith.addf %100, %77 : vector<8x512xf32>
    %102 = vector.extract_strided_slice %101 {offsets = [0, 0], sizes = [8, 384], strides = [1, 1]} : vector<8x512xf32> to vector<8x384xf32>
    %103 = arith.negf %102 : vector<8x384xf32>
    %104 = math.exp %103 : vector<8x384xf32>
    %cst_31 = arith.constant 1.000000e+00 : f32
    %105 = vector.broadcast %cst_31 : f32 to vector<8x384xf32>
    %106 = arith.addf %105, %104 : vector<8x384xf32>
    %107 = arith.divf %105, %106 : vector<8x384xf32>
    %108 = vector.extract_strided_slice %107 {offsets = [0, 0], sizes = [8, 128], strides = [1, 1]} : vector<8x384xf32> to vector<8x128xf32>
    %109 = vector.extract_strided_slice %107 {offsets = [0, 128], sizes = [8, 128], strides = [1, 1]} : vector<8x384xf32> to vector<8x128xf32>
    %110 = vector.extract_strided_slice %107 {offsets = [0, 256], sizes = [8, 128], strides = [1, 1]} : vector<8x384xf32> to vector<8x128xf32>
    %111 = vector.extract_strided_slice %101 {offsets = [0, 384], sizes = [8, 128], strides = [1, 1]} : vector<8x512xf32> to vector<8x128xf32>
    %112 = math.tanh %111 : vector<8x128xf32>
    %113 = arith.mulf %109, %73 : vector<8x128xf32>
    %114 = arith.mulf %108, %112 : vector<8x128xf32>
    %115 = arith.addf %113, %114 : vector<8x128xf32>
    %116 = math.tanh %115 : vector<8x128xf32>
    %117 = arith.mulf %110, %116 : vector<8x128xf32>
    %cst_32 = arith.constant dense<0.000000e+00> : vector<8x1024xf32>
    %118 = tpu.matmul %117, %3, %cst_32 {dimension_numbers = #tpu.dot_dimension_numbers<[1], [0], [0], [1], [0, 0, 1, 1], [], []>} : vector<8x128xf32>, vector<128x1024xf32>, vector<8x1024xf32> -> vector<8x1024xf32>
    %119 = vector.extract_strided_slice %118 {offsets = [0, 0], sizes = [8, 512], strides = [1, 1]} : vector<8x1024xf32> to vector<8x512xf32>
    %120 = vector.extract_strided_slice %118 {offsets = [0, 512], sizes = [8, 512], strides = [1, 1]} : vector<8x1024xf32> to vector<8x512xf32>
    %121 = arith.addf %120, %97 : vector<8x512xf32>
    %122 = arith.addf %121, %7 : vector<8x512xf32>
    %123 = vector.extract_strided_slice %122 {offsets = [0, 0], sizes = [8, 384], strides = [1, 1]} : vector<8x512xf32> to vector<8x384xf32>
    %124 = arith.negf %123 : vector<8x384xf32>
    %125 = math.exp %124 : vector<8x384xf32>
    %cst_33 = arith.constant 1.000000e+00 : f32
    %126 = vector.broadcast %cst_33 : f32 to vector<8x384xf32>
    %127 = arith.addf %126, %125 : vector<8x384xf32>
    %128 = arith.divf %126, %127 : vector<8x384xf32>
    %129 = vector.extract_strided_slice %128 {offsets = [0, 0], sizes = [8, 128], strides = [1, 1]} : vector<8x384xf32> to vector<8x128xf32>
    %130 = vector.extract_strided_slice %128 {offsets = [0, 128], sizes = [8, 128], strides = [1, 1]} : vector<8x384xf32> to vector<8x128xf32>
    %131 = vector.extract_strided_slice %128 {offsets = [0, 256], sizes = [8, 128], strides = [1, 1]} : vector<8x384xf32> to vector<8x128xf32>
    %132 = vector.extract_strided_slice %122 {offsets = [0, 384], sizes = [8, 128], strides = [1, 1]} : vector<8x512xf32> to vector<8x128xf32>
    %133 = math.tanh %132 : vector<8x128xf32>
    %134 = arith.mulf %130, %94 : vector<8x128xf32>
    %135 = arith.mulf %129, %133 : vector<8x128xf32>
    %136 = arith.addf %134, %135 : vector<8x128xf32>
    %137 = math.tanh %136 : vector<8x128xf32>
    %138 = arith.mulf %131, %137 : vector<8x128xf32>
    %c3_i32 = arith.constant 3 : i32
    %cst_34 = arith.constant dense<0.000000e+00> : vector<8x512xf32>
    %139 = tpu.matmul %138, %4, %cst_34 {dimension_numbers = #tpu.dot_dimension_numbers<[1], [0], [0], [1], [0, 0, 1, 1], [], []>} : vector<8x128xf32>, vector<128x512xf32>, vector<8x512xf32> -> vector<8x512xf32>
    %140 = arith.index_cast %c3_i32 : i32 to index
    %c0_35 = arith.constant 0 : index
    %c0_36 = arith.constant 0 : index
    %141 = vector.load %arg1[%140, %c0_35, %c0_36] : memref<8x8x512xf32, #tpu.memory_space<vmem>>, vector<1x8x512xf32>
    %142 = vector.shape_cast %141 : vector<1x8x512xf32> to vector<8x512xf32>
    %143 = arith.addf %142, %119 : vector<8x512xf32>
    %144 = vector.extract_strided_slice %143 {offsets = [0, 0], sizes = [8, 384], strides = [1, 1]} : vector<8x512xf32> to vector<8x384xf32>
    %145 = arith.negf %144 : vector<8x384xf32>
    %146 = math.exp %145 : vector<8x384xf32>
    %cst_37 = arith.constant 1.000000e+00 : f32
    %147 = vector.broadcast %cst_37 : f32 to vector<8x384xf32>
    %148 = arith.addf %147, %146 : vector<8x384xf32>
    %149 = arith.divf %147, %148 : vector<8x384xf32>
    %150 = vector.extract_strided_slice %149 {offsets = [0, 0], sizes = [8, 128], strides = [1, 1]} : vector<8x384xf32> to vector<8x128xf32>
    %151 = vector.extract_strided_slice %149 {offsets = [0, 128], sizes = [8, 128], strides = [1, 1]} : vector<8x384xf32> to vector<8x128xf32>
    %152 = vector.extract_strided_slice %149 {offsets = [0, 256], sizes = [8, 128], strides = [1, 1]} : vector<8x384xf32> to vector<8x128xf32>
    %153 = vector.extract_strided_slice %143 {offsets = [0, 384], sizes = [8, 128], strides = [1, 1]} : vector<8x512xf32> to vector<8x128xf32>
    %154 = math.tanh %153 : vector<8x128xf32>
    %155 = arith.mulf %151, %115 : vector<8x128xf32>
    %156 = arith.mulf %150, %154 : vector<8x128xf32>
    %157 = arith.addf %155, %156 : vector<8x128xf32>
    %158 = math.tanh %157 : vector<8x128xf32>
    %159 = arith.mulf %152, %158 : vector<8x128xf32>
    %cst_38 = arith.constant dense<0.000000e+00> : vector<8x1024xf32>
    %160 = tpu.matmul %159, %3, %cst_38 {dimension_numbers = #tpu.dot_dimension_numbers<[1], [0], [0], [1], [0, 0, 1, 1], [], []>} : vector<8x128xf32>, vector<128x1024xf32>, vector<8x1024xf32> -> vector<8x1024xf32>
    %161 = vector.extract_strided_slice %160 {offsets = [0, 0], sizes = [8, 512], strides = [1, 1]} : vector<8x1024xf32> to vector<8x512xf32>
    %162 = vector.extract_strided_slice %160 {offsets = [0, 512], sizes = [8, 512], strides = [1, 1]} : vector<8x1024xf32> to vector<8x512xf32>
    %163 = arith.addf %162, %139 : vector<8x512xf32>
    %164 = arith.addf %163, %7 : vector<8x512xf32>
    %165 = vector.extract_strided_slice %164 {offsets = [0, 0], sizes = [8, 384], strides = [1, 1]} : vector<8x512xf32> to vector<8x384xf32>
    %166 = arith.negf %165 : vector<8x384xf32>
    %167 = math.exp %166 : vector<8x384xf32>
    %cst_39 = arith.constant 1.000000e+00 : f32
    %168 = vector.broadcast %cst_39 : f32 to vector<8x384xf32>
    %169 = arith.addf %168, %167 : vector<8x384xf32>
    %170 = arith.divf %168, %169 : vector<8x384xf32>
    %171 = vector.extract_strided_slice %170 {offsets = [0, 0], sizes = [8, 128], strides = [1, 1]} : vector<8x384xf32> to vector<8x128xf32>
    %172 = vector.extract_strided_slice %170 {offsets = [0, 128], sizes = [8, 128], strides = [1, 1]} : vector<8x384xf32> to vector<8x128xf32>
    %173 = vector.extract_strided_slice %170 {offsets = [0, 256], sizes = [8, 128], strides = [1, 1]} : vector<8x384xf32> to vector<8x128xf32>
    %174 = vector.extract_strided_slice %164 {offsets = [0, 384], sizes = [8, 128], strides = [1, 1]} : vector<8x512xf32> to vector<8x128xf32>
    %175 = math.tanh %174 : vector<8x128xf32>
    %176 = arith.mulf %172, %136 : vector<8x128xf32>
    %177 = arith.mulf %171, %175 : vector<8x128xf32>
    %178 = arith.addf %176, %177 : vector<8x128xf32>
    %179 = math.tanh %178 : vector<8x128xf32>
    %180 = arith.mulf %173, %179 : vector<8x128xf32>
    %c4_i32 = arith.constant 4 : i32
    %cst_40 = arith.constant dense<0.000000e+00> : vector<8x512xf32>
    %181 = tpu.matmul %180, %4, %cst_40 {dimension_numbers = #tpu.dot_dimension_numbers<[1], [0], [0], [1], [0, 0, 1, 1], [], []>} : vector<8x128xf32>, vector<128x512xf32>, vector<8x512xf32> -> vector<8x512xf32>
    %182 = arith.index_cast %c4_i32 : i32 to index
    %c0_41 = arith.constant 0 : index
    %c0_42 = arith.constant 0 : index
    %183 = vector.load %arg1[%182, %c0_41, %c0_42] : memref<8x8x512xf32, #tpu.memory_space<vmem>>, vector<1x8x512xf32>
    %184 = vector.shape_cast %183 : vector<1x8x512xf32> to vector<8x512xf32>
    %185 = arith.addf %184, %161 : vector<8x512xf32>
    %186 = vector.extract_strided_slice %185 {offsets = [0, 0], sizes = [8, 384], strides = [1, 1]} : vector<8x512xf32> to vector<8x384xf32>
    %187 = arith.negf %186 : vector<8x384xf32>
    %188 = math.exp %187 : vector<8x384xf32>
    %cst_43 = arith.constant 1.000000e+00 : f32
    %189 = vector.broadcast %cst_43 : f32 to vector<8x384xf32>
    %190 = arith.addf %189, %188 : vector<8x384xf32>
    %191 = arith.divf %189, %190 : vector<8x384xf32>
    %192 = vector.extract_strided_slice %191 {offsets = [0, 0], sizes = [8, 128], strides = [1, 1]} : vector<8x384xf32> to vector<8x128xf32>
    %193 = vector.extract_strided_slice %191 {offsets = [0, 128], sizes = [8, 128], strides = [1, 1]} : vector<8x384xf32> to vector<8x128xf32>
    %194 = vector.extract_strided_slice %191 {offsets = [0, 256], sizes = [8, 128], strides = [1, 1]} : vector<8x384xf32> to vector<8x128xf32>
    %195 = vector.extract_strided_slice %185 {offsets = [0, 384], sizes = [8, 128], strides = [1, 1]} : vector<8x512xf32> to vector<8x128xf32>
    %196 = math.tanh %195 : vector<8x128xf32>
    %197 = arith.mulf %193, %157 : vector<8x128xf32>
    %198 = arith.mulf %192, %196 : vector<8x128xf32>
    %199 = arith.addf %197, %198 : vector<8x128xf32>
    %200 = math.tanh %199 : vector<8x128xf32>
    %201 = arith.mulf %194, %200 : vector<8x128xf32>
    %cst_44 = arith.constant dense<0.000000e+00> : vector<8x1024xf32>
    %202 = tpu.matmul %201, %3, %cst_44 {dimension_numbers = #tpu.dot_dimension_numbers<[1], [0], [0], [1], [0, 0, 1, 1], [], []>} : vector<8x128xf32>, vector<128x1024xf32>, vector<8x1024xf32> -> vector<8x1024xf32>
    %203 = vector.extract_strided_slice %202 {offsets = [0, 0], sizes = [8, 512], strides = [1, 1]} : vector<8x1024xf32> to vector<8x512xf32>
    %204 = vector.extract_strided_slice %202 {offsets = [0, 512], sizes = [8, 512], strides = [1, 1]} : vector<8x1024xf32> to vector<8x512xf32>
    %205 = arith.addf %204, %181 : vector<8x512xf32>
    %206 = arith.addf %205, %7 : vector<8x512xf32>
    %207 = vector.extract_strided_slice %206 {offsets = [0, 0], sizes = [8, 384], strides = [1, 1]} : vector<8x512xf32> to vector<8x384xf32>
    %208 = arith.negf %207 : vector<8x384xf32>
    %209 = math.exp %208 : vector<8x384xf32>
    %cst_45 = arith.constant 1.000000e+00 : f32
    %210 = vector.broadcast %cst_45 : f32 to vector<8x384xf32>
    %211 = arith.addf %210, %209 : vector<8x384xf32>
    %212 = arith.divf %210, %211 : vector<8x384xf32>
    %213 = vector.extract_strided_slice %212 {offsets = [0, 0], sizes = [8, 128], strides = [1, 1]} : vector<8x384xf32> to vector<8x128xf32>
    %214 = vector.extract_strided_slice %212 {offsets = [0, 128], sizes = [8, 128], strides = [1, 1]} : vector<8x384xf32> to vector<8x128xf32>
    %215 = vector.extract_strided_slice %212 {offsets = [0, 256], sizes = [8, 128], strides = [1, 1]} : vector<8x384xf32> to vector<8x128xf32>
    %216 = vector.extract_strided_slice %206 {offsets = [0, 384], sizes = [8, 128], strides = [1, 1]} : vector<8x512xf32> to vector<8x128xf32>
    %217 = math.tanh %216 : vector<8x128xf32>
    %218 = arith.mulf %214, %178 : vector<8x128xf32>
    %219 = arith.mulf %213, %217 : vector<8x128xf32>
    %220 = arith.addf %218, %219 : vector<8x128xf32>
    %221 = math.tanh %220 : vector<8x128xf32>
    %222 = arith.mulf %215, %221 : vector<8x128xf32>
    %c5_i32 = arith.constant 5 : i32
    %cst_46 = arith.constant dense<0.000000e+00> : vector<8x512xf32>
    %223 = tpu.matmul %222, %4, %cst_46 {dimension_numbers = #tpu.dot_dimension_numbers<[1], [0], [0], [1], [0, 0, 1, 1], [], []>} : vector<8x128xf32>, vector<128x512xf32>, vector<8x512xf32> -> vector<8x512xf32>
    %224 = arith.index_cast %c5_i32 : i32 to index
    %c0_47 = arith.constant 0 : index
    %c0_48 = arith.constant 0 : index
    %225 = vector.load %arg1[%224, %c0_47, %c0_48] : memref<8x8x512xf32, #tpu.memory_space<vmem>>, vector<1x8x512xf32>
    %226 = vector.shape_cast %225 : vector<1x8x512xf32> to vector<8x512xf32>
    %227 = arith.addf %226, %203 : vector<8x512xf32>
    %228 = vector.extract_strided_slice %227 {offsets = [0, 0], sizes = [8, 384], strides = [1, 1]} : vector<8x512xf32> to vector<8x384xf32>
    %229 = arith.negf %228 : vector<8x384xf32>
    %230 = math.exp %229 : vector<8x384xf32>
    %cst_49 = arith.constant 1.000000e+00 : f32
    %231 = vector.broadcast %cst_49 : f32 to vector<8x384xf32>
    %232 = arith.addf %231, %230 : vector<8x384xf32>
    %233 = arith.divf %231, %232 : vector<8x384xf32>
    %234 = vector.extract_strided_slice %233 {offsets = [0, 0], sizes = [8, 128], strides = [1, 1]} : vector<8x384xf32> to vector<8x128xf32>
    %235 = vector.extract_strided_slice %233 {offsets = [0, 128], sizes = [8, 128], strides = [1, 1]} : vector<8x384xf32> to vector<8x128xf32>
    %236 = vector.extract_strided_slice %233 {offsets = [0, 256], sizes = [8, 128], strides = [1, 1]} : vector<8x384xf32> to vector<8x128xf32>
    %237 = vector.extract_strided_slice %227 {offsets = [0, 384], sizes = [8, 128], strides = [1, 1]} : vector<8x512xf32> to vector<8x128xf32>
    %238 = math.tanh %237 : vector<8x128xf32>
    %239 = arith.mulf %235, %199 : vector<8x128xf32>
    %240 = arith.mulf %234, %238 : vector<8x128xf32>
    %241 = arith.addf %239, %240 : vector<8x128xf32>
    %242 = math.tanh %241 : vector<8x128xf32>
    %243 = arith.mulf %236, %242 : vector<8x128xf32>
    %cst_50 = arith.constant dense<0.000000e+00> : vector<8x1024xf32>
    %244 = tpu.matmul %243, %3, %cst_50 {dimension_numbers = #tpu.dot_dimension_numbers<[1], [0], [0], [1], [0, 0, 1, 1], [], []>} : vector<8x128xf32>, vector<128x1024xf32>, vector<8x1024xf32> -> vector<8x1024xf32>
    %245 = vector.extract_strided_slice %244 {offsets = [0, 0], sizes = [8, 512], strides = [1, 1]} : vector<8x1024xf32> to vector<8x512xf32>
    %246 = vector.extract_strided_slice %244 {offsets = [0, 512], sizes = [8, 512], strides = [1, 1]} : vector<8x1024xf32> to vector<8x512xf32>
    %247 = arith.addf %246, %223 : vector<8x512xf32>
    %248 = arith.addf %247, %7 : vector<8x512xf32>
    %249 = vector.extract_strided_slice %248 {offsets = [0, 0], sizes = [8, 384], strides = [1, 1]} : vector<8x512xf32> to vector<8x384xf32>
    %250 = arith.negf %249 : vector<8x384xf32>
    %251 = math.exp %250 : vector<8x384xf32>
    %cst_51 = arith.constant 1.000000e+00 : f32
    %252 = vector.broadcast %cst_51 : f32 to vector<8x384xf32>
    %253 = arith.addf %252, %251 : vector<8x384xf32>
    %254 = arith.divf %252, %253 : vector<8x384xf32>
    %255 = vector.extract_strided_slice %254 {offsets = [0, 0], sizes = [8, 128], strides = [1, 1]} : vector<8x384xf32> to vector<8x128xf32>
    %256 = vector.extract_strided_slice %254 {offsets = [0, 128], sizes = [8, 128], strides = [1, 1]} : vector<8x384xf32> to vector<8x128xf32>
    %257 = vector.extract_strided_slice %254 {offsets = [0, 256], sizes = [8, 128], strides = [1, 1]} : vector<8x384xf32> to vector<8x128xf32>
    %258 = vector.extract_strided_slice %248 {offsets = [0, 384], sizes = [8, 128], strides = [1, 1]} : vector<8x512xf32> to vector<8x128xf32>
    %259 = math.tanh %258 : vector<8x128xf32>
    %260 = arith.mulf %256, %220 : vector<8x128xf32>
    %261 = arith.mulf %255, %259 : vector<8x128xf32>
    %262 = arith.addf %260, %261 : vector<8x128xf32>
    %263 = math.tanh %262 : vector<8x128xf32>
    %264 = arith.mulf %257, %263 : vector<8x128xf32>
    %c6_i32 = arith.constant 6 : i32
    %cst_52 = arith.constant dense<0.000000e+00> : vector<8x512xf32>
    %265 = tpu.matmul %264, %4, %cst_52 {dimension_numbers = #tpu.dot_dimension_numbers<[1], [0], [0], [1], [0, 0, 1, 1], [], []>} : vector<8x128xf32>, vector<128x512xf32>, vector<8x512xf32> -> vector<8x512xf32>
    %266 = arith.index_cast %c6_i32 : i32 to index
    %c0_53 = arith.constant 0 : index
    %c0_54 = arith.constant 0 : index
    %267 = vector.load %arg1[%266, %c0_53, %c0_54] : memref<8x8x512xf32, #tpu.memory_space<vmem>>, vector<1x8x512xf32>
    %268 = vector.shape_cast %267 : vector<1x8x512xf32> to vector<8x512xf32>
    %269 = arith.addf %268, %245 : vector<8x512xf32>
    %270 = vector.extract_strided_slice %269 {offsets = [0, 0], sizes = [8, 384], strides = [1, 1]} : vector<8x512xf32> to vector<8x384xf32>
    %271 = arith.negf %270 : vector<8x384xf32>
    %272 = math.exp %271 : vector<8x384xf32>
    %cst_55 = arith.constant 1.000000e+00 : f32
    %273 = vector.broadcast %cst_55 : f32 to vector<8x384xf32>
    %274 = arith.addf %273, %272 : vector<8x384xf32>
    %275 = arith.divf %273, %274 : vector<8x384xf32>
    %276 = vector.extract_strided_slice %275 {offsets = [0, 0], sizes = [8, 128], strides = [1, 1]} : vector<8x384xf32> to vector<8x128xf32>
    %277 = vector.extract_strided_slice %275 {offsets = [0, 128], sizes = [8, 128], strides = [1, 1]} : vector<8x384xf32> to vector<8x128xf32>
    %278 = vector.extract_strided_slice %275 {offsets = [0, 256], sizes = [8, 128], strides = [1, 1]} : vector<8x384xf32> to vector<8x128xf32>
    %279 = vector.extract_strided_slice %269 {offsets = [0, 384], sizes = [8, 128], strides = [1, 1]} : vector<8x512xf32> to vector<8x128xf32>
    %280 = math.tanh %279 : vector<8x128xf32>
    %281 = arith.mulf %277, %241 : vector<8x128xf32>
    %282 = arith.mulf %276, %280 : vector<8x128xf32>
    %283 = arith.addf %281, %282 : vector<8x128xf32>
    %284 = math.tanh %283 : vector<8x128xf32>
    %285 = arith.mulf %278, %284 : vector<8x128xf32>
    %cst_56 = arith.constant dense<0.000000e+00> : vector<8x1024xf32>
    %286 = tpu.matmul %285, %3, %cst_56 {dimension_numbers = #tpu.dot_dimension_numbers<[1], [0], [0], [1], [0, 0, 1, 1], [], []>} : vector<8x128xf32>, vector<128x1024xf32>, vector<8x1024xf32> -> vector<8x1024xf32>
    %287 = vector.extract_strided_slice %286 {offsets = [0, 0], sizes = [8, 512], strides = [1, 1]} : vector<8x1024xf32> to vector<8x512xf32>
    %288 = vector.extract_strided_slice %286 {offsets = [0, 512], sizes = [8, 512], strides = [1, 1]} : vector<8x1024xf32> to vector<8x512xf32>
    %289 = arith.addf %288, %265 : vector<8x512xf32>
    %290 = arith.addf %289, %7 : vector<8x512xf32>
    %291 = vector.extract_strided_slice %290 {offsets = [0, 0], sizes = [8, 384], strides = [1, 1]} : vector<8x512xf32> to vector<8x384xf32>
    %292 = arith.negf %291 : vector<8x384xf32>
    %293 = math.exp %292 : vector<8x384xf32>
    %cst_57 = arith.constant 1.000000e+00 : f32
    %294 = vector.broadcast %cst_57 : f32 to vector<8x384xf32>
    %295 = arith.addf %294, %293 : vector<8x384xf32>
    %296 = arith.divf %294, %295 : vector<8x384xf32>
    %297 = vector.extract_strided_slice %296 {offsets = [0, 0], sizes = [8, 128], strides = [1, 1]} : vector<8x384xf32> to vector<8x128xf32>
    %298 = vector.extract_strided_slice %296 {offsets = [0, 128], sizes = [8, 128], strides = [1, 1]} : vector<8x384xf32> to vector<8x128xf32>
    %299 = vector.extract_strided_slice %296 {offsets = [0, 256], sizes = [8, 128], strides = [1, 1]} : vector<8x384xf32> to vector<8x128xf32>
    %300 = vector.extract_strided_slice %290 {offsets = [0, 384], sizes = [8, 128], strides = [1, 1]} : vector<8x512xf32> to vector<8x128xf32>
    %301 = math.tanh %300 : vector<8x128xf32>
    %302 = arith.mulf %298, %262 : vector<8x128xf32>
    %303 = arith.mulf %297, %301 : vector<8x128xf32>
    %304 = arith.addf %302, %303 : vector<8x128xf32>
    %305 = math.tanh %304 : vector<8x128xf32>
    %306 = arith.mulf %299, %305 : vector<8x128xf32>
    %c7_i32 = arith.constant 7 : i32
    %cst_58 = arith.constant dense<0.000000e+00> : vector<8x512xf32>
    %307 = tpu.matmul %306, %4, %cst_58 {dimension_numbers = #tpu.dot_dimension_numbers<[1], [0], [0], [1], [0, 0, 1, 1], [], []>} : vector<8x128xf32>, vector<128x512xf32>, vector<8x512xf32> -> vector<8x512xf32>
    %308 = arith.index_cast %c7_i32 : i32 to index
    %c0_59 = arith.constant 0 : index
    %c0_60 = arith.constant 0 : index
    %309 = vector.load %arg1[%308, %c0_59, %c0_60] : memref<8x8x512xf32, #tpu.memory_space<vmem>>, vector<1x8x512xf32>
    %310 = vector.shape_cast %309 : vector<1x8x512xf32> to vector<8x512xf32>
    %311 = arith.addf %310, %287 : vector<8x512xf32>
    %312 = vector.extract_strided_slice %311 {offsets = [0, 0], sizes = [8, 384], strides = [1, 1]} : vector<8x512xf32> to vector<8x384xf32>
    %313 = arith.negf %312 : vector<8x384xf32>
    %314 = math.exp %313 : vector<8x384xf32>
    %cst_61 = arith.constant 1.000000e+00 : f32
    %315 = vector.broadcast %cst_61 : f32 to vector<8x384xf32>
    %316 = arith.addf %315, %314 : vector<8x384xf32>
    %317 = arith.divf %315, %316 : vector<8x384xf32>
    %318 = vector.extract_strided_slice %317 {offsets = [0, 0], sizes = [8, 128], strides = [1, 1]} : vector<8x384xf32> to vector<8x128xf32>
    %319 = vector.extract_strided_slice %317 {offsets = [0, 128], sizes = [8, 128], strides = [1, 1]} : vector<8x384xf32> to vector<8x128xf32>
    %320 = vector.extract_strided_slice %317 {offsets = [0, 256], sizes = [8, 128], strides = [1, 1]} : vector<8x384xf32> to vector<8x128xf32>
    %321 = vector.extract_strided_slice %311 {offsets = [0, 384], sizes = [8, 128], strides = [1, 1]} : vector<8x512xf32> to vector<8x128xf32>
    %322 = math.tanh %321 : vector<8x128xf32>
    %323 = arith.mulf %319, %283 : vector<8x128xf32>
    %324 = arith.mulf %318, %322 : vector<8x128xf32>
    %325 = arith.addf %323, %324 : vector<8x128xf32>
    %326 = math.tanh %325 : vector<8x128xf32>
    %327 = arith.mulf %320, %326 : vector<8x128xf32>
    %cst_62 = arith.constant dense<0.000000e+00> : vector<8x1024xf32>
    %328 = tpu.matmul %327, %3, %cst_62 {dimension_numbers = #tpu.dot_dimension_numbers<[1], [0], [0], [1], [0, 0, 1, 1], [], []>} : vector<8x128xf32>, vector<128x1024xf32>, vector<8x1024xf32> -> vector<8x1024xf32>
    %329 = vector.extract_strided_slice %328 {offsets = [0, 0], sizes = [8, 512], strides = [1, 1]} : vector<8x1024xf32> to vector<8x512xf32>
    %330 = vector.extract_strided_slice %328 {offsets = [0, 512], sizes = [8, 512], strides = [1, 1]} : vector<8x1024xf32> to vector<8x512xf32>
    %331 = arith.addf %330, %307 : vector<8x512xf32>
    %332 = arith.addf %331, %7 : vector<8x512xf32>
    %333 = vector.extract_strided_slice %332 {offsets = [0, 0], sizes = [8, 384], strides = [1, 1]} : vector<8x512xf32> to vector<8x384xf32>
    %334 = arith.negf %333 : vector<8x384xf32>
    %335 = math.exp %334 : vector<8x384xf32>
    %cst_63 = arith.constant 1.000000e+00 : f32
    %336 = vector.broadcast %cst_63 : f32 to vector<8x384xf32>
    %337 = arith.addf %336, %335 : vector<8x384xf32>
    %338 = arith.divf %336, %337 : vector<8x384xf32>
    %339 = vector.extract_strided_slice %338 {offsets = [0, 0], sizes = [8, 128], strides = [1, 1]} : vector<8x384xf32> to vector<8x128xf32>
    %340 = vector.extract_strided_slice %338 {offsets = [0, 128], sizes = [8, 128], strides = [1, 1]} : vector<8x384xf32> to vector<8x128xf32>
    %341 = vector.extract_strided_slice %338 {offsets = [0, 256], sizes = [8, 128], strides = [1, 1]} : vector<8x384xf32> to vector<8x128xf32>
    %342 = vector.extract_strided_slice %332 {offsets = [0, 384], sizes = [8, 128], strides = [1, 1]} : vector<8x512xf32> to vector<8x128xf32>
    %343 = math.tanh %342 : vector<8x128xf32>
    %344 = arith.mulf %340, %304 : vector<8x128xf32>
    %345 = arith.mulf %339, %343 : vector<8x128xf32>
    %346 = arith.addf %344, %345 : vector<8x128xf32>
    %347 = math.tanh %346 : vector<8x128xf32>
    %348 = arith.mulf %341, %347 : vector<8x128xf32>
    %c8_i32 = arith.constant 8 : i32
    %c0_64 = arith.constant 0 : index
    %c0_65 = arith.constant 0 : index
    %349 = vector.load %arg6[%c0_64, %c0_65] : memref<8x128xf32, #tpu.memory_space<vmem>>, vector<8x128xf32>
    tpu.vector_store %arg6[%c0_64, %c0_65], %327 {strides = array<i32>} : memref<8x128xf32, #tpu.memory_space<vmem>>, vector<8x128xf32>,
    %c0_66 = arith.constant 0 : index
    %c0_67 = arith.constant 0 : index
    %350 = vector.load %arg7[%c0_66, %c0_67] : memref<8x128xf32, #tpu.memory_space<vmem>>, vector<8x128xf32>
    tpu.vector_store %arg7[%c0_66, %c0_67], %325 {strides = array<i32>} : memref<8x128xf32, #tpu.memory_space<vmem>>, vector<8x128xf32>,
    %c0_68 = arith.constant 0 : index
    %c0_69 = arith.constant 0 : index
    %351 = vector.load %arg8[%c0_68, %c0_69] : memref<8x128xf32, #tpu.memory_space<vmem>>, vector<8x128xf32>
    tpu.vector_store %arg8[%c0_68, %c0_69], %348 {strides = array<i32>} : memref<8x128xf32, #tpu.memory_space<vmem>>, vector<8x128xf32>,
    %c0_70 = arith.constant 0 : index
    %c0_71 = arith.constant 0 : index
    %352 = vector.load %arg9[%c0_70, %c0_71] : memref<8x128xf32, #tpu.memory_space<vmem>>, vector<8x128xf32>
    tpu.vector_store %arg9[%c0_70, %c0_71], %346 {strides = array<i32>} : memref<8x128xf32, #tpu.memory_space<vmem>>, vector<8x128xf32>,
    %c0_72 = arith.constant 0 : index
    %c0_73 = arith.constant 0 : index
    %353 = vector.load %arg10[%c0_72, %c0_73] : memref<8x512xf32, #tpu.memory_space<vmem>>, vector<8x512xf32>
    tpu.vector_store %arg10[%c0_72, %c0_73], %329 {strides = array<i32>} : memref<8x512xf32, #tpu.memory_space<vmem>>, vector<8x512xf32>,
    %c0_i32_74 = arith.constant 0 : i32
    %354 = arith.cmpi eq, %arg0, %c0_i32_74 : i32
    %355 = arith.extui %354 : i1 to i32
    %c0_i32_75 = arith.constant 0 : i32
    %356 = arith.cmpi ne, %355, %c0_i32_75 : i32
    scf.if %356 {
      %c0_76 = arith.constant 0 : index
      %c0_77 = arith.constant 0 : index
      %357 = vector.load %arg5[%c0_76, %c0_77] : memref<8x128xf32, #tpu.memory_space<vmem>>, vector<8x128xf32>
      tpu.vector_store %arg5[%c0_76, %c0_77], %348 {strides = array<i32>} : memref<8x128xf32, #tpu.memory_space<vmem>>, vector<8x128xf32>,
    } else {
    }
    return
  }
  func.func @transform_0(%arg0: i32) -> (i32, i32, i32) {
    %c0_i32 = arith.constant 0 : i32
    %c0_i32_0 = arith.constant 0 : i32
    %c0_i32_1 = arith.constant 0 : i32
    return %arg0, %c0_i32, %c0_i32_0 : i32, i32, i32
  }
  func.func @transform_1(%arg0: i32) -> (i32, i32) {
    %c0_i32 = arith.constant 0 : i32
    %c0_i32_0 = arith.constant 0 : i32
    %c0_i32_1 = arith.constant 0 : i32
    return %c0_i32, %c0_i32_0 : i32, i32
  }
  func.func @transform_2(%arg0: i32) -> (i32, i32) {
    %c0_i32 = arith.constant 0 : i32
    %c0_i32_0 = arith.constant 0 : i32
    %c0_i32_1 = arith.constant 0 : i32
    return %c0_i32, %c0_i32_0 : i32, i32
  }
  func.func @transform_3(%arg0: i32) -> (i32, i32) {
    %c0_i32 = arith.constant 0 : i32
    %c0_i32_0 = arith.constant 0 : i32
    %c0_i32_1 = arith.constant 0 : i32
    return %c0_i32, %c0_i32_0 : i32, i32
  }
  func.func @transform_4(%arg0: i32) -> (i32, i32) {
    %c0_i32 = arith.constant 0 : i32
    %c0_i32_0 = arith.constant 0 : i32
    %c0_i32_1 = arith.constant 0 : i32
    return %c0_i32, %c0_i32_0 : i32, i32
  }
}

</mosaic_0001>

<bundles_post_ra>
// kernel: lstm_embed_forward.1
= control target key start
LH: loop header
LB: loop body
LE: loop exit
PB: predicated region body
PF: predicated region fallthrough
CT: control target
= control target key end

     0   :  { %v7924_v3 = vmov 0.0   ;;  %s7919_s2 = inlined_call_operand.vmem [shape: f32[128,512], index: 2, kind: input, shape index: {}]   ;;  %s7920_s1 = inlined_call_operand.vmem [shape: f32[128,1024], index: 1, kind: input, shape index: {}]   ;;  %s7921_s0 = inlined_call_operand.vmem [shape: f32[8,8,512], index: 0, kind: input, shape index: {}]   ;;  %s7922_s3 = inlined_call_operand.vmem [shape: f32[1,512], index: 3, kind: input, shape index: {}]   ;;  %s7923_s4 = inlined_call_operand.vmem [shape: f32[8,128], index: 4, kind: output, shape index: {}]  }
   0x1   :  { %v158_v0 = vld [vmem:[%s7919_s2 + $0x8] sm:$0xff]  ;;  %v160_v2 = vld [vmem:[%s7919_s2 + $0x18] sm:$0xff]  ;;  %314 = vmatprep.mubr.f32.mxu0 %v7924_v3  ;;  %385 = vmatprep.mubr.f32.mxu1 %v7924_v3  ;;  %v157_v6 = vld [vmem:[%s7919_s2] sm:$0xff] }
   0x2   :  { %v162_v1 = vld [vmem:[%s7919_s2 + $0x28] sm:$0xff]  ;;  %v164_v5 = vld [vmem:[%s7919_s2 + $0x38] sm:$0xff]  ;;  %v161_v7 = vld [vmem:[%s7919_s2 + $0x20] sm:$0xff] }
   0x3   :  { %v6131_v4 = vpack.c.bf16 %v162_v1, %v158_v0  ;;  %v6142_v8 = vpack.c.bf16 %v164_v5, %v160_v2  ;;  %v6144_v9 = vpack.c.bf16 %v161_v7, %v157_v6  ;;  %v159_v10 = vld [vmem:[%s7919_s2 + $0x10] sm:$0xff]  ;;  %v166_v12 = vld [vmem:[%s7919_s2 + $0x48] sm:$0xff]  ;;  %v168_v15 = vld [vmem:[%s7919_s2 + $0x58] sm:$0xff] }
   0x4   :  { %v163_v11 = vld [vmem:[%s7919_s2 + $0x30] sm:$0xff]  ;;  %v170_v14 = vld [vmem:[%s7919_s2 + $0x68] sm:$0xff]  ;;  %v172_v16 = vld [vmem:[%s7919_s2 + $0x78] sm:$0xff] }
   0x5   :  { %8114 = vst [vmem:[#allocation7_spill] sm:$0xff] %v6131_v4  ;;  %8115 = vst [vmem:[#allocation8_spill] sm:$0xff] %v6142_v8  ;;  %4270 = vmatprep.subr.bf16.mxu0 %v6131_v4  ;;  %v6156_v13 = vpack.c.bf16 %v163_v11, %v159_v10  ;;  %4302 = vmatprep.subr.bf16.mxu1 %v6142_v8  ;;  %v6169_v17 = vpack.c.bf16 %v170_v14, %v166_v12  ;;  %v165_v19 = vld [vmem:[%s7919_s2 + $0x40] sm:$0xff]  ;;  %v167_v21 = vld [vmem:[%s7919_s2 + $0x50] sm:$0xff] }
   0x6   :  { %8116 = vst [vmem:[#allocation9_spill] sm:$0xff] %v6144_v9  ;;  %4272 = vmatpush1.bf16.msra.mxu0 %v6144_v9  ;;  %v6171_v18 = vpack.c.bf16 %v172_v16, %v168_v15  ;;  %v169_v20 = vld [vmem:[%s7919_s2 + $0x60] sm:$0xff]  ;;  %v171_v23 = vld [vmem:[%s7919_s2 + $0x70] sm:$0xff]  ;;  %v174_v24 = vld [vmem:[%s7919_s2 + $0x88] sm:$0xff] }
   0x7   :  { %8117 = vst [vmem:[#allocation10_spill] sm:$0xff] %v6156_v13  ;;  %8118 = vst [vmem:[#allocation11_spill] sm:$0xff] %v6169_v17  ;;  %4304 = vmatpush1.bf16.msra.mxu1 %v6156_v13  ;;  %v6183_v22 = vpack.c.bf16 %v169_v20, %v165_v19  ;;  %v178_v25 = vld [vmem:[%s7919_s2 + $0xa8] sm:$0xff]  ;;  %4274 = vmatprep.subr.bf16.mxu0 %v6169_v17  ;;  %v6196_v26 = vpack.c.bf16 %v171_v23, %v167_v21  ;;  %v176_v28 = vld [vmem:[%s7919_s2 + $0x98] sm:$0xff] }
   0x8   :  { %8119 = vst [vmem:[#allocation12_spill] sm:$0xff] %v6171_v18  ;;  %4306 = vmatprep.subr.bf16.mxu1 %v6171_v18  ;;  %v6198_v27 = vpack.c.bf16 %v178_v25, %v174_v24  ;;  %v180_v29 = vld [vmem:[%s7919_s2 + $0xb8] sm:$0xff]  ;;  %v173_v30 = vld [vmem:[%s7919_s2 + $0x80] sm:$0xff]  ;;  %v175_v33 = vld [vmem:[%s7919_s2 + $0x90] sm:$0xff] }
   0x9   :  { %8120 = vst [vmem:[#allocation13_spill] sm:$0xff] %v6183_v22  ;;  %8121 = vst [vmem:[#allocation14_spill] sm:$0xff] %v6196_v26  ;;  %v6209_v31 = vpack.c.bf16 %v180_v29, %v176_v28  ;;  %v177_v32 = vld [vmem:[%s7919_s2 + $0xa0] sm:$0xff]  ;;  %v179_v34 = vld [vmem:[%s7919_s2 + $0xb0] sm:$0xff] }
   0xa   :  { %8122 = vst [vmem:[#allocation15_spill] sm:$0xff] %v6198_v27  ;;  %4276 = vmatpush1.bf16.msra.mxu0 %v6183_v22  ;;  %v6221_v35 = vpack.c.bf16 %v177_v32, %v173_v30  ;;  %v182_v36 = vld [vmem:[%s7919_s2 + $0xc8] sm:$0xff]  ;;  %v184_v38 = vld [vmem:[%s7919_s2 + $0xd8] sm:$0xff]  ;;  %v6234_v39 = vpack.c.bf16 %v179_v34, %v175_v33  ;;  %v181_v42 = vld [vmem:[%s7919_s2 + $0xc0] sm:$0xff] }
   0xb   :  { %8123 = vst [vmem:[#allocation16_spill] sm:$0xff] %v6209_v31  ;;  %v186_v37 = vld [vmem:[%s7919_s2 + $0xe8] sm:$0xff]  ;;  %4308 = vmatpush1.bf16.msra.mxu1 %v6196_v26  ;;  %4278 = vmatprep.subr.bf16.mxu0 %v6198_v27  ;;  %v188_v41 = vld [vmem:[%s7919_s2 + $0xf8] sm:$0xff]  ;;  %v185_v43 = vld [vmem:[%s7919_s2 + $0xe0] sm:$0xff] }
   0xc   :  { %8124 = vst [vmem:[#allocation17_spill] sm:$0xff] %v6221_v35  ;;  %8125 = vst [vmem:[#allocation18_spill] sm:$0xff] %v6234_v39  ;;  %v6236_v40 = vpack.c.bf16 %v186_v37, %v182_v36  ;;  %4310 = vmatprep.subr.bf16.mxu1 %v6209_v31  ;;  %v6248_v44 = vpack.c.bf16 %v188_v41, %v184_v38  ;;  %v183_v45 = vld [vmem:[%s7919_s2 + $0xd0] sm:$0xff]  ;;  %v190_v47 = vld [vmem:[%s7919_s2 + $0x108] sm:$0xff]  ;;  %v6269_v51 = vpack.c.bf16 %v185_v43, %v181_v42 }
   0xd   :  { %v187_v46 = vld [vmem:[%s7919_s2 + $0xf0] sm:$0xff]  ;;  %v194_v48 = vld [vmem:[%s7919_s2 + $0x128] sm:$0xff]  ;;  %v192_v49 = vld [vmem:[%s7919_s2 + $0x118] sm:$0xff] }
   0xe   :  { %8126 = vst [vmem:[#allocation19_spill] sm:$0xff] %v6236_v40  ;;  %8127 = vst [vmem:[#allocation20_spill] sm:$0xff] %v6248_v44  ;;  %v196_v50 = vld [vmem:[%s7919_s2 + $0x138] sm:$0xff]  ;;  %4280 = vmatpush1.bf16.msra.mxu0 %v6221_v35  ;;  %v6273_v52 = vpack.c.bf16 %v187_v46, %v183_v45  ;;  %v6275_v53 = vpack.c.bf16 %v194_v48, %v190_v47  ;;  %v189_v54 = vld [vmem:[%s7919_s2 + $0x100] sm:$0xff] }
   0xf   :  { %8128 = vst [vmem:[#allocation21_spill] sm:$0xff] %v6269_v51  ;;  %4312 = vmatpush1.bf16.msra.mxu1 %v6234_v39  ;;  %4282 = vmatprep.subr.bf16.mxu0 %v6236_v40  ;;  %v193_v55 = vld [vmem:[%s7919_s2 + $0x120] sm:$0xff]  ;;  %v191_v56 = vld [vmem:[%s7919_s2 + $0x110] sm:$0xff]  ;;  %v6287_v57 = vpack.c.bf16 %v196_v50, %v192_v49  ;;  %v198_v59 = vld [vmem:[%s7919_s2 + $0x148] sm:$0xff] }
  0x10   :  { %8129 = vst [vmem:[#allocation22_spill] sm:$0xff] %v6273_v52  ;;  %8130 = vst [vmem:[#allocation23_spill] sm:$0xff] %v6275_v53  ;;  %4314 = vmatprep.subr.bf16.mxu1 %v6248_v44  ;;  %v195_v58 = vld [vmem:[%s7919_s2 + $0x130] sm:$0xff]  ;;  %v202_v60 = vld [vmem:[%s7919_s2 + $0x168] sm:$0xff]  ;;  %v6305_v63 = vpack.c.bf16 %v193_v55, %v189_v54 }
  0x11   :  { %8131 = vst [vmem:[#allocation24_spill] sm:$0xff] %v6287_v57  ;;  %v200_v61 = vld [vmem:[%s7919_s2 + $0x158] sm:$0xff]  ;;  %v6309_v0 = vpack.c.bf16 %v195_v58, %v191_v56  ;;  %v6311_v1 = vpack.c.bf16 %v202_v60, %v198_v59  ;;  %v197_v2 = vld [vmem:[%s7919_s2 + $0x140] sm:$0xff]  ;;  %v199_v6 = vld [vmem:[%s7919_s2 + $0x150] sm:$0xff] }
  0x12   :  { %v204_v62 = vld [vmem:[%s7919_s2 + $0x178] sm:$0xff]  ;;  %4284 = vmatpush1.bf16.msra.mxu0 %v6269_v51  ;;  %8132 = vst [vmem:[#allocation25_spill] sm:$0xff] %v6305_v63  ;;  %v201_v5 = vld [vmem:[%s7919_s2 + $0x160] sm:$0xff]  ;;  %v203_v10 = vld [vmem:[%s7919_s2 + $0x170] sm:$0xff] }
  0x13   :  { %4316 = vmatpush1.bf16.msra.mxu1 %v6273_v52  ;;  %4286 = vmatprep.subr.bf16.mxu0 %v6275_v53  ;;  %8133 = vst [vmem:[#allocation26_spill] sm:$0xff] %v6309_v0  ;;  %8134 = vst [vmem:[#allocation27_spill] sm:$0xff] %v6311_v1  ;;  %v6323_v7 = vpack.c.bf16 %v204_v62, %v200_v61  ;;  %v206_v11 = vld [vmem:[%s7919_s2 + $0x188] sm:$0xff]  ;;  %v208_v14 = vld [vmem:[%s7919_s2 + $0x198] sm:$0xff]  ;;  %v6341_v16 = vpack.c.bf16 %v201_v5, %v197_v2 }
  0x14   :  { %4318 = vmatprep.subr.bf16.mxu1 %v6287_v57  ;;  %v210_v12 = vld [vmem:[%s7919_s2 + $0x1a8] sm:$0xff]  ;;  %v212_v15 = vld [vmem:[%s7919_s2 + $0x1b8] sm:$0xff]  ;;  %v6345_v19 = vpack.c.bf16 %v203_v10, %v199_v6  ;;  %v205_v21 = vld [vmem:[%s7919_s2 + $0x180] sm:$0xff] }
  0x15   :  { %8135 = vst [vmem:[#allocation28_spill] sm:$0xff] %v6323_v7  ;;  %8136 = vst [vmem:[#allocation29_spill] sm:$0xff] %v6341_v16  ;;  %v6347_v20 = vpack.c.bf16 %v210_v12, %v206_v11  ;;  %v209_v23 = vld [vmem:[%s7919_s2 + $0x1a0] sm:$0xff]  ;;  %v207_v24 = vld [vmem:[%s7919_s2 + $0x190] sm:$0xff]  ;;  %v6359_v25 = vpack.c.bf16 %v212_v15, %v208_v14 }
  0x16   :  { %4288 = vmatpush1.bf16.msra.mxu0 %v6305_v63  ;;  %8137 = vst [vmem:[#allocation30_spill] sm:$0xff] %v6345_v19  ;;  %v211_v28 = vld [vmem:[%s7919_s2 + $0x1b0] sm:$0xff]  ;;  %v214_v29 = vld [vmem:[%s7919_s2 + $0x1c8] sm:$0xff]  ;;  %v216_v32 = vld [vmem:[%s7919_s2 + $0x1d8] sm:$0xff]  ;;  %v6377_v34 = vpack.c.bf16 %v209_v23, %v205_v21 }
  0x17   :  { %4320 = vmatpush1.bf16.msra.mxu1 %v6309_v0  ;;  %4290 = vmatprep.subr.bf16.mxu0 %v6311_v1  ;;  %8138 = vst [vmem:[#allocation31_spill] sm:$0xff] %v6347_v20  ;;  %8139 = vst [vmem:[#allocation32_spill] sm:$0xff] %v6359_v25  ;;  %v218_v30 = vld [vmem:[%s7919_s2 + $0x1e8] sm:$0xff]  ;;  %v220_v33 = vld [vmem:[%s7919_s2 + $0x1f8] sm:$0xff]  ;;  %v6381_v36 = vpack.c.bf16 %v211_v28, %v207_v24 }
  0x18   :  { %4322 = vmatprep.subr.bf16.mxu1 %v6323_v7  ;;  %8140 = vst [vmem:[#allocation33_spill] sm:$0xff] %v6377_v34  ;;  %v6383_v37 = vpack.c.bf16 %v218_v30, %v214_v29  ;;  %v213_v38 = vld [vmem:[%s7919_s2 + $0x1c0] sm:$0xff]  ;;  %v215_v42 = vld [vmem:[%s7919_s2 + $0x1d0] sm:$0xff]  ;;  %v6395_v43 = vpack.c.bf16 %v220_v33, %v216_v32  ;;  %v30_v46 = vld [vmem:[%s7920_s1 + $0x8] sm:$0xff] }
  0x19   :  { %8141 = vst [vmem:[#allocation34_spill] sm:$0xff] %v6381_v36  ;;  %v217_v41 = vld [vmem:[%s7919_s2 + $0x1e0] sm:$0xff]  ;;  %v219_v45 = vld [vmem:[%s7919_s2 + $0x1f0] sm:$0xff]  ;;  %v38_v47 = vld [vmem:[%s7920_s1 + $0x48] sm:$0xff] }
  0x1a   :  { %4292 = vmatpush1.bf16.msra.mxu0 %v6341_v16  ;;  %8142 = vst [vmem:[#allocation35_spill] sm:$0xff] %v6383_v37  ;;  %8143 = vst [vmem:[#allocation36_spill] sm:$0xff] %v6395_v43  ;;  %v32_v48 = vld [vmem:[%s7920_s1 + $0x18] sm:$0xff]  ;;  %v6413_v50 = vpack.c.bf16 %v217_v41, %v213_v38  ;;  %v6417_v54 = vpack.c.bf16 %v219_v45, %v215_v42  ;;  %v6419_v55 = vpack.c.bf16 %v38_v47, %v30_v46  ;;  %v29_v56 = vld [vmem:[%s7920_s1] sm:$0xff] }
  0x1b   :  { %4324 = vmatpush1.bf16.msra.mxu1 %v6345_v19  ;;  %4294 = vmatprep.subr.bf16.mxu0 %v6347_v20  ;;  %v40_v49 = vld [vmem:[%s7920_s1 + $0x58] sm:$0xff]  ;;  %v37_v58 = vld [vmem:[%s7920_s1 + $0x40] sm:$0xff]  ;;  %v31_v59 = vld [vmem:[%s7920_s1 + $0x10] sm:$0xff] }
  0x1c   :  { %4326 = vmatprep.subr.bf16.mxu1 %v6359_v25  ;;  %8144 = vst [vmem:[#allocation37_spill] sm:$0xff] %v6413_v50  ;;  %8145 = vst [vmem:[#allocation38_spill] sm:$0xff] %v6417_v54  ;;  %v6431_v60 = vpack.c.bf16 %v40_v49, %v32_v48  ;;  %v39_v61 = vld [vmem:[%s7920_s1 + $0x50] sm:$0xff]  ;;  %v46_v62 = vld [vmem:[%s7920_s1 + $0x88] sm:$0xff]  ;;  %v6449_v10 = vpack.c.bf16 %v37_v58, %v29_v56 }
  0x1d   :  { %8146 = vst [vmem:[#allocation39_spill] sm:$0xff] %v6419_v55  ;;  %v54_v2 = vld [vmem:[%s7920_s1 + $0xc8] sm:$0xff]  ;;  %v48_v5 = vld [vmem:[%s7920_s1 + $0x98] sm:$0xff]  ;;  %v6453_v11 = vpack.c.bf16 %v39_v61, %v31_v59  ;;  %v45_v14 = vld [vmem:[%s7920_s1 + $0x80] sm:$0xff] }
  0x1e   :  { %4296 = vmatpush1.bf16.msra.mxu0 %v6377_v34  ;;  %8147 = vst [vmem:[#allocation40_spill] sm:$0xff] %v6431_v60  ;;  %v56_v6 = vld [vmem:[%s7920_s1 + $0xd8] sm:$0xff]  ;;  %v6455_v12 = vpack.c.bf16 %v54_v2, %v46_v62  ;;  %v53_v15 = vld [vmem:[%s7920_s1 + $0xc0] sm:$0xff]  ;;  %v47_v21 = vld [vmem:[%s7920_s1 + $0x90] sm:$0xff] }
  0x1f   :  { %4328 = vmatpush1.bf16.msra.mxu1 %v6381_v36  ;;  %4298 = vmatprep.subr.bf16.mxu0 %v6383_v37  ;;  %v6467_v23 = vpack.c.bf16 %v56_v6, %v48_v5  ;;  %v55_v24 = vld [vmem:[%s7920_s1 + $0xd0] sm:$0xff]  ;;  %v62_v28 = vld [vmem:[%s7920_s1 + $0x108] sm:$0xff]  ;;  %v64_v30 = vld [vmem:[%s7920_s1 + $0x118] sm:$0xff]  ;;  %v6487_v33 = vpack.c.bf16 %v53_v15, %v45_v14 }
  0x20   :  { %4330 = vmatprep.subr.bf16.mxu1 %v6395_v43  ;;  %v70_v29 = vld [vmem:[%s7920_s1 + $0x148] sm:$0xff]  ;;  %v72_v32 = vld [vmem:[%s7920_s1 + $0x158] sm:$0xff]  ;;  %v6491_v38 = vpack.c.bf16 %v55_v24, %v47_v21  ;;  %v61_v42 = vld [vmem:[%s7920_s1 + $0x100] sm:$0xff] }
  0x21   :  { %v6493_v41 = vpack.c.bf16 %v70_v29, %v62_v28  ;;  %v69_v45 = vld [vmem:[%s7920_s1 + $0x140] sm:$0xff]  ;;  %v63_v46 = vld [vmem:[%s7920_s1 + $0x110] sm:$0xff]  ;;  %v6505_v47 = vpack.c.bf16 %v72_v32, %v64_v30  ;;  %v78_v49 = vld [vmem:[%s7920_s1 + $0x188] sm:$0xff] }
  0x22   :  { %4300 = vmatpush1.bf16.msra.mxu0 %v6413_v50  ;;  %v71_v48 = vld [vmem:[%s7920_s1 + $0x150] sm:$0xff]  ;;  %v86_v56 = vld [vmem:[%s7920_s1 + $0x1c8] sm:$0xff]  ;;  %v80_v58 = vld [vmem:[%s7920_s1 + $0x198] sm:$0xff]  ;;  %v6525_v61 = vpack.c.bf16 %v69_v45, %v61_v42 }
  0x23   :  { %4332 = vmatpush1.bf16.msra.mxu1 %v6417_v54  ;;  %4334 = vmatprep.subr.bf16.mxu0 %v6419_v55  ;;  %v88_v59 = vld [vmem:[%s7920_s1 + $0x1d8] sm:$0xff]  ;;  %v77_v62 = vld [vmem:[%s7920_s1 + $0x180] sm:$0xff]  ;;  %v6532_v2 = vpack.c.bf16 %v71_v48, %v63_v46  ;;  %v6534_v5 = vpack.c.bf16 %v86_v56, %v78_v49  ;;  %v79_v14 = vld [vmem:[%s7920_s1 + $0x190] sm:$0xff] }
  0x24   :  { %4366 = vmatprep.subr.bf16.mxu1 %v6431_v60  ;;  %v85_v6 = vld [vmem:[%s7920_s1 + $0x1c0] sm:$0xff]  ;;  %v87_v15 = vld [vmem:[%s7920_s1 + $0x1d0] sm:$0xff]  ;;  %v6546_v21 = vpack.c.bf16 %v88_v59, %v80_v58  ;;  %v94_v24 = vld [vmem:[%s7920_s1 + $0x208] sm:$0xff] }
  0x25   :  { %315 = vmatmul.mubr.f32.vlgmr.msra.gmra.mrb[0].mxu0 %v7924_v3  ;;  %8148 = vst [vmem:[#allocation41_spill] sm:$0xff] %v6532_v2  ;;  %8149 = vst [vmem:[#allocation42_spill] sm:$0xff] %v6534_v5  ;;  %v102_v28 = vld [vmem:[%s7920_s1 + $0x248] sm:$0xff]  ;;  %v392_v29 = vld [vmem:[%s7921_s0] sm:$0xff]  ;;  %v6567_v46 = vpack.c.bf16 %v85_v6, %v77_v62  ;;  %v6571_v49 = vpack.c.bf16 %v87_v15, %v79_v14 }
  0x26   :  { %386 = vmatmul.mubr.f32.vlgmr.msra.gmra.mrb[0].mxu1 %v7924_v3  ;;  %4336 = vmatpush1.bf16.msra.mxu0 %v6449_v10  ;;  %8150 = vst [vmem:[#allocation43_spill] sm:$0xff] %v6546_v21  ;;  %v96_v30 = vld [vmem:[%s7920_s1 + $0x218] sm:$0xff]  ;;  %v393_v42 = vld [vmem:[%s7921_s0 + $0x8] sm:$0xff]  ;;  %v4193_v45 = vmul.f32 -1.442695, %v392_v29  ;;  %v6573_v56 = vpack.c.bf16 %v102_v28, %v94_v24  ;;  %v93_v58 = vld [vmem:[%s7920_s1 + $0x200] sm:$0xff] }
  0x27   :  { %4368 = vmatpush1.bf16.msra.mxu1 %v6453_v11  ;;  %4338 = vmatprep.subr.bf16.mxu0 %v6455_v12  ;;  %v104_v32 = vld [vmem:[%s7920_s1 + $0x258] sm:$0xff]  ;;  %8151 = vst [vmem:[#allocation44_spill] sm:$0xff] %v6567_v46  ;;  %v4194_v48 = vmul.f32 -1.442695, %v393_v42  ;;  %8152 = vst [vmem:[#allocation45_spill] sm:$0xff] %v6571_v49  ;;  %v101_v59 = vld [vmem:[%s7920_s1 + $0x240] sm:$0xff] }
  0x28   :  { %4370 = vmatprep.subr.bf16.mxu1 %v6467_v23  ;;  %488 = vmatprep.mubr.f32.mxu0 %v7924_v3  ;;  %8153 = vst [vmem:[#allocation46_spill] sm:$0xff] %v6573_v56  ;;  %v95_v62 = vld [vmem:[%s7920_s1 + $0x210] sm:$0xff]  ;;  %5838 = vpow2.f32 %v4193_v45  ;;  %v6585_v6 = vpack.c.bf16 %v104_v32, %v96_v30  ;;  %v110_v15 = vld [vmem:[%s7920_s1 + $0x288] sm:$0xff]  ;;  %v112_v28 = vld [vmem:[%s7920_s1 + $0x298] sm:$0xff]  ;;  %v6603_v30 = vpack.c.bf16 %v101_v59, %v93_v58 }
  0x29   :  { %559 = vmatprep.mubr.f32.mxu1 %v7924_v3  ;;  %v103_v14 = vld [vmem:[%s7920_s1 + $0x250] sm:$0xff]  ;;  %v118_v24 = vld [vmem:[%s7920_s1 + $0x2c8] sm:$0xff]  ;;  %5840 = vpow2.f32 %v4194_v48  ;;  %v120_v29 = vld [vmem:[%s7920_s1 + $0x2d8] sm:$0xff] }
  0x2a   :  { %4340 = vmatpush1.bf16.msra.mxu0 %v6487_v33  ;;  %8154 = vst [vmem:[#allocation47_spill] sm:$0xff] %v6585_v6  ;;  %8155 = vst [vmem:[#allocation48_spill] sm:$0xff] %v6603_v30  ;;  %v394_v32 = vld [vmem:[%s7921_s0 + $0x10] sm:$0xff]  ;;  %v6610_v42 = vpack.c.bf16 %v103_v14, %v95_v62  ;;  %v6612_v45 = vpack.c.bf16 %v118_v24, %v110_v15  ;;  %v109_v48 = vld [vmem:[%s7920_s1 + $0x280] sm:$0xff]  ;;  %v6624_v3 = vpack.c.bf16 %v120_v29, %v112_v28 }
  0x2b   :  { %4372 = vmatpush1.bf16.msra.mxu1 %v6491_v38  ;;  %4342 = vmatprep.subr.bf16.mxu0 %v6493_v41  ;;  %v117_v58 = vld [vmem:[%s7920_s1 + $0x2c0] sm:$0xff]  ;;  %v111_v59 = vld [vmem:[%s7920_s1 + $0x290] sm:$0xff]  ;;  %v126_v14 = vld [vmem:[%s7920_s1 + $0x308] sm:$0xff]  ;;  %v4195_v29 = vmul.f32 -1.442695, %v394_v32 }
  0x2c   :  { %4374 = vmatprep.subr.bf16.mxu1 %v6505_v47  ;;  %8156 = vst [vmem:[#allocation49_spill] sm:$0xff] %v6610_v42  ;;  %8157 = vst [vmem:[#allocation50_spill] sm:$0xff] %v6612_v45  ;;  %v119_v62 = vld [vmem:[%s7920_s1 + $0x2d0] sm:$0xff]  ;;  %v134_v15 = vld [vmem:[%s7920_s1 + $0x348] sm:$0xff] }
  0x2d   :  { %8158 = vst [vmem:[#allocation51_spill] sm:$0xff] %v6624_v3  ;;  %v128_v24 = vld [vmem:[%s7920_s1 + $0x318] sm:$0xff]  ;;  %v133_v32 = vld [vmem:[%s7920_s1 + $0x340] sm:$0xff]  ;;  %5842 = vpow2.f32 %v4195_v29 }
  0x2e   :  { %4344 = vmatpush1.bf16.msra.mxu0 %v6525_v61  ;;  %v136_v28 = vld [vmem:[%s7920_s1 + $0x358] sm:$0xff]  ;;  %v149_v29 = vld [vmem:[%s7920_s1 + $0x3c0] sm:$0xff] }
  0x2f   :  { %4376 = vmatpush1.bf16.msra.mxu1 %v6532_v2  ;;  %4346 = vmatprep.subr.bf16.mxu0 %v6534_v5  ;;  %v141_v2 = vld [vmem:[%s7920_s1 + $0x380] sm:$0xff] }
  0x30   :  { %4378 = vmatprep.subr.bf16.mxu1 %v6546_v21 }
  0x32   :  { %4348 = vmatpush1.bf16.msra.mxu0 %v6567_v46  ;;  %v6651_v46 = vpack.c.bf16 %v134_v15, %v126_v14  ;;  %v150_v14 = vld [vmem:[%s7920_s1 + $0x3c8] sm:$0xff]  ;;  %v5839_v15 = vpop.eup %5838 }
  0x33   :  { %4380 = vmatpush1.bf16.msra.mxu1 %v6571_v49  ;;  %4350 = vmatprep.subr.bf16.mxu0 %v6573_v56  ;;  %v125_v56 = vld [vmem:[%s7920_s1 + $0x300] sm:$0xff]  ;;  %v6649_v49 = vpack.c.bf16 %v119_v62, %v111_v59  ;;  %v135_v59 = vld [vmem:[%s7920_s1 + $0x350] sm:$0xff]  ;;  %v142_v62 = vld [vmem:[%s7920_s1 + $0x388] sm:$0xff] }
  0x34   :  { %4382 = vmatprep.subr.bf16.mxu1 %v6585_v6  ;;  %v6642_v6 = vpack.c.bf16 %v117_v58, %v109_v48  ;;  %8161 = vst [vmem:[#allocation54_spill] sm:$0xff] %v6651_v46  ;;  %v127_v48 = vld [vmem:[%s7920_s1 + $0x310] sm:$0xff]  ;;  %v395_v58 = vld [vmem:[%s7921_s0 + $0x18] sm:$0xff]  ;;  %v6687_v5 = vpack.c.bf16 %v150_v14, %v142_v62  ;;  %v42_v62 = vld [vmem:[%s7920_s1 + $0x68] sm:$0xff] }
  0x35   :  { %8160 = vst [vmem:[#allocation53_spill] sm:$0xff] %v6649_v49  ;;  %5844 = vtanh.f32 %v395_v58  ;;  %v6685_v21 = vpack.c.bf16 %v135_v59, %v127_v48  ;;  %v151_v48 = vld [vmem:[%s7920_s1 + $0x3d0] sm:$0xff]  ;;  %v34_v59 = vld [vmem:[%s7920_s1 + $0x28] sm:$0xff]  ;;  %v36_v14 = vld [vmem:[%s7920_s1 + $0x38] sm:$0xff] }
  0x36   :  { %4352 = vmatpush1.bf16.msra.mxu0 %v6603_v30  ;;  %8159 = vst [vmem:[#allocation52_spill] sm:$0xff] %v6642_v6  ;;  %v409_v30 = vadd.f32 1.0, %v5839_v15  ;;  %8165 = vst [vmem:[#allocation58_spill] sm:$0xff] %v6687_v5 }
  0x37   :  { %4384 = vmatpush1.bf16.msra.mxu1 %v6610_v42  ;;  %4354 = vmatprep.subr.bf16.mxu0 %v6612_v45  ;;  %v6663_v42 = vpack.c.bf16 %v136_v28, %v128_v24  ;;  %v144_v45 = vld [vmem:[%s7920_s1 + $0x398] sm:$0xff]  ;;  %v5841_v28 = vpop.eup %5840  ;;  %8164 = vst [vmem:[#allocation57_spill] sm:$0xff] %v6685_v21 }
  0x38   :  { %4386 = vmatprep.subr.bf16.mxu1 %v6624_v3  ;;  %v152_v24 = vld [vmem:[%s7920_s1 + $0x3d8] sm:$0xff]  ;;  %v6681_v3 = vpack.c.bf16 %v133_v32, %v125_v56  ;;  %v143_v56 = vld [vmem:[%s7920_s1 + $0x390] sm:$0xff]  ;;  %v410_v32 = vadd.f32 1.0, %v5841_v28  ;;  %5846 = vrcp.f32 %v409_v30  ;;  %v6717_v30 = vpack.c.bf16 %v149_v29, %v141_v2 }
  0x39   :  { %8162 = vst [vmem:[#allocation55_spill] sm:$0xff] %v6663_v42  ;;  %v6699_v58 = vpack.c.bf16 %v152_v24, %v144_v45  ;;  %v44_v45 = vld [vmem:[%s7920_s1 + $0x78] sm:$0xff]  ;;  %v6721_v15 = vpack.c.bf16 %v151_v48, %v143_v56  ;;  %v6723_v24 = vpack.c.bf16 %v42_v62, %v34_v59 }
  0x3a   :  { %4356 = vmatpush1.bf16.msra.mxu0 %v6642_v6  ;;  %8163 = vst [vmem:[#allocation56_spill] sm:$0xff] %v6681_v3  ;;  %5848 = vrcp.f32 %v410_v32  ;;  %8167 = vst [vmem:[#allocation60_spill] sm:$0xff] %v6717_v30  ;;  %v6726_v28 = vpack.c.bf16 %v44_v45, %v36_v14  ;;  %v5843_v32 = vpop.eup %5842  ;;  %v33_v14 = vld [vmem:[%s7920_s1 + $0x20] sm:$0xff] }
  0x3b   :  { %4388 = vmatpush1.bf16.msra.mxu1 %v6649_v49  ;;  %4358 = vmatprep.subr.bf16.mxu0 %v6651_v46  ;;  %8166 = vst [vmem:[#allocation59_spill] sm:$0xff] %v6699_v58  ;;  %8168 = vst [vmem:[#allocation61_spill] sm:$0xff] %v6721_v15  ;;  %v41_v45 = vld [vmem:[%s7920_s1 + $0x60] sm:$0xff] }
  0x3c   :  { %4390 = vmatprep.subr.bf16.mxu1 %v6663_v42  ;;  %8169 = vst [vmem:[#allocation62_spill] sm:$0xff] %v6723_v24  ;;  %8170 = vst [vmem:[#allocation63_spill] sm:$0xff] %v6726_v28 }
  0x3e   :  { %4360 = vmatpush1.bf16.msra.mxu0 %v6681_v3 }
  0x3f   :  { %4392 = vmatpush1.bf16.msra.mxu1 %v6685_v21  ;;  %4362 = vmatprep.subr.bf16.mxu0 %v6687_v5  ;;  %v5845_v2 = vpop.eup %5844  ;;  %v411_v5 = vadd.f32 1.0, %v5843_v32  ;;  %v35_v32 = vld [vmem:[%s7920_s1 + $0x30] sm:$0xff] }
  0x40   :  { %4394 = vmatprep.subr.bf16.mxu1 %v6699_v58  ;;  %v57_v58 = vld [vmem:[%s7920_s1 + $0xe0] sm:$0xff] }
  0x41   :  { %5850 = vrcp.f32 %v411_v5  ;;  %v43_v5 = vld [vmem:[%s7920_s1 + $0x70] sm:$0xff] }
  0x42   :  { %4364 = vmatpush1.bf16.msra.mxu0 %v6717_v30  ;;  %v5847_v29 = vpop.eup %5846  ;;  %v49_v30 = vld [vmem:[%s7920_s1 + $0xa0] sm:$0xff] }
  0x43   :  { %4396 = vmatpush1.bf16.msra.mxu1 %v6721_v15  ;;  %4398 = vmatprep.subr.bf16.mxu0 %v6723_v24  ;;  %v420_v48 = vmul.f32 %v5847_v29, %v5845_v2  ;;  %v50_v2 = vld [vmem:[%s7920_s1 + $0xa8] sm:$0xff]  ;;  %v6759_v24 = vpack.c.bf16 %v41_v45, %v33_v14  ;;  %v6761_v15 = vpack.c.bf16 %v43_v5, %v35_v32  ;;  %v51_v14 = vld [vmem:[%s7920_s1 + $0xb0] sm:$0xff]  ;;  %v68_v5 = vld [vmem:[%s7920_s1 + $0x138] sm:$0xff] }
  0x44   :  { %4430 = vmatprep.subr.bf16.mxu1 %v6726_v28  ;;  %v5849_v56 = vpop.eup %5848  ;;  %v59_v45 = vld [vmem:[%s7920_s1 + $0xf0] sm:$0xff]  ;;  %v66_v32 = vld [vmem:[%s7920_s1 + $0x128] sm:$0xff] }
  0x45   :  { %v419_v59 = vmul.f32 0.0, %v5849_v56  ;;  %v58_v56 = vld [vmem:[%s7920_s1 + $0xe8] sm:$0xff]  ;;  %8171 = vst [vmem:[#allocation64_spill] sm:$0xff] %v6759_v24  ;;  %8172 = vst [vmem:[#allocation65_spill] sm:$0xff] %v6761_v15 }
  0x46   :  { %v6771_v3 = vpack.c.bf16 %v58_v56, %v50_v2  ;;  %v76_v2 = vld [vmem:[%s7920_s1 + $0x178] sm:$0xff]  ;;  %v6799_v56 = vpack.c.bf16 %v59_v45, %v51_v14  ;;  %v82_v14 = vld [vmem:[%s7920_s1 + $0x1a8] sm:$0xff] }
  0x47   :  { %v6732_v62 = vadd.f32 %v420_v48, %v419_v59  ;;  %v52_v48 = vld [vmem:[%s7920_s1 + $0xb8] sm:$0xff]  ;;  %v90_v45 = vld [vmem:[%s7920_s1 + $0x1e8] sm:$0xff] }
  0x48   :  { %v60_v59 = vld [vmem:[%s7920_s1 + $0xf8] sm:$0xff]  ;;  %8173 = vst [vmem:[#allocation66_spill] sm:$0xff] %v6771_v3  ;;  %8176 = vst [vmem:[#allocation69_spill] sm:$0xff] %v6799_v56  ;;  %v6847_v49 = vpack.c.bf16 %v90_v45, %v82_v14 }
  0x49   :  { %5852 = vtanh.f32 %v6732_v62  ;;  %v6773_v42 = vpack.c.bf16 %v60_v59, %v52_v48  ;;  %v65_v48 = vld [vmem:[%s7920_s1 + $0x120] sm:$0xff]  ;;  %v100_v14 = vld [vmem:[%s7920_s1 + $0x238] sm:$0xff] }
  0x4a   :  { %v73_v59 = vld [vmem:[%s7920_s1 + $0x160] sm:$0xff]  ;;  %8182 = vst [vmem:[#allocation74_spill] sm:$0xff] %v6847_v49  ;;  %v108_v45 = vld [vmem:[%s7920_s1 + $0x278] sm:$0xff] }
  0x4b   :  { %v5851_v29 = vpop.eup %5850  ;;  %8174 = vst [vmem:[#allocation67_spill] sm:$0xff] %v6773_v42 }
  0x53   :  { %v5853_v28 = vpop.eup %5852 }
  0x54   :  { %v6769_v21 = vmul.f32 %v5853_v28, %v5851_v29  ;;  %v74_v28 = vld [vmem:[%s7920_s1 + $0x168] sm:$0xff]  ;;  %v6797_v29 = vpack.c.bf16 %v57_v58, %v49_v30  ;;  %v67_v58 = vld [vmem:[%s7920_s1 + $0x130] sm:$0xff] }
  0x55   :  { %v6809_v46 = vpack.c.bf16 %v74_v28, %v66_v32  ;;  %v75_v30 = vld [vmem:[%s7920_s1 + $0x170] sm:$0xff]  ;;  %v84_v32 = vld [vmem:[%s7920_s1 + $0x1b8] sm:$0xff] }
  0x56   :  { %489 = vmatmul.mubr.f32.vlgmr.msra.gmra.mrb[2].mxu0 %v6769_v21  ;;  %560 = vmatmul.mubr.f32.vlgmr.msra.gmra.mrb[2].mxu1 %v6769_v21  ;;  %8175 = vst [vmem:[#allocation68_spill] sm:$0xff] %v6797_v29  ;;  %v92_v28 = vld [vmem:[%s7920_s1 + $0x1f8] sm:$0xff] }
  0x57   :  { %4400 = vmatpush1.bf16.msra.mxu0 %v6759_v24  ;;  %4432 = vmatpush1.bf16.msra.mxu1 %v6761_v15  ;;  %8177 = vst [vmem:[#allocation70_spill] sm:$0xff] %v6809_v46  ;;  %v6811_v24 = vpack.c.bf16 %v76_v2, %v68_v5  ;;  %v8179_v5 = vmov 0.0   ;;  %v6835_v2 = vpack.c.bf16 %v73_v59, %v65_v48  ;;  %v89_v15 = vld [vmem:[%s7920_s1 + $0x1e0] sm:$0xff]  ;;  %v83_v48 = vld [vmem:[%s7920_s1 + $0x1b0] sm:$0xff] }
  0x58   :  { %4402 = vmatprep.subr.bf16.mxu0 %v6771_v3  ;;  %4434 = vmatprep.subr.bf16.mxu1 %v6773_v42  ;;  %v6837_v42 = vpack.c.bf16 %v75_v30, %v67_v58  ;;  %v81_v3 = vld [vmem:[%s7920_s1 + $0x1a0] sm:$0xff]  ;;  %v91_v59 = vld [vmem:[%s7920_s1 + $0x1f0] sm:$0xff]  ;;  %v98_v58 = vld [vmem:[%s7920_s1 + $0x228] sm:$0xff] }
  0x59   :  { %8178 = vst [vmem:[#allocation71_spill] sm:$0xff] %v6811_v24  ;;  %630 = vmatprep.mubr.f32.mxu0 %v8179_v5  ;;  %701 = vmatprep.mubr.f32.mxu1 %v8179_v5  ;;  %8180 = vst [vmem:[#allocation72_spill] sm:$0xff] %v6835_v2  ;;  %v106_v30 = vld [vmem:[%s7920_s1 + $0x268] sm:$0xff] }
  0x5a   :  { %8181 = vst [vmem:[#allocation73_spill] sm:$0xff] %v6837_v42 }
  0x5b   :  { %4404 = vmatpush1.bf16.msra.mxu0 %v6797_v29  ;;  %4436 = vmatpush1.bf16.msra.mxu1 %v6799_v56  ;;  %v6849_v29 = vpack.c.bf16 %v92_v28, %v84_v32  ;;  %v6871_v32 = vpack.c.bf16 %v89_v15, %v81_v3  ;;  %v6873_v28 = vpack.c.bf16 %v91_v59, %v83_v48  ;;  %v99_v3 = vld [vmem:[%s7920_s1 + $0x230] sm:$0xff]  ;;  %v114_v48 = vld [vmem:[%s7920_s1 + $0x2a8] sm:$0xff] }
  0x5c   :  { %4406 = vmatprep.subr.bf16.mxu0 %v6809_v46  ;;  %4438 = vmatprep.subr.bf16.mxu1 %v6811_v24  ;;  %v97_v24 = vld [vmem:[%s7920_s1 + $0x220] sm:$0xff]  ;;  %v6883_v56 = vpack.c.bf16 %v106_v30, %v98_v58  ;;  %v107_v15 = vld [vmem:[%s7920_s1 + $0x270] sm:$0xff]  ;;  %v122_v59 = vld [vmem:[%s7920_s1 + $0x2e8] sm:$0xff] }
  0x5d   :  { %8183 = vst [vmem:[#allocation75_spill] sm:$0xff] %v6849_v29  ;;  %8184 = vst [vmem:[#allocation76_spill] sm:$0xff] %v6871_v32  ;;  %v105_v46 = vld [vmem:[%s7920_s1 + $0x260] sm:$0xff]  ;;  %v116_v58 = vld [vmem:[%s7920_s1 + $0x2b8] sm:$0xff] }
  0x5e   :  { %8185 = vst [vmem:[#allocation77_spill] sm:$0xff] %v6873_v28  ;;  %8186 = vst [vmem:[#allocation78_spill] sm:$0xff] %v6883_v56  ;;  %v124_v30 = vld [vmem:[%s7920_s1 + $0x2f8] sm:$0xff] }
  0x5f   :  { %4408 = vmatpush1.bf16.msra.mxu0 %v6835_v2  ;;  %4440 = vmatpush1.bf16.msra.mxu1 %v6837_v42  ;;  %v6885_v2 = vpack.c.bf16 %v108_v45, %v100_v14  ;;  %v6907_v14 = vpack.c.bf16 %v105_v46, %v97_v24  ;;  %v6909_v45 = vpack.c.bf16 %v107_v15, %v99_v3  ;;  %v115_v46 = vld [vmem:[%s7920_s1 + $0x2b0] sm:$0xff]  ;;  %v130_v3 = vld [vmem:[%s7920_s1 + $0x328] sm:$0xff] }
  0x60   :  { %4410 = vmatprep.subr.bf16.mxu0 %v6847_v49  ;;  %4442 = vmatprep.subr.bf16.mxu1 %v6849_v29  ;;  %v113_v29 = vld [vmem:[%s7920_s1 + $0x2a0] sm:$0xff]  ;;  %v6919_v42 = vpack.c.bf16 %v122_v59, %v114_v48  ;;  %v123_v24 = vld [vmem:[%s7920_s1 + $0x2f0] sm:$0xff]  ;;  %v138_v15 = vld [vmem:[%s7920_s1 + $0x368] sm:$0xff] }
  0x61   :  { %8187 = vst [vmem:[#allocation79_spill] sm:$0xff] %v6885_v2  ;;  %8188 = vst [vmem:[#allocation80_spill] sm:$0xff] %v6907_v14  ;;  %v121_v49 = vld [vmem:[%s7920_s1 + $0x2e0] sm:$0xff]  ;;  %v132_v48 = vld [vmem:[%s7920_s1 + $0x338] sm:$0xff] }
  0x62   :  { %8189 = vst [vmem:[#allocation81_spill] sm:$0xff] %v6909_v45  ;;  %8190 = vst [vmem:[#allocation82_spill] sm:$0xff] %v6919_v42  ;;  %v140_v59 = vld [vmem:[%s7920_s1 + $0x378] sm:$0xff] }
  0x63   :  { %4412 = vmatpush1.bf16.msra.mxu0 %v6871_v32  ;;  %4444 = vmatpush1.bf16.msra.mxu1 %v6873_v28  ;;  %v6921_v32 = vpack.c.bf16 %v124_v30, %v116_v58  ;;  %v6943_v58 = vpack.c.bf16 %v121_v49, %v113_v29  ;;  %v6945_v30 = vpack.c.bf16 %v123_v24, %v115_v46  ;;  %v131_v49 = vld [vmem:[%s7920_s1 + $0x330] sm:$0xff]  ;;  %v146_v46 = vld [vmem:[%s7920_s1 + $0x3a8] sm:$0xff] }
  0x64   :  { %4414 = vmatprep.subr.bf16.mxu0 %v6883_v56  ;;  %4446 = vmatprep.subr.bf16.mxu1 %v6885_v2  ;;  %v129_v2 = vld [vmem:[%s7920_s1 + $0x320] sm:$0xff]  ;;  %v6955_v28 = vpack.c.bf16 %v138_v15, %v130_v3  ;;  %v139_v29 = vld [vmem:[%s7920_s1 + $0x370] sm:$0xff]  ;;  %v154_v24 = vld [vmem:[%s7920_s1 + $0x3e8] sm:$0xff] }
  0x65   :  { %8191 = vst [vmem:[#allocation83_spill] sm:$0xff] %v6921_v32  ;;  %8192 = vst [vmem:[#allocation84_spill] sm:$0xff] %v6943_v58  ;;  %v137_v56 = vld [vmem:[%s7920_s1 + $0x360] sm:$0xff]  ;;  %v148_v3 = vld [vmem:[%s7920_s1 + $0x3b8] sm:$0xff] }
  0x66   :  { %8193 = vst [vmem:[#allocation85_spill] sm:$0xff] %v6945_v30  ;;  %8194 = vst [vmem:[#allocation86_spill] sm:$0xff] %v6955_v28  ;;  %v156_v15 = vld [vmem:[%s7920_s1 + $0x3f8] sm:$0xff] }
  0x67   :  { %4416 = vmatpush1.bf16.msra.mxu0 %v6907_v14  ;;  %4448 = vmatpush1.bf16.msra.mxu1 %v6909_v45  ;;  %v6957_v14 = vpack.c.bf16 %v140_v59, %v132_v48  ;;  %v6979_v48 = vpack.c.bf16 %v137_v56, %v129_v2  ;;  %v6981_v59 = vpack.c.bf16 %v139_v29, %v131_v49  ;;  %v147_v56 = vld [vmem:[%s7920_s1 + $0x3b0] sm:$0xff] }
  0x68   :  { %4418 = vmatprep.subr.bf16.mxu0 %v6919_v42  ;;  %4450 = vmatprep.subr.bf16.mxu1 %v6921_v32  ;;  %v145_v32 = vld [vmem:[%s7920_s1 + $0x3a0] sm:$0xff]  ;;  %v6988_v42 = vpack.c.bf16 %v154_v24, %v146_v46  ;;  %v6990_v45 = vpack.c.bf16 %v156_v15, %v148_v3  ;;  %v155_v2 = vld [vmem:[%s7920_s1 + $0x3f0] sm:$0xff] }
  0x69   :  { %8195 = vst [vmem:[#allocation87_spill] sm:$0xff] %v6957_v14  ;;  %8196 = vst [vmem:[#allocation88_spill] sm:$0xff] %v6979_v48  ;;  %v7005_v29 = vpack.c.bf16 %v155_v2, %v147_v56 }
  0x6a   :  { %8197 = vst [vmem:[#allocation89_spill] sm:$0xff] %v6981_v59  ;;  %8198 = vst [vmem:[#allocation90_spill] sm:$0xff] %v6988_v42 }
  0x6b   :  { %4420 = vmatpush1.bf16.msra.mxu0 %v6943_v58  ;;  %4452 = vmatpush1.bf16.msra.mxu1 %v6945_v30  ;;  %8199 = vst [vmem:[#allocation91_spill] sm:$0xff] %v6990_v45  ;;  %v153_v30 = vld [vmem:[%s7920_s1 + $0x3e0] sm:$0xff]  ;;  %8201 = vst [vmem:[#allocation93_spill] sm:$0xff] %v7005_v29 }
  0x6c   :  { %4422 = vmatprep.subr.bf16.mxu0 %v6955_v28  ;;  %4454 = vmatprep.subr.bf16.mxu1 %v6957_v14  ;;  %v7003_v49 = vpack.c.bf16 %v153_v30, %v145_v32  ;;  %v4200_v32 = vld [vmem:[%s7921_s0 + $0x28] sm:$0xff] }
  0x6e   :  { %8200 = vst [vmem:[#allocation92_spill] sm:$0xff] %v7003_v49 }
  0x6f   :  { %4424 = vmatpush1.bf16.msra.mxu0 %v6979_v48  ;;  %4456 = vmatpush1.bf16.msra.mxu1 %v6981_v59 }
  0x70   :  { %4426 = vmatprep.subr.bf16.mxu0 %v6988_v42  ;;  %4458 = vmatprep.subr.bf16.mxu1 %v6990_v45 }
  0x73   :  { %4428 = vmatpush1.bf16.msra.mxu0 %v7003_v49  ;;  %4460 = vmatpush1.bf16.msra.mxu1 %v7005_v29 }
  0x74   :  { %4462 = vmatprep.subr.bf16.mxu0 %v6131_v4  ;;  %4494 = vmatprep.subr.bf16.mxu1 %v6142_v8 }
  0x76   :  { %631 = vmatmul.mubr.f32.vlgmr.msra.gmra.mrb[0].mxu0 %v6769_v21  ;;  %702 = vmatmul.mubr.f32.vlgmr.msra.gmra.mrb[0].mxu1 %v6769_v21  ;;  %v4199_v21 = vld [vmem:[%s7921_s0 + $0x20] sm:$0xff] }
  0x77   :  { %4464 = vmatpush1.bf16.msra.mxu0 %v6144_v9  ;;  %4496 = vmatpush1.bf16.msra.mxu1 %v6156_v13 }
  0x78   :  { %4466 = vmatprep.subr.bf16.mxu0 %v6169_v17  ;;  %4498 = vmatprep.subr.bf16.mxu1 %v6171_v18 }
  0x79   :  { %804 = vmatprep.mubr.f32.mxu0 %v8179_v5  ;;  %875 = vmatprep.mubr.f32.mxu1 %v8179_v5 }
  0x7b   :  { %4468 = vmatpush1.bf16.msra.mxu0 %v6183_v22  ;;  %4500 = vmatpush1.bf16.msra.mxu1 %v6196_v26 }
  0x7c   :  { %4470 = vmatprep.subr.bf16.mxu0 %v6198_v27  ;;  %4502 = vmatprep.subr.bf16.mxu1 %v6209_v31 }
  0x7f   :  { %4472 = vmatpush1.bf16.msra.mxu0 %v6221_v35  ;;  %4504 = vmatpush1.bf16.msra.mxu1 %v6234_v39 }
  0x80   :  { %4474 = vmatprep.subr.bf16.mxu0 %v6236_v40  ;;  %4506 = vmatprep.subr.bf16.mxu1 %v6248_v44 }
  0x83   :  { %4476 = vmatpush1.bf16.msra.mxu0 %v6269_v51  ;;  %4508 = vmatpush1.bf16.msra.mxu1 %v6273_v52 }
  0x84   :  { %4478 = vmatprep.subr.bf16.mxu0 %v6275_v53  ;;  %4510 = vmatprep.subr.bf16.mxu1 %v6287_v57 }
  0x87   :  { %4480 = vmatpush1.bf16.msra.mxu0 %v6305_v63  ;;  %4512 = vmatpush1.bf16.msra.mxu1 %v6309_v0 }
  0x88   :  { %4482 = vmatprep.subr.bf16.mxu0 %v6311_v1  ;;  %4514 = vmatprep.subr.bf16.mxu1 %v6323_v7 }
  0x8b   :  { %4484 = vmatpush1.bf16.msra.mxu0 %v6341_v16  ;;  %4516 = vmatpush1.bf16.msra.mxu1 %v6345_v19 }
  0x8c   :  { %4486 = vmatprep.subr.bf16.mxu0 %v6347_v20  ;;  %4518 = vmatprep.subr.bf16.mxu1 %v6359_v25 }
  0x8f   :  { %4488 = vmatpush1.bf16.msra.mxu0 %v6377_v34  ;;  %4520 = vmatpush1.bf16.msra.mxu1 %v6381_v36  ;;  %v223_v34 = vlaneseq }
  0x90   :  { %4490 = vmatprep.subr.bf16.mxu0 %v6383_v37  ;;  %4522 = vmatprep.subr.bf16.mxu1 %v6395_v43 }
  0x93   :  { %4492 = vmatpush1.bf16.msra.mxu0 %v6413_v50  ;;  %4524 = vmatpush1.bf16.msra.mxu1 %v6417_v54 }
  0x94   :  { %4526 = vmatprep.subr.bf16.mxu0 %v6419_v55  ;;  %4558 = vmatprep.subr.bf16.mxu1 %v6431_v60  ;;  %v4202_v60 = vld [vmem:[%s7921_s0 + $0x38] sm:$0xff] }
 0x129   :  { %v490_v30 = vpop.f32.mrb[2].mxu0  ;;  %v7055_v46 = vpop.f32.mrb[2].mxu1 }
 0x12a   :  { %v887_v24 = vadd.f32 %v4199_v21, %v490_v30  ;;  %v492_v3 = vpop.f32.mrb[3].mxu0  ;;  %v563_v15 = vpop.f32.mrb[3].mxu1  ;;  %v224_v21 = vshrl.u32 %v223_v34, 7 }
 0x12b   :  { %v888_v56 = vadd.f32 %v4200_v32, %v492_v3  ;;  %v890_v55 = vadd.f32 %v4202_v60, %v563_v15 }
 0x12c   :  { %v4203_v2 = vmul.f32 -1.442695, %v887_v24  ;;  %v225_v30 = vsub.s32 0, %v224_v21  ;;  %v229_v24 = vsub.s32 1, %v224_v21  ;;  %v233_v15 = vsub.s32 2, %v224_v21 }
 0x12d   :  { %v4204_v54 = vmul.f32 -1.442695, %v888_v56 }
 0x12e   :  { %5854 = vpow2.f32 %v4203_v2 }
 0x12f   :  { %5856 = vpow2.f32 %v4204_v54  ;;  %v221_v54 = vld [vmem:[%s7922_s3] sm:$0xf] }
 0x130   :  { %5858 = vtanh.f32 %v890_v55  ;;  %v7063_v60 = vrot.slane %v221_v54, %v225_v30  ;;  %v7066_v55 = vrot.slane %v221_v54, %v229_v24  ;;  %v7072_v30 = vrot.slane %v221_v54, %v233_v15 }
 0x138   :  { %v5855_v50 = vpop.eup %5854 }
 0x139   :  { %v5857_v43 = vpop.eup %5856  ;;  %v900_v37 = vadd.f32 1.0, %v5855_v50 }
 0x13a   :  { %v901_v36 = vadd.f32 1.0, %v5857_v43  ;;  %v5859_v32 = vpop.eup %5858 }
 0x13b   :  { %5860 = vrcp.f32 %v900_v37 }
 0x13c   :  { %5862 = vrcp.f32 %v901_v36 }
 0x145   :  { %v5861_v3 = vpop.eup %5860 }
 0x146   :  { %v5863_v56 = vpop.eup %5862  ;;  %v911_v2 = vmul.f32 %v5861_v3, %v5859_v32  ;;  %v237_v32 = vsub.s32 3, %v224_v21 }
 0x147   :  { %v910_v50 = vmul.f32 %v5863_v56, %v6732_v62 }
 0x148   :  { %v7074_v62 = vrot.slane %v221_v54, %v237_v32 }
 0x149   :  { %v7068_v43 = vadd.f32 %v911_v2, %v910_v50  ;;  %v632_v36 = vpop.f32.mrb[0].mxu0  ;;  %v703_v34 = vpop.f32.mrb[0].mxu1 }
 0x14a   :  { %v712_v37 = vadd.f32 %v632_v36, %v7063_v60  ;;  %v634_v25 = vpop.f32.mrb[1].mxu0  ;;  %v705_v20 = vpop.f32.mrb[1].mxu1  ;;  %v714_v24 = vadd.f32 %v703_v34, %v7072_v30 }
 0x14b   :  { %v713_v19 = vadd.f32 %v634_v25, %v7066_v55  ;;  %v715_v3 = vadd.f32 %v705_v20, %v7074_v62  ;;  %v4201_v20 = vld [vmem:[%s7921_s0 + $0x30] sm:$0xff] }
 0x14c   :  { %v4196_v16 = vmul.f32 -1.442695, %v712_v37  ;;  %v4198_v56 = vmul.f32 -1.442695, %v714_v24  ;;  %v889_v34 = vadd.f32 %v4201_v20, %v7055_v46  ;;  %v8211_v20 = vld [vmem:[#allocation50_spill] sm:$0xff] }
 0x14d   :  { %v4197_v7 = vmul.f32 -1.442695, %v713_v19 }
 0x14e   :  { %5864 = vpow2.f32 %v4196_v16  ;;  %v4205_v24 = vmul.f32 -1.442695, %v889_v34  ;;  %v8212_v34 = vld [vmem:[#allocation51_spill] sm:$0xff] }
 0x14f   :  { %5866 = vpow2.f32 %v4197_v7 }
 0x150   :  { %5868 = vtanh.f32 %v715_v3 }
 0x151   :  { %5870 = vpow2.f32 %v4198_v56 }
 0x158   :  { %v5865_v2 = vpop.eup %5864 }
 0x159   :  { %v725_v50 = vadd.f32 1.0, %v5865_v2  ;;  %v5867_v36 = vpop.eup %5866 }
 0x15a   :  { %v726_v25 = vadd.f32 1.0, %v5867_v36  ;;  %v5869_v19 = vpop.eup %5868  ;;  %v8203_v36 = vld [vmem:[#allocation42_spill] sm:$0xff] }
 0x15b   :  { %5872 = vrcp.f32 %v725_v50  ;;  %v5871_v16 = vpop.eup %5870  ;;  %v8202_v50 = vld [vmem:[#allocation41_spill] sm:$0xff] }
 0x15c   :  { %5874 = vrcp.f32 %v726_v25  ;;  %v727_v54 = vadd.f32 1.0, %v5871_v16  ;;  %v8204_v25 = vld [vmem:[#allocation43_spill] sm:$0xff]  ;;  %v8205_v16 = vld [vmem:[#allocation44_spill] sm:$0xff] }
 0x15e   :  { %5876 = vrcp.f32 %v727_v54  ;;  %v8209_v54 = vld [vmem:[#allocation48_spill] sm:$0xff] }
 0x165   :  { %v5873_v21 = vpop.eup %5872 }
 0x166   :  { %v736_v37 = vmul.f32 %v5873_v21, %v5869_v19  ;;  %v5875_v7 = vpop.eup %5874  ;;  %v8206_v21 = vld [vmem:[#allocation45_spill] sm:$0xff] }
 0x167   :  { %v735_v15 = vmul.f32 0.0, %v5875_v7  ;;  %v8208_v7 = vld [vmem:[#allocation47_spill] sm:$0xff] }
 0x168   :  { %v5877_v3 = vpop.eup %5876 }
 0x169   :  { %v7078_v32 = vadd.f32 %v736_v37, %v735_v15  ;;  %v8207_v37 = vld [vmem:[#allocation46_spill] sm:$0xff]  ;;  %v8210_v15 = vld [vmem:[#allocation49_spill] sm:$0xff] }
 0x16b   :  { %5878 = vtanh.f32 %v7078_v32 }
 0x16c   :  { %5880 = vpow2.f32 %v4205_v24  ;;  %v8213_v24 = vld [vmem:[#allocation53_spill] sm:$0xff] }
 0x175   :  { %v5879_v56 = vpop.eup %5878 }
 0x176   :  { %v739_v2 = vmul.f32 %v5879_v56, %v5877_v3  ;;  %v5881_v46 = vpop.eup %5880  ;;  %v8214_v3 = vld [vmem:[#allocation54_spill] sm:$0xff]  ;;  %v8215_v56 = vld [vmem:[#allocation55_spill] sm:$0xff] }
 0x177   :  { %v902_v19 = vadd.f32 1.0, %v5881_v46  ;;  %v8217_v46 = vld [vmem:[#allocation57_spill] sm:$0xff] }
 0x178   :  { %805 = vmatmul.mubr.f32.vlgmr.msra.gmra.mrb[4].mxu0 %v739_v2  ;;  %876 = vmatmul.mubr.f32.vlgmr.msra.gmra.mrb[4].mxu1 %v739_v2  ;;  %v8216_v2 = vld [vmem:[#allocation56_spill] sm:$0xff] }
 0x179   :  { %4528 = vmatpush1.bf16.msra.mxu0 %v6449_v10  ;;  %4560 = vmatpush1.bf16.msra.mxu1 %v6453_v11  ;;  %5882 = vrcp.f32 %v902_v19 }
 0x17a   :  { %4530 = vmatprep.subr.bf16.mxu0 %v6455_v12  ;;  %4562 = vmatprep.subr.bf16.mxu1 %v6467_v23  ;;  %5884 = vtanh.f32 %v7068_v43 }
 0x17b   :  { %979 = vmatprep.mubr.f32.mxu0 %v8179_v5  ;;  %1050 = vmatprep.mubr.f32.mxu1 %v8179_v5 }
 0x17d   :  { %4532 = vmatpush1.bf16.msra.mxu0 %v6487_v33  ;;  %4564 = vmatpush1.bf16.msra.mxu1 %v6491_v38 }
 0x17e   :  { %4534 = vmatprep.subr.bf16.mxu0 %v6493_v41  ;;  %4566 = vmatprep.subr.bf16.mxu1 %v6505_v47 }
 0x181   :  { %4536 = vmatpush1.bf16.msra.mxu0 %v6525_v61  ;;  %4568 = vmatpush1.bf16.msra.mxu1 %v8202_v50 }
 0x182   :  { %4538 = vmatprep.subr.bf16.mxu0 %v8203_v36  ;;  %4570 = vmatprep.subr.bf16.mxu1 %v8204_v25 }
 0x183   :  { %v5883_v19 = vpop.eup %5882 }
 0x185   :  { %4540 = vmatpush1.bf16.msra.mxu0 %v8205_v16  ;;  %4572 = vmatpush1.bf16.msra.mxu1 %v8206_v21 }
 0x186   :  { %4542 = vmatprep.subr.bf16.mxu0 %v8207_v37  ;;  %4574 = vmatprep.subr.bf16.mxu1 %v8208_v7  ;;  %v8220_v7 = vld [vmem:[#allocation60_spill] sm:$0xff] }
 0x189   :  { %4544 = vmatpush1.bf16.msra.mxu0 %v8209_v54  ;;  %4576 = vmatpush1.bf16.msra.mxu1 %v8210_v15  ;;  %v8218_v54 = vld [vmem:[#allocation58_spill] sm:$0xff]  ;;  %v8219_v15 = vld [vmem:[#allocation59_spill] sm:$0xff] }
 0x18a   :  { %4546 = vmatprep.subr.bf16.mxu0 %v8211_v20  ;;  %4578 = vmatprep.subr.bf16.mxu1 %v8212_v34  ;;  %v5885_v20 = vpop.eup %5884  ;;  %v8221_v34 = vld [vmem:[#allocation61_spill] sm:$0xff] }
 0x18d   :  { %4548 = vmatpush1.bf16.msra.mxu0 %v6642_v6  ;;  %4580 = vmatpush1.bf16.msra.mxu1 %v8213_v24  ;;  %v914_v6 = vmul.f32 %v5885_v20, %v5883_v19  ;;  %v8222_v24 = vld [vmem:[#allocation62_spill] sm:$0xff]  ;;  %v8229_v20 = vld [vmem:[#allocation69_spill] sm:$0xff] }
 0x18e   :  { %4550 = vmatprep.subr.bf16.mxu0 %v8214_v3  ;;  %4582 = vmatprep.subr.bf16.mxu1 %v8215_v56  ;;  %v8223_v3 = vld [vmem:[#allocation63_spill] sm:$0xff]  ;;  %v8226_v56 = vld [vmem:[#allocation66_spill] sm:$0xff] }
 0x18f   :  { %v8230_v19 = vld [vmem:[#allocation70_spill] sm:$0xff] }
 0x191   :  { %4552 = vmatpush1.bf16.msra.mxu0 %v8216_v2  ;;  %4584 = vmatpush1.bf16.msra.mxu1 %v8217_v46  ;;  %v8224_v2 = vld [vmem:[#allocation64_spill] sm:$0xff]  ;;  %v8225_v46 = vld [vmem:[#allocation65_spill] sm:$0xff] }
 0x192   :  { %4554 = vmatprep.subr.bf16.mxu0 %v8218_v54  ;;  %4586 = vmatprep.subr.bf16.mxu1 %v8219_v15  ;;  %v8227_v54 = vld [vmem:[#allocation67_spill] sm:$0xff]  ;;  %v8238_v15 = vld [vmem:[#allocation78_spill] sm:$0xff] }
 0x195   :  { %4556 = vmatpush1.bf16.msra.mxu0 %v8220_v7  ;;  %4588 = vmatpush1.bf16.msra.mxu1 %v8221_v34  ;;  %v8228_v34 = vld [vmem:[#allocation68_spill] sm:$0xff]  ;;  %v8237_v7 = vld [vmem:[#allocation77_spill] sm:$0xff] }
 0x196   :  { %4590 = vmatprep.subr.bf16.mxu0 %v8222_v24  ;;  %4622 = vmatprep.subr.bf16.mxu1 %v8223_v3  ;;  %v8231_v3 = vld [vmem:[#allocation71_spill] sm:$0xff]  ;;  %v8232_v24 = vld [vmem:[#allocation72_spill] sm:$0xff] }
 0x198   :  { %980 = vmatmul.mubr.f32.vlgmr.msra.gmra.mrb[6].mxu0 %v914_v6  ;;  %1051 = vmatmul.mubr.f32.vlgmr.msra.gmra.mrb[6].mxu1 %v914_v6 }
 0x199   :  { %4592 = vmatpush1.bf16.msra.mxu0 %v8224_v2  ;;  %4624 = vmatpush1.bf16.msra.mxu1 %v8225_v46  ;;  %v8233_v2 = vld [vmem:[#allocation73_spill] sm:$0xff]  ;;  %v8234_v46 = vld [vmem:[#allocation74_spill] sm:$0xff] }
 0x19a   :  { %4594 = vmatprep.subr.bf16.mxu0 %v8226_v56  ;;  %4626 = vmatprep.subr.bf16.mxu1 %v8227_v54  ;;  %v8235_v56 = vld [vmem:[#allocation75_spill] sm:$0xff]  ;;  %v8236_v54 = vld [vmem:[#allocation76_spill] sm:$0xff] }
 0x19b   :  { %1121 = vmatprep.mubr.f32.mxu0 %v8179_v5  ;;  %1192 = vmatprep.mubr.f32.mxu1 %v8179_v5 }
 0x19d   :  { %4596 = vmatpush1.bf16.msra.mxu0 %v8228_v34  ;;  %4628 = vmatpush1.bf16.msra.mxu1 %v8229_v20  ;;  %v8239_v34 = vld [vmem:[#allocation79_spill] sm:$0xff]  ;;  %v8240_v20 = vld [vmem:[#allocation80_spill] sm:$0xff] }
 0x19e   :  { %4598 = vmatprep.subr.bf16.mxu0 %v8230_v19  ;;  %4630 = vmatprep.subr.bf16.mxu1 %v8231_v3  ;;  %v8241_v19 = vld [vmem:[#allocation81_spill] sm:$0xff]  ;;  %v8242_v3 = vld [vmem:[#allocation82_spill] sm:$0xff] }
 0x1a1   :  { %4600 = vmatpush1.bf16.msra.mxu0 %v8232_v24  ;;  %4632 = vmatpush1.bf16.msra.mxu1 %v8233_v2  ;;  %v8243_v24 = vld [vmem:[#allocation83_spill] sm:$0xff] }
 0x1a2   :  { %4602 = vmatprep.subr.bf16.mxu0 %v8234_v46  ;;  %4634 = vmatprep.subr.bf16.mxu1 %v8235_v56  ;;  %v8244_v46 = vld [vmem:[#allocation85_spill] sm:$0xff] }
 0x1a5   :  { %4604 = vmatpush1.bf16.msra.mxu0 %v8236_v54  ;;  %4636 = vmatpush1.bf16.msra.mxu1 %v8237_v7 }
 0x1a6   :  { %4606 = vmatprep.subr.bf16.mxu0 %v8238_v15  ;;  %4638 = vmatprep.subr.bf16.mxu1 %v8239_v34 }
 0x1a9   :  { %4608 = vmatpush1.bf16.msra.mxu0 %v8240_v20  ;;  %4640 = vmatpush1.bf16.msra.mxu1 %v8241_v19 }
 0x1aa   :  { %4610 = vmatprep.subr.bf16.mxu0 %v8242_v3  ;;  %4642 = vmatprep.subr.bf16.mxu1 %v8243_v24 }
 0x1ad   :  { %4612 = vmatpush1.bf16.msra.mxu0 %v6943_v58  ;;  %4644 = vmatpush1.bf16.msra.mxu1 %v8244_v46 }
 0x1ae   :  { %4614 = vmatprep.subr.bf16.mxu0 %v6955_v28  ;;  %4646 = vmatprep.subr.bf16.mxu1 %v6957_v14 }
 0x1b1   :  { %4616 = vmatpush1.bf16.msra.mxu0 %v6979_v48  ;;  %4648 = vmatpush1.bf16.msra.mxu1 %v6981_v59 }
 0x1b2   :  { %4618 = vmatprep.subr.bf16.mxu0 %v6988_v42  ;;  %4650 = vmatprep.subr.bf16.mxu1 %v6990_v45 }
 0x1b5   :  { %4620 = vmatpush1.bf16.msra.mxu0 %v7003_v49  ;;  %4652 = vmatpush1.bf16.msra.mxu1 %v7005_v29 }
 0x1b6   :  { %4654 = vmatprep.subr.bf16.mxu0 %v6131_v4  ;;  %4686 = vmatprep.subr.bf16.mxu1 %v6142_v8 }
 0x1b8   :  { %1122 = vmatmul.mubr.f32.vlgmr.msra.gmra.mrb[4].mxu0 %v914_v6  ;;  %1193 = vmatmul.mubr.f32.vlgmr.msra.gmra.mrb[4].mxu1 %v914_v6  ;;  %v8245_v6 = vld [vmem:[#allocation28_spill] sm:$0xff] }
 0x1b9   :  { %4656 = vmatpush1.bf16.msra.mxu0 %v6144_v9  ;;  %4688 = vmatpush1.bf16.msra.mxu1 %v6156_v13 }
 0x1ba   :  { %4658 = vmatprep.subr.bf16.mxu0 %v6169_v17  ;;  %4690 = vmatprep.subr.bf16.mxu1 %v6171_v18 }
 0x1bb   :  { %1295 = vmatprep.mubr.f32.mxu0 %v8179_v5  ;;  %1366 = vmatprep.mubr.f32.mxu1 %v8179_v5 }
 0x1bd   :  { %4660 = vmatpush1.bf16.msra.mxu0 %v6183_v22  ;;  %4692 = vmatpush1.bf16.msra.mxu1 %v6196_v26 }
 0x1be   :  { %4662 = vmatprep.subr.bf16.mxu0 %v6198_v27  ;;  %4694 = vmatprep.subr.bf16.mxu1 %v6209_v31 }
 0x1c1   :  { %4664 = vmatpush1.bf16.msra.mxu0 %v6221_v35  ;;  %4696 = vmatpush1.bf16.msra.mxu1 %v6234_v39  ;;  %v8246_v39 = vld [vmem:[#allocation29_spill] sm:$0xff] }
 0x1c2   :  { %4666 = vmatprep.subr.bf16.mxu0 %v6236_v40  ;;  %4698 = vmatprep.subr.bf16.mxu1 %v6248_v44  ;;  %v8247_v40 = vld [vmem:[#allocation30_spill] sm:$0xff]  ;;  %v8248_v44 = vld [vmem:[#allocation31_spill] sm:$0xff] }
 0x1c5   :  { %4668 = vmatpush1.bf16.msra.mxu0 %v6269_v51  ;;  %4700 = vmatpush1.bf16.msra.mxu1 %v6273_v52  ;;  %v8249_v51 = vld [vmem:[#allocation32_spill] sm:$0xff]  ;;  %v8250_v52 = vld [vmem:[#allocation33_spill] sm:$0xff] }
 0x1c6   :  { %4670 = vmatprep.subr.bf16.mxu0 %v6275_v53  ;;  %4702 = vmatprep.subr.bf16.mxu1 %v6287_v57  ;;  %v8251_v53 = vld [vmem:[#allocation34_spill] sm:$0xff]  ;;  %v8252_v57 = vld [vmem:[#allocation35_spill] sm:$0xff] }
 0x1c9   :  { %4672 = vmatpush1.bf16.msra.mxu0 %v6305_v63  ;;  %4704 = vmatpush1.bf16.msra.mxu1 %v6309_v0  ;;  %v8253_v63 = vld [vmem:[#allocation36_spill] sm:$0xff]  ;;  %v8254_v0 = vld [vmem:[#allocation37_spill] sm:$0xff] }
 0x1ca   :  { %4674 = vmatprep.subr.bf16.mxu0 %v6311_v1  ;;  %4706 = vmatprep.subr.bf16.mxu1 %v8245_v6  ;;  %v8255_v1 = vld [vmem:[#allocation38_spill] sm:$0xff]  ;;  %v8256_v6 = vld [vmem:[#allocation39_spill] sm:$0xff] }
 0x1cd   :  { %4676 = vmatpush1.bf16.msra.mxu0 %v8246_v39  ;;  %4708 = vmatpush1.bf16.msra.mxu1 %v8247_v40  ;;  %v8257_v39 = vld [vmem:[#allocation40_spill] sm:$0xff] }
 0x1ce   :  { %4678 = vmatprep.subr.bf16.mxu0 %v8248_v44  ;;  %4710 = vmatprep.subr.bf16.mxu1 %v8249_v51  ;;  %v4209_v51 = vld [vmem:[%s7921_s0 + $0x40] sm:$0xff] }
 0x1d1   :  { %4680 = vmatpush1.bf16.msra.mxu0 %v8250_v52  ;;  %4712 = vmatpush1.bf16.msra.mxu1 %v8251_v53  ;;  %v4210_v53 = vld [vmem:[%s7921_s0 + $0x48] sm:$0xff] }
 0x1d2   :  { %4682 = vmatprep.subr.bf16.mxu0 %v8252_v57  ;;  %4714 = vmatprep.subr.bf16.mxu1 %v8253_v63 }
 0x1d5   :  { %4684 = vmatpush1.bf16.msra.mxu0 %v8254_v0  ;;  %4716 = vmatpush1.bf16.msra.mxu1 %v8255_v1 }
 0x1d6   :  { %4718 = vmatprep.subr.bf16.mxu0 %v8256_v6  ;;  %4750 = vmatprep.subr.bf16.mxu1 %v8257_v39  ;;  %v4212_v39 = vld [vmem:[%s7921_s0 + $0x58] sm:$0xff] }
 0x26b   :  { %v981_v52 = vpop.f32.mrb[6].mxu0  ;;  %v1052_v57 = vpop.f32.mrb[6].mxu1 }
 0x26c   :  { %v1378_v44 = vadd.f32 %v4209_v51, %v981_v52  ;;  %v983_v63 = vpop.f32.mrb[7].mxu0  ;;  %v1054_v40 = vpop.f32.mrb[7].mxu1 }
 0x26d   :  { %v1379_v0 = vadd.f32 %v4210_v53, %v983_v63  ;;  %v1381_v6 = vadd.f32 %v4212_v39, %v1054_v40 }
 0x26e   :  { %v4213_v35 = vmul.f32 -1.442695, %v1378_v44 }
 0x26f   :  { %v4214_v1 = vmul.f32 -1.442695, %v1379_v0 }
 0x270   :  { %5886 = vpow2.f32 %v4213_v35 }
 0x271   :  { %5888 = vpow2.f32 %v4214_v1 }
 0x272   :  { %5890 = vtanh.f32 %v1381_v6 }
 0x27a   :  { %v5887_v31 = vpop.eup %5886 }
 0x27b   :  { %v1391_v27 = vadd.f32 1.0, %v5887_v31  ;;  %v5889_v26 = vpop.eup %5888 }
 0x27c   :  { %v1392_v22 = vadd.f32 1.0, %v5889_v26  ;;  %v5891_v51 = vpop.eup %5890 }
 0x27d   :  { %5892 = vrcp.f32 %v1391_v27 }
 0x27e   :  { %5894 = vrcp.f32 %v1392_v22 }
 0x287   :  { %v5893_v52 = vpop.eup %5892 }
 0x288   :  { %v1402_v18 = vmul.f32 %v5893_v52, %v5891_v51  ;;  %v5895_v53 = vpop.eup %5894 }
 0x289   :  { %v1401_v44 = vmul.f32 %v5895_v53, %v7068_v43 }
 0x28b   :  { %v1123_v35 = vpop.f32.mrb[4].mxu0  ;;  %v1194_v63 = vpop.f32.mrb[4].mxu1  ;;  %v7198_v0 = vadd.f32 %v1402_v18, %v1401_v44 }
 0x28c   :  { %v1203_v1 = vadd.f32 %v1123_v35, %v7063_v60  ;;  %v1125_v39 = vpop.f32.mrb[5].mxu0  ;;  %v1196_v40 = vpop.f32.mrb[5].mxu1  ;;  %v1205_v22 = vadd.f32 %v1194_v63, %v7072_v30 }
 0x28d   :  { %v1204_v31 = vadd.f32 %v1125_v39, %v7066_v55  ;;  %v1206_v26 = vadd.f32 %v1196_v40, %v7074_v62  ;;  %v4211_v40 = vld [vmem:[%s7921_s0 + $0x50] sm:$0xff] }
 0x28e   :  { %v4206_v6 = vmul.f32 -1.442695, %v1203_v1  ;;  %v4208_v51 = vmul.f32 -1.442695, %v1205_v22  ;;  %v1380_v22 = vadd.f32 %v4211_v40, %v1052_v57  ;;  %v8267_v40 = vld [vmem:[#allocation56_spill] sm:$0xff] }
 0x28f   :  { %v4207_v27 = vmul.f32 -1.442695, %v1204_v31 }
 0x290   :  { %5896 = vpow2.f32 %v4206_v6 }
 0x291   :  { %5898 = vpow2.f32 %v4207_v27 }
 0x292   :  { %5900 = vtanh.f32 %v1206_v26 }
 0x293   :  { %5902 = vpow2.f32 %v4208_v51 }
 0x29a   :  { %v5897_v43 = vpop.eup %5896 }
 0x29b   :  { %v1216_v52 = vadd.f32 1.0, %v5897_v43  ;;  %v5899_v18 = vpop.eup %5898  ;;  %v4215_v43 = vmul.f32 -1.442695, %v1380_v22  ;;  %v8268_v22 = vld [vmem:[#allocation57_spill] sm:$0xff] }
 0x29c   :  { %v1217_v53 = vadd.f32 1.0, %v5899_v18  ;;  %v5901_v44 = vpop.eup %5900 }
 0x29d   :  { %5904 = vrcp.f32 %v1216_v52  ;;  %v5903_v35 = vpop.eup %5902 }
 0x29e   :  { %5906 = vrcp.f32 %v1217_v53  ;;  %v1218_v6 = vadd.f32 1.0, %v5903_v35  ;;  %v8259_v53 = vld [vmem:[#allocation48_spill] sm:$0xff]  ;;  %v8261_v35 = vld [vmem:[#allocation50_spill] sm:$0xff] }
 0x2a0   :  { %5908 = vrcp.f32 %v1218_v6  ;;  %v8265_v6 = vld [vmem:[#allocation54_spill] sm:$0xff] }
 0x2a7   :  { %v5905_v39 = vpop.eup %5904 }
 0x2a8   :  { %v1227_v1 = vmul.f32 %v5905_v39, %v5901_v44  ;;  %v5907_v31 = vpop.eup %5906  ;;  %v8260_v44 = vld [vmem:[#allocation49_spill] sm:$0xff]  ;;  %v8262_v39 = vld [vmem:[#allocation51_spill] sm:$0xff] }
 0x2a9   :  { %v1226_v27 = vmul.f32 %v5907_v31, %v7078_v32  ;;  %v8258_v32 = vld [vmem:[#allocation47_spill] sm:$0xff]  ;;  %v8264_v31 = vld [vmem:[#allocation53_spill] sm:$0xff] }
 0x2aa   :  { %v5909_v26 = vpop.eup %5908 }
 0x2ab   :  { %v7205_v63 = vadd.f32 %v1227_v1, %v1226_v27  ;;  %v8263_v1 = vld [vmem:[#allocation52_spill] sm:$0xff]  ;;  %v8266_v27 = vld [vmem:[#allocation55_spill] sm:$0xff] }
 0x2ad   :  { %5910 = vtanh.f32 %v7205_v63 }
 0x2ae   :  { %5912 = vpow2.f32 %v4215_v43 }
 0x2af   :  { %5914 = vtanh.f32 %v7198_v0 }
 0x2b7   :  { %v5911_v51 = vpop.eup %5910 }
 0x2b8   :  { %v1230_v52 = vmul.f32 %v5911_v51, %v5909_v26  ;;  %v5913_v57 = vpop.eup %5912  ;;  %v8269_v26 = vld [vmem:[#allocation58_spill] sm:$0xff]  ;;  %v8270_v51 = vld [vmem:[#allocation59_spill] sm:$0xff] }
 0x2b9   :  { %v1393_v18 = vadd.f32 1.0, %v5913_v57  ;;  %v5915_v43 = vpop.eup %5914  ;;  %v8271_v57 = vld [vmem:[#allocation60_spill] sm:$0xff] }
 0x2ba   :  { %1296 = vmatmul.mubr.f32.vlgmr.msra.gmra.mrb[8].mxu0 %v1230_v52  ;;  %1367 = vmatmul.mubr.f32.vlgmr.msra.gmra.mrb[8].mxu1 %v1230_v52 }
 0x2bb   :  { %4720 = vmatpush1.bf16.msra.mxu0 %v6449_v10  ;;  %4752 = vmatpush1.bf16.msra.mxu1 %v6453_v11  ;;  %5916 = vrcp.f32 %v1393_v18  ;;  %v8272_v18 = vld [vmem:[#allocation61_spill] sm:$0xff] }
 0x2bc   :  { %4722 = vmatprep.subr.bf16.mxu0 %v6455_v12  ;;  %4754 = vmatprep.subr.bf16.mxu1 %v6467_v23 }
 0x2bd   :  { %1470 = vmatprep.mubr.f32.mxu0 %v8179_v5  ;;  %1541 = vmatprep.mubr.f32.mxu1 %v8179_v5 }
 0x2bf   :  { %4724 = vmatpush1.bf16.msra.mxu0 %v6487_v33  ;;  %4756 = vmatpush1.bf16.msra.mxu1 %v6491_v38 }
 0x2c0   :  { %4726 = vmatprep.subr.bf16.mxu0 %v6493_v41  ;;  %4758 = vmatprep.subr.bf16.mxu1 %v6505_v47 }
 0x2c3   :  { %4728 = vmatpush1.bf16.msra.mxu0 %v6525_v61  ;;  %4760 = vmatpush1.bf16.msra.mxu1 %v8202_v50 }
 0x2c4   :  { %4730 = vmatprep.subr.bf16.mxu0 %v8203_v36  ;;  %4762 = vmatprep.subr.bf16.mxu1 %v8204_v25 }
 0x2c5   :  { %v5917_v52 = vpop.eup %5916 }
 0x2c7   :  { %4732 = vmatpush1.bf16.msra.mxu0 %v8205_v16  ;;  %4764 = vmatpush1.bf16.msra.mxu1 %v8206_v21 }
 0x2c8   :  { %4734 = vmatprep.subr.bf16.mxu0 %v8207_v37  ;;  %4766 = vmatprep.subr.bf16.mxu1 %v8258_v32 }
 0x2cb   :  { %4736 = vmatpush1.bf16.msra.mxu0 %v8259_v53  ;;  %4768 = vmatpush1.bf16.msra.mxu1 %v8260_v44 }
 0x2cc   :  { %4738 = vmatprep.subr.bf16.mxu0 %v8261_v35  ;;  %4770 = vmatprep.subr.bf16.mxu1 %v8262_v39 }
 0x2cf   :  { %4740 = vmatpush1.bf16.msra.mxu0 %v8263_v1  ;;  %4772 = vmatpush1.bf16.msra.mxu1 %v8264_v31  ;;  %v1405_v1 = vmul.f32 %v5917_v52, %v5915_v43  ;;  %v8273_v31 = vld [vmem:[#allocation62_spill] sm:$0xff]  ;;  %v8280_v43 = vld [vmem:[#allocation69_spill] sm:$0xff] }
 0x2d0   :  { %4742 = vmatprep.subr.bf16.mxu0 %v8265_v6  ;;  %4774 = vmatprep.subr.bf16.mxu1 %v8266_v27  ;;  %v8274_v6 = vld [vmem:[#allocation63_spill] sm:$0xff]  ;;  %v8281_v52 = vld [vmem:[#allocation70_spill] sm:$0xff] }
 0x2d3   :  { %4744 = vmatpush1.bf16.msra.mxu0 %v8267_v40  ;;  %4776 = vmatpush1.bf16.msra.mxu1 %v8268_v22  ;;  %v8275_v40 = vld [vmem:[#allocation64_spill] sm:$0xff]  ;;  %v8276_v22 = vld [vmem:[#allocation65_spill] sm:$0xff] }
 0x2d4   :  { %4746 = vmatprep.subr.bf16.mxu0 %v8269_v26  ;;  %4778 = vmatprep.subr.bf16.mxu1 %v8270_v51  ;;  %v8277_v26 = vld [vmem:[#allocation66_spill] sm:$0xff]  ;;  %v8278_v51 = vld [vmem:[#allocation67_spill] sm:$0xff] }
 0x2d7   :  { %4748 = vmatpush1.bf16.msra.mxu0 %v8271_v57  ;;  %4780 = vmatpush1.bf16.msra.mxu1 %v8272_v18  ;;  %v8279_v18 = vld [vmem:[#allocation68_spill] sm:$0xff] }
 0x2d8   :  { %4782 = vmatprep.subr.bf16.mxu0 %v8273_v31  ;;  %4814 = vmatprep.subr.bf16.mxu1 %v8274_v6  ;;  %v8282_v6 = vld [vmem:[#allocation71_spill] sm:$0xff]  ;;  %v8283_v31 = vld [vmem:[#allocation72_spill] sm:$0xff] }
 0x2da   :  { %1471 = vmatmul.mubr.f32.vlgmr.msra.gmra.mrb[10].mxu0 %v1405_v1  ;;  %1542 = vmatmul.mubr.f32.vlgmr.msra.gmra.mrb[10].mxu1 %v1405_v1 }
 0x2db   :  { %4784 = vmatpush1.bf16.msra.mxu0 %v8275_v40  ;;  %4816 = vmatpush1.bf16.msra.mxu1 %v8276_v22  ;;  %v8284_v22 = vld [vmem:[#allocation74_spill] sm:$0xff] }
 0x2dc   :  { %4786 = vmatprep.subr.bf16.mxu0 %v8277_v26  ;;  %4818 = vmatprep.subr.bf16.mxu1 %v8278_v51 }
 0x2dd   :  { %1612 = vmatprep.mubr.f32.mxu0 %v8179_v5  ;;  %1683 = vmatprep.mubr.f32.mxu1 %v8179_v5 }
 0x2df   :  { %4788 = vmatpush1.bf16.msra.mxu0 %v8279_v18  ;;  %4820 = vmatpush1.bf16.msra.mxu1 %v8280_v43 }
 0x2e0   :  { %4790 = vmatprep.subr.bf16.mxu0 %v8281_v52  ;;  %4822 = vmatprep.subr.bf16.mxu1 %v8282_v6 }
 0x2e3   :  { %4792 = vmatpush1.bf16.msra.mxu0 %v8283_v31  ;;  %4824 = vmatpush1.bf16.msra.mxu1 %v8233_v2 }
 0x2e4   :  { %4794 = vmatprep.subr.bf16.mxu0 %v8284_v22  ;;  %4826 = vmatprep.subr.bf16.mxu1 %v8235_v56 }
 0x2e7   :  { %4796 = vmatpush1.bf16.msra.mxu0 %v8236_v54  ;;  %4828 = vmatpush1.bf16.msra.mxu1 %v8237_v7 }
 0x2e8   :  { %4798 = vmatprep.subr.bf16.mxu0 %v8238_v15  ;;  %4830 = vmatprep.subr.bf16.mxu1 %v8239_v34 }
 0x2eb   :  { %4800 = vmatpush1.bf16.msra.mxu0 %v8240_v20  ;;  %4832 = vmatpush1.bf16.msra.mxu1 %v8241_v19 }
 0x2ec   :  { %4802 = vmatprep.subr.bf16.mxu0 %v8242_v3  ;;  %4834 = vmatprep.subr.bf16.mxu1 %v8243_v24 }
 0x2ef   :  { %4804 = vmatpush1.bf16.msra.mxu0 %v6943_v58  ;;  %4836 = vmatpush1.bf16.msra.mxu1 %v8244_v46 }
 0x2f0   :  { %4806 = vmatprep.subr.bf16.mxu0 %v6955_v28  ;;  %4838 = vmatprep.subr.bf16.mxu1 %v6957_v14 }
 0x2f3   :  { %4808 = vmatpush1.bf16.msra.mxu0 %v6979_v48  ;;  %4840 = vmatpush1.bf16.msra.mxu1 %v6981_v59  ;;  %v8285_v59 = vld [vmem:[#allocation12_spill] sm:$0xff] }
 0x2f4   :  { %4810 = vmatprep.subr.bf16.mxu0 %v6988_v42  ;;  %4842 = vmatprep.subr.bf16.mxu1 %v6990_v45  ;;  %v8295_v45 = vld [vmem:[#allocation22_spill] sm:$0xff]  ;;  %v8296_v42 = vld [vmem:[#allocation23_spill] sm:$0xff] }
 0x2f7   :  { %4812 = vmatpush1.bf16.msra.mxu0 %v7003_v49  ;;  %4844 = vmatpush1.bf16.msra.mxu1 %v7005_v29  ;;  %v8286_v49 = vld [vmem:[#allocation13_spill] sm:$0xff]  ;;  %v8287_v29 = vld [vmem:[#allocation14_spill] sm:$0xff] }
 0x2f8   :  { %4846 = vmatprep.subr.bf16.mxu0 %v6131_v4  ;;  %4878 = vmatprep.subr.bf16.mxu1 %v6142_v8  ;;  %v8288_v4 = vld [vmem:[#allocation15_spill] sm:$0xff]  ;;  %v8289_v8 = vld [vmem:[#allocation16_spill] sm:$0xff] }
 0x2fa   :  { %1613 = vmatmul.mubr.f32.vlgmr.msra.gmra.mrb[8].mxu0 %v1405_v1  ;;  %1684 = vmatmul.mubr.f32.vlgmr.msra.gmra.mrb[8].mxu1 %v1405_v1  ;;  %v8290_v1 = vld [vmem:[#allocation17_spill] sm:$0xff] }
 0x2fb   :  { %4848 = vmatpush1.bf16.msra.mxu0 %v6144_v9  ;;  %4880 = vmatpush1.bf16.msra.mxu1 %v6156_v13  ;;  %v8291_v9 = vld [vmem:[#allocation18_spill] sm:$0xff]  ;;  %v8292_v13 = vld [vmem:[#allocation19_spill] sm:$0xff] }
 0x2fc   :  { %4850 = vmatprep.subr.bf16.mxu0 %v6169_v17  ;;  %4882 = vmatprep.subr.bf16.mxu1 %v8285_v59  ;;  %v8293_v17 = vld [vmem:[#allocation20_spill] sm:$0xff]  ;;  %v8294_v59 = vld [vmem:[#allocation21_spill] sm:$0xff] }
 0x2fd   :  { %1786 = vmatprep.mubr.f32.mxu0 %v8179_v5  ;;  %1857 = vmatprep.mubr.f32.mxu1 %v8179_v5 }
 0x2ff   :  { %4852 = vmatpush1.bf16.msra.mxu0 %v8286_v49  ;;  %4884 = vmatpush1.bf16.msra.mxu1 %v8287_v29  ;;  %v8297_v49 = vld [vmem:[#allocation24_spill] sm:$0xff]  ;;  %v8298_v29 = vld [vmem:[#allocation25_spill] sm:$0xff] }
 0x300   :  { %4854 = vmatprep.subr.bf16.mxu0 %v8288_v4  ;;  %4886 = vmatprep.subr.bf16.mxu1 %v8289_v8  ;;  %v8299_v4 = vld [vmem:[#allocation26_spill] sm:$0xff]  ;;  %v8300_v8 = vld [vmem:[#allocation27_spill] sm:$0xff] }
 0x303   :  { %4856 = vmatpush1.bf16.msra.mxu0 %v8290_v1  ;;  %4888 = vmatpush1.bf16.msra.mxu1 %v8291_v9  ;;  %v8301_v1 = vld [vmem:[#allocation28_spill] sm:$0xff]  ;;  %v8302_v9 = vld [vmem:[#allocation29_spill] sm:$0xff] }
 0x304   :  { %4858 = vmatprep.subr.bf16.mxu0 %v8292_v13  ;;  %4890 = vmatprep.subr.bf16.mxu1 %v8293_v17  ;;  %v8303_v13 = vld [vmem:[#allocation30_spill] sm:$0xff]  ;;  %v8304_v17 = vld [vmem:[#allocation31_spill] sm:$0xff] }
 0x307   :  { %4860 = vmatpush1.bf16.msra.mxu0 %v8294_v59  ;;  %4892 = vmatpush1.bf16.msra.mxu1 %v8295_v45  ;;  %v8305_v59 = vld [vmem:[#allocation32_spill] sm:$0xff]  ;;  %v8306_v45 = vld [vmem:[#allocation33_spill] sm:$0xff] }
 0x308   :  { %4862 = vmatprep.subr.bf16.mxu0 %v8296_v42  ;;  %4894 = vmatprep.subr.bf16.mxu1 %v8297_v49  ;;  %v8307_v42 = vld [vmem:[#allocation34_spill] sm:$0xff]  ;;  %v8308_v49 = vld [vmem:[#allocation35_spill] sm:$0xff] }
 0x30b   :  { %4864 = vmatpush1.bf16.msra.mxu0 %v8298_v29  ;;  %4896 = vmatpush1.bf16.msra.mxu1 %v8299_v4  ;;  %v8309_v29 = vld [vmem:[#allocation36_spill] sm:$0xff]  ;;  %v8310_v4 = vld [vmem:[#allocation37_spill] sm:$0xff] }
 0x30c   :  { %4866 = vmatprep.subr.bf16.mxu0 %v8300_v8  ;;  %4898 = vmatprep.subr.bf16.mxu1 %v8301_v1  ;;  %v8311_v8 = vld [vmem:[#allocation38_spill] sm:$0xff]  ;;  %v8312_v1 = vld [vmem:[#allocation39_spill] sm:$0xff] }
 0x30f   :  { %4868 = vmatpush1.bf16.msra.mxu0 %v8302_v9  ;;  %4900 = vmatpush1.bf16.msra.mxu1 %v8303_v13  ;;  %v8313_v9 = vld [vmem:[#allocation40_spill] sm:$0xff] }
 0x310   :  { %4870 = vmatprep.subr.bf16.mxu0 %v8304_v17  ;;  %4902 = vmatprep.subr.bf16.mxu1 %v8305_v59  ;;  %v4219_v59 = vld [vmem:[%s7921_s0 + $0x60] sm:$0xff] }
 0x313   :  { %4872 = vmatpush1.bf16.msra.mxu0 %v8306_v45  ;;  %4904 = vmatpush1.bf16.msra.mxu1 %v8307_v42  ;;  %v4220_v42 = vld [vmem:[%s7921_s0 + $0x68] sm:$0xff] }
 0x314   :  { %4874 = vmatprep.subr.bf16.mxu0 %v8308_v49  ;;  %4906 = vmatprep.subr.bf16.mxu1 %v8309_v29 }
 0x317   :  { %4876 = vmatpush1.bf16.msra.mxu0 %v8310_v4  ;;  %4908 = vmatpush1.bf16.msra.mxu1 %v8311_v8 }
 0x318   :  { %4910 = vmatprep.subr.bf16.mxu0 %v8312_v1  ;;  %4942 = vmatprep.subr.bf16.mxu1 %v8313_v9  ;;  %v4222_v9 = vld [vmem:[%s7921_s0 + $0x78] sm:$0xff] }
 0x3ad   :  { %v1472_v45 = vpop.f32.mrb[10].mxu0  ;;  %v1543_v49 = vpop.f32.mrb[10].mxu1 }
 0x3ae   :  { %v1869_v17 = vadd.f32 %v4219_v59, %v1472_v45  ;;  %v1474_v29 = vpop.f32.mrb[11].mxu0  ;;  %v1545_v13 = vpop.f32.mrb[11].mxu1 }
 0x3af   :  { %v1870_v4 = vadd.f32 %v4220_v42, %v1474_v29  ;;  %v1872_v1 = vadd.f32 %v4222_v9, %v1545_v13 }
 0x3b0   :  { %v4223_v48 = vmul.f32 -1.442695, %v1869_v17 }
 0x3b1   :  { %v4224_v8 = vmul.f32 -1.442695, %v1870_v4 }
 0x3b2   :  { %5918 = vpow2.f32 %v4223_v48 }
 0x3b3   :  { %5920 = vpow2.f32 %v4224_v8 }
 0x3b4   :  { %5922 = vtanh.f32 %v1872_v1 }
 0x3bc   :  { %v5919_v14 = vpop.eup %5918 }
 0x3bd   :  { %v1882_v28 = vadd.f32 1.0, %v5919_v14  ;;  %v5921_v46 = vpop.eup %5920 }
 0x3be   :  { %v1883_v58 = vadd.f32 1.0, %v5921_v46  ;;  %v5923_v45 = vpop.eup %5922 }
 0x3bf   :  { %5924 = vrcp.f32 %v1882_v28 }
 0x3c0   :  { %5926 = vrcp.f32 %v1883_v58 }
 0x3c9   :  { %v5925_v59 = vpop.eup %5924 }
 0x3ca   :  { %v1893_v24 = vmul.f32 %v5925_v59, %v5923_v45  ;;  %v5927_v42 = vpop.eup %5926 }
 0x3cb   :  { %v1892_v4 = vmul.f32 %v5927_v42, %v7198_v0 }
 0x3cd   :  { %v1614_v17 = vpop.f32.mrb[8].mxu0  ;;  %v1685_v8 = vpop.f32.mrb[8].mxu1  ;;  %v7324_v48 = vadd.f32 %v1893_v24, %v1892_v4 }
 0x3ce   :  { %v1694_v29 = vadd.f32 %v1614_v17, %v7063_v60  ;;  %v1616_v9 = vpop.f32.mrb[9].mxu0  ;;  %v1687_v13 = vpop.f32.mrb[9].mxu1  ;;  %v1696_v58 = vadd.f32 %v1685_v8, %v7072_v30 }
 0x3cf   :  { %v1695_v14 = vadd.f32 %v1616_v9, %v7066_v55  ;;  %v1697_v46 = vadd.f32 %v1687_v13, %v7074_v62  ;;  %v4221_v13 = vld [vmem:[%s7921_s0 + $0x70] sm:$0xff] }
 0x3d0   :  { %v4216_v1 = vmul.f32 -1.442695, %v1694_v29  ;;  %v4218_v45 = vmul.f32 -1.442695, %v1696_v58  ;;  %v1871_v58 = vadd.f32 %v4221_v13, %v1543_v49  ;;  %v8321_v13 = vld [vmem:[#allocation61_spill] sm:$0xff] }
 0x3d1   :  { %v4217_v28 = vmul.f32 -1.442695, %v1695_v14 }
 0x3d2   :  { %5928 = vpow2.f32 %v4216_v1 }
 0x3d3   :  { %5930 = vpow2.f32 %v4217_v28 }
 0x3d4   :  { %5932 = vtanh.f32 %v1697_v46 }
 0x3d5   :  { %5934 = vpow2.f32 %v4218_v45 }
 0x3dc   :  { %v5929_v0 = vpop.eup %5928 }
 0x3dd   :  { %v1707_v59 = vadd.f32 1.0, %v5929_v0  ;;  %v5931_v24 = vpop.eup %5930  ;;  %v4225_v0 = vmul.f32 -1.442695, %v1871_v58 }
 0x3de   :  { %v1708_v42 = vadd.f32 1.0, %v5931_v24  ;;  %v5933_v4 = vpop.eup %5932  ;;  %v8314_v24 = vld [vmem:[#allocation52_spill] sm:$0xff] }
 0x3df   :  { %5936 = vrcp.f32 %v1707_v59  ;;  %v5935_v17 = vpop.eup %5934 }
 0x3e0   :  { %5938 = vrcp.f32 %v1708_v42  ;;  %v1709_v1 = vadd.f32 1.0, %v5935_v17  ;;  %v8315_v42 = vld [vmem:[#allocation53_spill] sm:$0xff]  ;;  %v8317_v17 = vld [vmem:[#allocation56_spill] sm:$0xff] }
 0x3e2   :  { %5940 = vrcp.f32 %v1709_v1 }
 0x3e9   :  { %v5937_v9 = vpop.eup %5936 }
 0x3ea   :  { %v1718_v29 = vmul.f32 %v5937_v9, %v5933_v4  ;;  %v5939_v14 = vpop.eup %5938  ;;  %v8316_v4 = vld [vmem:[#allocation54_spill] sm:$0xff]  ;;  %v8318_v9 = vld [vmem:[#allocation57_spill] sm:$0xff] }
 0x3eb   :  { %v1717_v28 = vmul.f32 %v5939_v14, %v7205_v63  ;;  %v8320_v14 = vld [vmem:[#allocation59_spill] sm:$0xff] }
 0x3ec   :  { %v5941_v46 = vpop.eup %5940 }
 0x3ed   :  { %v7331_v8 = vadd.f32 %v1718_v29, %v1717_v28  ;;  %v8319_v29 = vld [vmem:[#allocation58_spill] sm:$0xff] }
 0x3ef   :  { %5942 = vtanh.f32 %v7331_v8 }
 0x3f0   :  { %5944 = vpow2.f32 %v4225_v0  ;;  %v8324_v0 = vld [vmem:[#allocation65_spill] sm:$0xff] }
 0x3f1   :  { %5946 = vtanh.f32 %v7324_v48 }
 0x3f9   :  { %v5943_v45 = vpop.eup %5942 }
 0x3fa   :  { %v1721_v59 = vmul.f32 %v5943_v45, %v5941_v46  ;;  %v5945_v49 = vpop.eup %5944  ;;  %v8322_v46 = vld [vmem:[#allocation62_spill] sm:$0xff]  ;;  %v8323_v45 = vld [vmem:[#allocation63_spill] sm:$0xff] }
 0x3fb   :  { %v1884_v63 = vadd.f32 1.0, %v5945_v49  ;;  %v5947_v1 = vpop.eup %5946  ;;  %v8326_v49 = vld [vmem:[#allocation84_spill] sm:$0xff] }
 0x3fc   :  { %1787 = vmatmul.mubr.f32.vlgmr.msra.gmra.mrb[12].mxu0 %v1721_v59  ;;  %1858 = vmatmul.mubr.f32.vlgmr.msra.gmra.mrb[12].mxu1 %v1721_v59  ;;  %v8325_v59 = vld [vmem:[#allocation83_spill] sm:$0xff] }
 0x3fd   :  { %4912 = vmatpush1.bf16.msra.mxu0 %v6449_v10  ;;  %4944 = vmatpush1.bf16.msra.mxu1 %v6453_v11  ;;  %5948 = vrcp.f32 %v1884_v63  ;;  %v8327_v63 = vld [vmem:[#allocation85_spill] sm:$0xff] }
 0x3fe   :  { %4914 = vmatprep.subr.bf16.mxu0 %v6455_v12  ;;  %4946 = vmatprep.subr.bf16.mxu1 %v6467_v23 }
 0x3ff   :  { %1961 = vmatprep.mubr.f32.mxu0 %v8179_v5  ;;  %2032 = vmatprep.mubr.f32.mxu1 %v8179_v5 }
 0x401   :  { %4916 = vmatpush1.bf16.msra.mxu0 %v6487_v33  ;;  %4948 = vmatpush1.bf16.msra.mxu1 %v6491_v38 }
 0x402   :  { %4918 = vmatprep.subr.bf16.mxu0 %v6493_v41  ;;  %4950 = vmatprep.subr.bf16.mxu1 %v6505_v47 }
 0x405   :  { %4920 = vmatpush1.bf16.msra.mxu0 %v6525_v61  ;;  %4952 = vmatpush1.bf16.msra.mxu1 %v8202_v50 }
 0x406   :  { %4922 = vmatprep.subr.bf16.mxu0 %v8203_v36  ;;  %4954 = vmatprep.subr.bf16.mxu1 %v8204_v25 }
 0x407   :  { %v5949_v28 = vpop.eup %5948 }
 0x408   :  { %v1896_v58 = vmul.f32 %v5949_v28, %v5947_v1  ;;  %v8328_v1 = vld [vmem:[#allocation86_spill] sm:$0xff]  ;;  %v8329_v28 = vld [vmem:[#allocation87_spill] sm:$0xff] }
 0x409   :  { %4924 = vmatpush1.bf16.msra.mxu0 %v8205_v16  ;;  %4956 = vmatpush1.bf16.msra.mxu1 %v8206_v21 }
 0x40a   :  { %4926 = vmatprep.subr.bf16.mxu0 %v8207_v37  ;;  %4958 = vmatprep.subr.bf16.mxu1 %v8258_v32 }
 0x40d   :  { %4928 = vmatpush1.bf16.msra.mxu0 %v8259_v53  ;;  %4960 = vmatpush1.bf16.msra.mxu1 %v8260_v44 }
 0x40e   :  { %4930 = vmatprep.subr.bf16.mxu0 %v8261_v35  ;;  %4962 = vmatprep.subr.bf16.mxu1 %v8262_v39 }
 0x411   :  { %4932 = vmatpush1.bf16.msra.mxu0 %v8314_v24  ;;  %4964 = vmatpush1.bf16.msra.mxu1 %v8315_v42 }
 0x412   :  { %4934 = vmatprep.subr.bf16.mxu0 %v8316_v4  ;;  %4966 = vmatprep.subr.bf16.mxu1 %v8266_v27 }
 0x415   :  { %4936 = vmatpush1.bf16.msra.mxu0 %v8317_v17  ;;  %4968 = vmatpush1.bf16.msra.mxu1 %v8318_v9 }
 0x416   :  { %4938 = vmatprep.subr.bf16.mxu0 %v8319_v29  ;;  %4970 = vmatprep.subr.bf16.mxu1 %v8320_v14 }
 0x419   :  { %4940 = vmatpush1.bf16.msra.mxu0 %v8271_v57  ;;  %4972 = vmatpush1.bf16.msra.mxu1 %v8321_v13 }
 0x41a   :  { %4974 = vmatprep.subr.bf16.mxu0 %v8322_v46  ;;  %5006 = vmatprep.subr.bf16.mxu1 %v8323_v45 }
 0x41c   :  { %1962 = vmatmul.mubr.f32.vlgmr.msra.gmra.mrb[14].mxu0 %v1896_v58  ;;  %2033 = vmatmul.mubr.f32.vlgmr.msra.gmra.mrb[14].mxu1 %v1896_v58 }
 0x41d   :  { %4976 = vmatpush1.bf16.msra.mxu0 %v8275_v40  ;;  %5008 = vmatpush1.bf16.msra.mxu1 %v8324_v0 }
 0x41e   :  { %4978 = vmatprep.subr.bf16.mxu0 %v8277_v26  ;;  %5010 = vmatprep.subr.bf16.mxu1 %v8278_v51 }
 0x41f   :  { %2103 = vmatprep.mubr.f32.mxu0 %v8179_v5  ;;  %2174 = vmatprep.mubr.f32.mxu1 %v8179_v5 }
 0x421   :  { %4980 = vmatpush1.bf16.msra.mxu0 %v8279_v18  ;;  %5012 = vmatpush1.bf16.msra.mxu1 %v8280_v43 }
 0x422   :  { %4982 = vmatprep.subr.bf16.mxu0 %v8281_v52  ;;  %5014 = vmatprep.subr.bf16.mxu1 %v8282_v6 }
 0x425   :  { %4984 = vmatpush1.bf16.msra.mxu0 %v8283_v31  ;;  %5016 = vmatpush1.bf16.msra.mxu1 %v8233_v2 }
 0x426   :  { %4986 = vmatprep.subr.bf16.mxu0 %v8284_v22  ;;  %5018 = vmatprep.subr.bf16.mxu1 %v8235_v56 }
 0x429   :  { %4988 = vmatpush1.bf16.msra.mxu0 %v8236_v54  ;;  %5020 = vmatpush1.bf16.msra.mxu1 %v8237_v7  ;;  %v8330_v7 = vld [vmem:[#allocation88_spill] sm:$0xff] }
 0x42a   :  { %4990 = vmatprep.subr.bf16.mxu0 %v8238_v15  ;;  %5022 = vmatprep.subr.bf16.mxu1 %v8239_v34  ;;  %v8331_v15 = vld [vmem:[#allocation89_spill] sm:$0xff]  ;;  %v8332_v34 = vld [vmem:[#allocation90_spill] sm:$0xff] }
 0x42d   :  { %4992 = vmatpush1.bf16.msra.mxu0 %v8240_v20  ;;  %5024 = vmatpush1.bf16.msra.mxu1 %v8241_v19  ;;  %v8333_v20 = vld [vmem:[#allocation91_spill] sm:$0xff]  ;;  %v8334_v19 = vld [vmem:[#allocation92_spill] sm:$0xff] }
 0x42e   :  { %4994 = vmatprep.subr.bf16.mxu0 %v8242_v3  ;;  %5026 = vmatprep.subr.bf16.mxu1 %v8325_v59  ;;  %v8335_v3 = vld [vmem:[#allocation93_spill] sm:$0xff]  ;;  %v8336_v59 = vld [vmem:[#allocation7_spill] sm:$0xff] }
 0x431   :  { %4996 = vmatpush1.bf16.msra.mxu0 %v8326_v49  ;;  %5028 = vmatpush1.bf16.msra.mxu1 %v8327_v63  ;;  %v8337_v49 = vld [vmem:[#allocation8_spill] sm:$0xff] }
 0x432   :  { %4998 = vmatprep.subr.bf16.mxu0 %v8328_v1  ;;  %5030 = vmatprep.subr.bf16.mxu1 %v8329_v28  ;;  %v8338_v1 = vld [vmem:[#allocation9_spill] sm:$0xff]  ;;  %v8339_v28 = vld [vmem:[#allocation10_spill] sm:$0xff] }
 0x435   :  { %5000 = vmatpush1.bf16.msra.mxu0 %v8330_v7  ;;  %5032 = vmatpush1.bf16.msra.mxu1 %v8331_v15  ;;  %v8340_v7 = vld [vmem:[#allocation11_spill] sm:$0xff]  ;;  %v8341_v15 = vld [vmem:[#allocation12_spill] sm:$0xff] }
 0x436   :  { %5002 = vmatprep.subr.bf16.mxu0 %v8332_v34  ;;  %5034 = vmatprep.subr.bf16.mxu1 %v8333_v20  ;;  %v8351_v20 = vld [vmem:[#allocation22_spill] sm:$0xff]  ;;  %v8352_v34 = vld [vmem:[#allocation23_spill] sm:$0xff] }
 0x439   :  { %5004 = vmatpush1.bf16.msra.mxu0 %v8334_v19  ;;  %5036 = vmatpush1.bf16.msra.mxu1 %v8335_v3  ;;  %v8342_v19 = vld [vmem:[#allocation13_spill] sm:$0xff]  ;;  %v8343_v3 = vld [vmem:[#allocation14_spill] sm:$0xff] }
 0x43a   :  { %5038 = vmatprep.subr.bf16.mxu0 %v8336_v59  ;;  %5070 = vmatprep.subr.bf16.mxu1 %v8337_v49  ;;  %v8344_v59 = vld [vmem:[#allocation15_spill] sm:$0xff]  ;;  %v8345_v49 = vld [vmem:[#allocation16_spill] sm:$0xff] }
 0x43c   :  { %2104 = vmatmul.mubr.f32.vlgmr.msra.gmra.mrb[12].mxu0 %v1896_v58  ;;  %2175 = vmatmul.mubr.f32.vlgmr.msra.gmra.mrb[12].mxu1 %v1896_v58  ;;  %v8346_v58 = vld [vmem:[#allocation17_spill] sm:$0xff] }
 0x43d   :  { %5040 = vmatpush1.bf16.msra.mxu0 %v8338_v1  ;;  %5072 = vmatpush1.bf16.msra.mxu1 %v8339_v28  ;;  %v8347_v1 = vld [vmem:[#allocation18_spill] sm:$0xff]  ;;  %v8348_v28 = vld [vmem:[#allocation19_spill] sm:$0xff] }
 0x43e   :  { %5042 = vmatprep.subr.bf16.mxu0 %v8340_v7  ;;  %5074 = vmatprep.subr.bf16.mxu1 %v8341_v15  ;;  %v8349_v7 = vld [vmem:[#allocation20_spill] sm:$0xff]  ;;  %v8350_v15 = vld [vmem:[#allocation21_spill] sm:$0xff] }
 0x43f   :  { %2277 = vmatprep.mubr.f32.mxu0 %v8179_v5  ;;  %2348 = vmatprep.mubr.f32.mxu1 %v8179_v5 }
 0x441   :  { %5044 = vmatpush1.bf16.msra.mxu0 %v8342_v19  ;;  %5076 = vmatpush1.bf16.msra.mxu1 %v8343_v3  ;;  %v8353_v19 = vld [vmem:[#allocation24_spill] sm:$0xff]  ;;  %v8354_v3 = vld [vmem:[#allocation25_spill] sm:$0xff] }
 0x442   :  { %5046 = vmatprep.subr.bf16.mxu0 %v8344_v59  ;;  %5078 = vmatprep.subr.bf16.mxu1 %v8345_v49  ;;  %v8355_v59 = vld [vmem:[#allocation26_spill] sm:$0xff]  ;;  %v8356_v49 = vld [vmem:[#allocation27_spill] sm:$0xff] }
 0x445   :  { %5048 = vmatpush1.bf16.msra.mxu0 %v8346_v58  ;;  %5080 = vmatpush1.bf16.msra.mxu1 %v8347_v1  ;;  %v8357_v58 = vld [vmem:[#allocation28_spill] sm:$0xff]  ;;  %v8358_v1 = vld [vmem:[#allocation29_spill] sm:$0xff] }
 0x446   :  { %5050 = vmatprep.subr.bf16.mxu0 %v8348_v28  ;;  %5082 = vmatprep.subr.bf16.mxu1 %v8349_v7  ;;  %v8359_v28 = vld [vmem:[#allocation30_spill] sm:$0xff]  ;;  %v8360_v7 = vld [vmem:[#allocation31_spill] sm:$0xff] }
 0x449   :  { %5052 = vmatpush1.bf16.msra.mxu0 %v8350_v15  ;;  %5084 = vmatpush1.bf16.msra.mxu1 %v8351_v20  ;;  %v8361_v15 = vld [vmem:[#allocation32_spill] sm:$0xff]  ;;  %v8362_v20 = vld [vmem:[#allocation33_spill] sm:$0xff] }
 0x44a   :  { %5054 = vmatprep.subr.bf16.mxu0 %v8352_v34  ;;  %5086 = vmatprep.subr.bf16.mxu1 %v8353_v19  ;;  %v8363_v34 = vld [vmem:[#allocation34_spill] sm:$0xff]  ;;  %v8364_v19 = vld [vmem:[#allocation35_spill] sm:$0xff] }
 0x44d   :  { %5056 = vmatpush1.bf16.msra.mxu0 %v8354_v3  ;;  %5088 = vmatpush1.bf16.msra.mxu1 %v8355_v59  ;;  %v8365_v3 = vld [vmem:[#allocation36_spill] sm:$0xff]  ;;  %v8366_v59 = vld [vmem:[#allocation37_spill] sm:$0xff] }
 0x44e   :  { %5058 = vmatprep.subr.bf16.mxu0 %v8356_v49  ;;  %5090 = vmatprep.subr.bf16.mxu1 %v8357_v58  ;;  %v8367_v49 = vld [vmem:[#allocation38_spill] sm:$0xff]  ;;  %v8368_v58 = vld [vmem:[#allocation39_spill] sm:$0xff] }
 0x451   :  { %5060 = vmatpush1.bf16.msra.mxu0 %v8358_v1  ;;  %5092 = vmatpush1.bf16.msra.mxu1 %v8359_v28  ;;  %v8369_v1 = vld [vmem:[#allocation40_spill] sm:$0xff] }
 0x452   :  { %5062 = vmatprep.subr.bf16.mxu0 %v8360_v7  ;;  %5094 = vmatprep.subr.bf16.mxu1 %v8361_v15  ;;  %v4229_v15 = vld [vmem:[%s7921_s0 + $0x80] sm:$0xff] }
 0x455   :  { %5064 = vmatpush1.bf16.msra.mxu0 %v8362_v20  ;;  %5096 = vmatpush1.bf16.msra.mxu1 %v8363_v34  ;;  %v4230_v34 = vld [vmem:[%s7921_s0 + $0x88] sm:$0xff] }
 0x456   :  { %5066 = vmatprep.subr.bf16.mxu0 %v8364_v19  ;;  %5098 = vmatprep.subr.bf16.mxu1 %v8365_v3 }
 0x459   :  { %5068 = vmatpush1.bf16.msra.mxu0 %v8366_v59  ;;  %5100 = vmatpush1.bf16.msra.mxu1 %v8367_v49 }
 0x45a   :  { %5102 = vmatprep.subr.bf16.mxu0 %v8368_v58  ;;  %5134 = vmatprep.subr.bf16.mxu1 %v8369_v1  ;;  %v4232_v1 = vld [vmem:[%s7921_s0 + $0x98] sm:$0xff] }
 0x4ef   :  { %v1963_v20 = vpop.f32.mrb[14].mxu0  ;;  %v2034_v19 = vpop.f32.mrb[14].mxu1 }
 0x4f0   :  { %v2360_v7 = vadd.f32 %v4229_v15, %v1963_v20  ;;  %v1965_v3 = vpop.f32.mrb[15].mxu0  ;;  %v2036_v28 = vpop.f32.mrb[15].mxu1 }
 0x4f1   :  { %v2361_v59 = vadd.f32 %v4230_v34, %v1965_v3  ;;  %v2363_v58 = vadd.f32 %v4232_v1, %v2036_v28 }
 0x4f2   :  { %v4233_v63 = vmul.f32 -1.442695, %v2360_v7 }
 0x4f3   :  { %v4234_v49 = vmul.f32 -1.442695, %v2361_v59 }
 0x4f4   :  { %5950 = vpow2.f32 %v4233_v63 }
 0x4f5   :  { %5952 = vpow2.f32 %v4234_v49 }
 0x4f6   :  { %5954 = vtanh.f32 %v2363_v58 }
 0x4fe   :  { %v5951_v54 = vpop.eup %5950 }
 0x4ff   :  { %v2373_v56 = vadd.f32 1.0, %v5951_v54  ;;  %v5953_v22 = vpop.eup %5952 }
 0x500   :  { %v2374_v2 = vadd.f32 1.0, %v5953_v22  ;;  %v5955_v15 = vpop.eup %5954 }
 0x501   :  { %5956 = vrcp.f32 %v2373_v56 }
 0x502   :  { %5958 = vrcp.f32 %v2374_v2 }
 0x50b   :  { %v5957_v20 = vpop.eup %5956 }
 0x50c   :  { %v2384_v31 = vmul.f32 %v5957_v20, %v5955_v15  ;;  %v5959_v34 = vpop.eup %5958 }
 0x50d   :  { %v2383_v7 = vmul.f32 %v5959_v34, %v7324_v48 }
 0x50f   :  { %v2105_v3 = vpop.f32.mrb[12].mxu0  ;;  %v2176_v59 = vpop.f32.mrb[12].mxu1  ;;  %v7450_v49 = vadd.f32 %v2384_v31, %v2383_v7 }
 0x510   :  { %v2185_v63 = vadd.f32 %v2105_v3, %v7063_v60  ;;  %v2107_v1 = vpop.f32.mrb[13].mxu0  ;;  %v2178_v28 = vpop.f32.mrb[13].mxu1  ;;  %v2187_v2 = vadd.f32 %v2176_v59, %v7072_v30 }
 0x511   :  { %v2186_v54 = vadd.f32 %v2107_v1, %v7066_v55  ;;  %v2188_v22 = vadd.f32 %v2178_v28, %v7074_v62  ;;  %v4231_v28 = vld [vmem:[%s7921_s0 + $0x90] sm:$0xff] }
 0x512   :  { %v4226_v58 = vmul.f32 -1.442695, %v2185_v63  ;;  %v4228_v15 = vmul.f32 -1.442695, %v2187_v2  ;;  %v2362_v2 = vadd.f32 %v4231_v28, %v2034_v19  ;;  %v8376_v28 = vld [vmem:[#allocation78_spill] sm:$0xff] }
 0x513   :  { %v4227_v56 = vmul.f32 -1.442695, %v2186_v54 }
 0x514   :  { %5960 = vpow2.f32 %v4226_v58 }
 0x515   :  { %5962 = vpow2.f32 %v4227_v56 }
 0x516   :  { %5964 = vtanh.f32 %v2188_v22 }
 0x517   :  { %5966 = vpow2.f32 %v4228_v15 }
 0x51e   :  { %v5961_v48 = vpop.eup %5960 }
 0x51f   :  { %v2198_v20 = vadd.f32 1.0, %v5961_v48  ;;  %v5963_v31 = vpop.eup %5962  ;;  %v4235_v48 = vmul.f32 -1.442695, %v2362_v2  ;;  %v8377_v2 = vld [vmem:[#allocation79_spill] sm:$0xff] }
 0x520   :  { %v2199_v34 = vadd.f32 1.0, %v5963_v31  ;;  %v5965_v7 = vpop.eup %5964 }
 0x521   :  { %5968 = vrcp.f32 %v2198_v20  ;;  %v5967_v3 = vpop.eup %5966 }
 0x522   :  { %5970 = vrcp.f32 %v2199_v34  ;;  %v2200_v58 = vadd.f32 1.0, %v5967_v3  ;;  %v8370_v3 = vld [vmem:[#allocation72_spill] sm:$0xff] }
 0x524   :  { %5972 = vrcp.f32 %v2200_v58  ;;  %v8374_v58 = vld [vmem:[#allocation76_spill] sm:$0xff] }
 0x52b   :  { %v5969_v1 = vpop.eup %5968 }
 0x52c   :  { %v2209_v63 = vmul.f32 %v5969_v1, %v5965_v7  ;;  %v5971_v54 = vpop.eup %5970  ;;  %v8371_v1 = vld [vmem:[#allocation73_spill] sm:$0xff] }
 0x52d   :  { %v2208_v56 = vmul.f32 %v5971_v54, %v7331_v8  ;;  %v8373_v54 = vld [vmem:[#allocation75_spill] sm:$0xff] }
 0x52e   :  { %v5973_v22 = vpop.eup %5972 }
 0x52f   :  { %v7457_v59 = vadd.f32 %v2209_v63, %v2208_v56  ;;  %v8372_v63 = vld [vmem:[#allocation74_spill] sm:$0xff]  ;;  %v8375_v56 = vld [vmem:[#allocation77_spill] sm:$0xff] }
 0x531   :  { %5974 = vtanh.f32 %v7457_v59 }
 0x532   :  { %5976 = vpow2.f32 %v4235_v48  ;;  %v8380_v48 = vld [vmem:[#allocation82_spill] sm:$0xff] }
 0x533   :  { %5978 = vtanh.f32 %v7450_v49 }
 0x53b   :  { %v5975_v15 = vpop.eup %5974 }
 0x53c   :  { %v2212_v20 = vmul.f32 %v5975_v15, %v5973_v22  ;;  %v5977_v19 = vpop.eup %5976  ;;  %v8378_v22 = vld [vmem:[#allocation80_spill] sm:$0xff]  ;;  %v8379_v15 = vld [vmem:[#allocation81_spill] sm:$0xff] }
 0x53d   :  { %v2375_v8 = vadd.f32 1.0, %v5977_v19  ;;  %v5979_v31 = vpop.eup %5978  ;;  %v8382_v19 = vld [vmem:[#allocation84_spill] sm:$0xff] }
 0x53e   :  { %2278 = vmatmul.mubr.f32.vlgmr.msra.gmra.mrb[16].mxu0 %v2212_v20  ;;  %2349 = vmatmul.mubr.f32.vlgmr.msra.gmra.mrb[16].mxu1 %v2212_v20  ;;  %v8381_v20 = vld [vmem:[#allocation83_spill] sm:$0xff] }
 0x53f   :  { %5104 = vmatpush1.bf16.msra.mxu0 %v6449_v10  ;;  %5136 = vmatpush1.bf16.msra.mxu1 %v6453_v11  ;;  %5980 = vrcp.f32 %v2375_v8  ;;  %v8383_v8 = vld [vmem:[#allocation85_spill] sm:$0xff] }
 0x540   :  { %5106 = vmatprep.subr.bf16.mxu0 %v6455_v12  ;;  %5138 = vmatprep.subr.bf16.mxu1 %v6467_v23 }
 0x541   :  { %2452 = vmatprep.mubr.f32.mxu0 %v8179_v5  ;;  %2523 = vmatprep.mubr.f32.mxu1 %v8179_v5 }
 0x543   :  { %5108 = vmatpush1.bf16.msra.mxu0 %v6487_v33  ;;  %5140 = vmatpush1.bf16.msra.mxu1 %v6491_v38 }
 0x544   :  { %5110 = vmatprep.subr.bf16.mxu0 %v6493_v41  ;;  %5142 = vmatprep.subr.bf16.mxu1 %v6505_v47 }
 0x547   :  { %5112 = vmatpush1.bf16.msra.mxu0 %v6525_v61  ;;  %5144 = vmatpush1.bf16.msra.mxu1 %v8202_v50 }
 0x548   :  { %5114 = vmatprep.subr.bf16.mxu0 %v8203_v36  ;;  %5146 = vmatprep.subr.bf16.mxu1 %v8204_v25 }
 0x549   :  { %v5981_v34 = vpop.eup %5980 }
 0x54a   :  { %v2387_v7 = vmul.f32 %v5981_v34, %v5979_v31  ;;  %v8384_v31 = vld [vmem:[#allocation86_spill] sm:$0xff]  ;;  %v8385_v34 = vld [vmem:[#allocation87_spill] sm:$0xff] }
 0x54b   :  { %5116 = vmatpush1.bf16.msra.mxu0 %v8205_v16  ;;  %5148 = vmatpush1.bf16.msra.mxu1 %v8206_v21 }
 0x54c   :  { %5118 = vmatprep.subr.bf16.mxu0 %v8207_v37  ;;  %5150 = vmatprep.subr.bf16.mxu1 %v8258_v32 }
 0x54f   :  { %5120 = vmatpush1.bf16.msra.mxu0 %v8259_v53  ;;  %5152 = vmatpush1.bf16.msra.mxu1 %v8260_v44 }
 0x550   :  { %5122 = vmatprep.subr.bf16.mxu0 %v8261_v35  ;;  %5154 = vmatprep.subr.bf16.mxu1 %v8262_v39 }
 0x553   :  { %5124 = vmatpush1.bf16.msra.mxu0 %v8314_v24  ;;  %5156 = vmatpush1.bf16.msra.mxu1 %v8315_v42 }
 0x554   :  { %5126 = vmatprep.subr.bf16.mxu0 %v8316_v4  ;;  %5158 = vmatprep.subr.bf16.mxu1 %v8266_v27 }
 0x557   :  { %5128 = vmatpush1.bf16.msra.mxu0 %v8317_v17  ;;  %5160 = vmatpush1.bf16.msra.mxu1 %v8318_v9 }
 0x558   :  { %5130 = vmatprep.subr.bf16.mxu0 %v8319_v29  ;;  %5162 = vmatprep.subr.bf16.mxu1 %v8320_v14 }
 0x55b   :  { %5132 = vmatpush1.bf16.msra.mxu0 %v8271_v57  ;;  %5164 = vmatpush1.bf16.msra.mxu1 %v8321_v13 }
 0x55c   :  { %5166 = vmatprep.subr.bf16.mxu0 %v8322_v46  ;;  %5198 = vmatprep.subr.bf16.mxu1 %v8323_v45 }
 0x55e   :  { %2453 = vmatmul.mubr.f32.vlgmr.msra.gmra.mrb[18].mxu0 %v2387_v7  ;;  %2524 = vmatmul.mubr.f32.vlgmr.msra.gmra.mrb[18].mxu1 %v2387_v7 }
 0x55f   :  { %5168 = vmatpush1.bf16.msra.mxu0 %v8275_v40  ;;  %5200 = vmatpush1.bf16.msra.mxu1 %v8324_v0 }
 0x560   :  { %5170 = vmatprep.subr.bf16.mxu0 %v8277_v26  ;;  %5202 = vmatprep.subr.bf16.mxu1 %v8278_v51 }
 0x561   :  { %2594 = vmatprep.mubr.f32.mxu0 %v8179_v5  ;;  %2665 = vmatprep.mubr.f32.mxu1 %v8179_v5 }
 0x563   :  { %5172 = vmatpush1.bf16.msra.mxu0 %v8279_v18  ;;  %5204 = vmatpush1.bf16.msra.mxu1 %v8280_v43 }
 0x564   :  { %5174 = vmatprep.subr.bf16.mxu0 %v8281_v52  ;;  %5206 = vmatprep.subr.bf16.mxu1 %v8282_v6 }
 0x567   :  { %5176 = vmatpush1.bf16.msra.mxu0 %v8370_v3  ;;  %5208 = vmatpush1.bf16.msra.mxu1 %v8371_v1 }
 0x568   :  { %5178 = vmatprep.subr.bf16.mxu0 %v8372_v63  ;;  %5210 = vmatprep.subr.bf16.mxu1 %v8373_v54 }
 0x56b   :  { %5180 = vmatpush1.bf16.msra.mxu0 %v8374_v58  ;;  %5212 = vmatpush1.bf16.msra.mxu1 %v8375_v56  ;;  %v8386_v56 = vld [vmem:[#allocation88_spill] sm:$0xff] }
 0x56c   :  { %5182 = vmatprep.subr.bf16.mxu0 %v8376_v28  ;;  %5214 = vmatprep.subr.bf16.mxu1 %v8377_v2  ;;  %v8387_v28 = vld [vmem:[#allocation89_spill] sm:$0xff]  ;;  %v8388_v2 = vld [vmem:[#allocation90_spill] sm:$0xff] }
 0x56f   :  { %5184 = vmatpush1.bf16.msra.mxu0 %v8378_v22  ;;  %5216 = vmatpush1.bf16.msra.mxu1 %v8379_v15  ;;  %v8389_v22 = vld [vmem:[#allocation91_spill] sm:$0xff]  ;;  %v8390_v15 = vld [vmem:[#allocation92_spill] sm:$0xff] }
 0x570   :  { %5186 = vmatprep.subr.bf16.mxu0 %v8380_v48  ;;  %5218 = vmatprep.subr.bf16.mxu1 %v8381_v20  ;;  %v8391_v48 = vld [vmem:[#allocation93_spill] sm:$0xff]  ;;  %v8392_v20 = vld [vmem:[#allocation7_spill] sm:$0xff] }
 0x573   :  { %5188 = vmatpush1.bf16.msra.mxu0 %v8382_v19  ;;  %5220 = vmatpush1.bf16.msra.mxu1 %v8383_v8  ;;  %v8393_v19 = vld [vmem:[#allocation8_spill] sm:$0xff] }
 0x574   :  { %5190 = vmatprep.subr.bf16.mxu0 %v8384_v31  ;;  %5222 = vmatprep.subr.bf16.mxu1 %v8385_v34  ;;  %v8394_v31 = vld [vmem:[#allocation9_spill] sm:$0xff]  ;;  %v8395_v34 = vld [vmem:[#allocation10_spill] sm:$0xff] }
 0x577   :  { %5192 = vmatpush1.bf16.msra.mxu0 %v8386_v56  ;;  %5224 = vmatpush1.bf16.msra.mxu1 %v8387_v28  ;;  %v8396_v56 = vld [vmem:[#allocation11_spill] sm:$0xff]  ;;  %v8397_v28 = vld [vmem:[#allocation12_spill] sm:$0xff] }
 0x578   :  { %5194 = vmatprep.subr.bf16.mxu0 %v8388_v2  ;;  %5226 = vmatprep.subr.bf16.mxu1 %v8389_v22  ;;  %v8407_v22 = vld [vmem:[#allocation22_spill] sm:$0xff]  ;;  %v8408_v2 = vld [vmem:[#allocation23_spill] sm:$0xff] }
 0x57b   :  { %5196 = vmatpush1.bf16.msra.mxu0 %v8390_v15  ;;  %5228 = vmatpush1.bf16.msra.mxu1 %v8391_v48  ;;  %v8398_v15 = vld [vmem:[#allocation13_spill] sm:$0xff]  ;;  %v8399_v48 = vld [vmem:[#allocation14_spill] sm:$0xff] }
 0x57c   :  { %5230 = vmatprep.subr.bf16.mxu0 %v8392_v20  ;;  %5262 = vmatprep.subr.bf16.mxu1 %v8393_v19  ;;  %v8400_v20 = vld [vmem:[#allocation15_spill] sm:$0xff]  ;;  %v8401_v19 = vld [vmem:[#allocation16_spill] sm:$0xff] }
 0x57e   :  { %2595 = vmatmul.mubr.f32.vlgmr.msra.gmra.mrb[16].mxu0 %v2387_v7  ;;  %2666 = vmatmul.mubr.f32.vlgmr.msra.gmra.mrb[16].mxu1 %v2387_v7  ;;  %v8402_v7 = vld [vmem:[#allocation17_spill] sm:$0xff] }
 0x57f   :  { %5232 = vmatpush1.bf16.msra.mxu0 %v8394_v31  ;;  %5264 = vmatpush1.bf16.msra.mxu1 %v8395_v34  ;;  %v8403_v31 = vld [vmem:[#allocation18_spill] sm:$0xff]  ;;  %v8404_v34 = vld [vmem:[#allocation19_spill] sm:$0xff] }
 0x580   :  { %5234 = vmatprep.subr.bf16.mxu0 %v8396_v56  ;;  %5266 = vmatprep.subr.bf16.mxu1 %v8397_v28  ;;  %v8405_v56 = vld [vmem:[#allocation20_spill] sm:$0xff]  ;;  %v8406_v28 = vld [vmem:[#allocation21_spill] sm:$0xff] }
 0x581   :  { %2768 = vmatprep.mubr.f32.mxu0 %v8179_v5  ;;  %2839 = vmatprep.mubr.f32.mxu1 %v8179_v5 }
 0x583   :  { %5236 = vmatpush1.bf16.msra.mxu0 %v8398_v15  ;;  %5268 = vmatpush1.bf16.msra.mxu1 %v8399_v48  ;;  %v8409_v15 = vld [vmem:[#allocation24_spill] sm:$0xff]  ;;  %v8410_v48 = vld [vmem:[#allocation25_spill] sm:$0xff] }
 0x584   :  { %5238 = vmatprep.subr.bf16.mxu0 %v8400_v20  ;;  %5270 = vmatprep.subr.bf16.mxu1 %v8401_v19  ;;  %v8411_v20 = vld [vmem:[#allocation26_spill] sm:$0xff]  ;;  %v8412_v19 = vld [vmem:[#allocation27_spill] sm:$0xff] }
 0x587   :  { %5240 = vmatpush1.bf16.msra.mxu0 %v8402_v7  ;;  %5272 = vmatpush1.bf16.msra.mxu1 %v8403_v31  ;;  %v8413_v7 = vld [vmem:[#allocation28_spill] sm:$0xff]  ;;  %v8414_v31 = vld [vmem:[#allocation29_spill] sm:$0xff] }
 0x588   :  { %5242 = vmatprep.subr.bf16.mxu0 %v8404_v34  ;;  %5274 = vmatprep.subr.bf16.mxu1 %v8405_v56  ;;  %v8415_v34 = vld [vmem:[#allocation30_spill] sm:$0xff]  ;;  %v8416_v56 = vld [vmem:[#allocation31_spill] sm:$0xff] }
 0x58b   :  { %5244 = vmatpush1.bf16.msra.mxu0 %v8406_v28  ;;  %5276 = vmatpush1.bf16.msra.mxu1 %v8407_v22  ;;  %v8417_v28 = vld [vmem:[#allocation32_spill] sm:$0xff]  ;;  %v8418_v22 = vld [vmem:[#allocation33_spill] sm:$0xff] }
 0x58c   :  { %5246 = vmatprep.subr.bf16.mxu0 %v8408_v2  ;;  %5278 = vmatprep.subr.bf16.mxu1 %v8409_v15  ;;  %v8419_v2 = vld [vmem:[#allocation34_spill] sm:$0xff]  ;;  %v8420_v15 = vld [vmem:[#allocation35_spill] sm:$0xff] }
 0x58f   :  { %5248 = vmatpush1.bf16.msra.mxu0 %v8410_v48  ;;  %5280 = vmatpush1.bf16.msra.mxu1 %v8411_v20  ;;  %v8421_v48 = vld [vmem:[#allocation36_spill] sm:$0xff]  ;;  %v8422_v20 = vld [vmem:[#allocation37_spill] sm:$0xff] }
 0x590   :  { %5250 = vmatprep.subr.bf16.mxu0 %v8412_v19  ;;  %5282 = vmatprep.subr.bf16.mxu1 %v8413_v7  ;;  %v8423_v19 = vld [vmem:[#allocation38_spill] sm:$0xff]  ;;  %v8424_v7 = vld [vmem:[#allocation39_spill] sm:$0xff] }
 0x593   :  { %5252 = vmatpush1.bf16.msra.mxu0 %v8414_v31  ;;  %5284 = vmatpush1.bf16.msra.mxu1 %v8415_v34  ;;  %v8425_v31 = vld [vmem:[#allocation40_spill] sm:$0xff] }
 0x594   :  { %5254 = vmatprep.subr.bf16.mxu0 %v8416_v56  ;;  %5286 = vmatprep.subr.bf16.mxu1 %v8417_v28  ;;  %v4239_v28 = vld [vmem:[%s7921_s0 + $0xa0] sm:$0xff] }
 0x597   :  { %5256 = vmatpush1.bf16.msra.mxu0 %v8418_v22  ;;  %5288 = vmatpush1.bf16.msra.mxu1 %v8419_v2  ;;  %v4240_v2 = vld [vmem:[%s7921_s0 + $0xa8] sm:$0xff] }
 0x598   :  { %5258 = vmatprep.subr.bf16.mxu0 %v8420_v15  ;;  %5290 = vmatprep.subr.bf16.mxu1 %v8421_v48 }
 0x59b   :  { %5260 = vmatpush1.bf16.msra.mxu0 %v8422_v20  ;;  %5292 = vmatpush1.bf16.msra.mxu1 %v8423_v19 }
 0x59c   :  { %5294 = vmatprep.subr.bf16.mxu0 %v8424_v7  ;;  %5326 = vmatprep.subr.bf16.mxu1 %v8425_v31  ;;  %v4242_v31 = vld [vmem:[%s7921_s0 + $0xb8] sm:$0xff] }
 0x631   :  { %v2454_v22 = vpop.f32.mrb[18].mxu0  ;;  %v2525_v15 = vpop.f32.mrb[18].mxu1 }
 0x632   :  { %v2851_v56 = vadd.f32 %v4239_v28, %v2454_v22  ;;  %v2456_v48 = vpop.f32.mrb[19].mxu0  ;;  %v2527_v34 = vpop.f32.mrb[19].mxu1 }
 0x633   :  { %v2852_v20 = vadd.f32 %v4240_v2, %v2456_v48  ;;  %v2854_v7 = vadd.f32 %v4242_v31, %v2527_v34 }
 0x634   :  { %v4243_v8 = vmul.f32 -1.442695, %v2851_v56 }
 0x635   :  { %v4244_v19 = vmul.f32 -1.442695, %v2852_v20 }
 0x636   :  { %5982 = vpow2.f32 %v4243_v8 }
 0x637   :  { %5984 = vpow2.f32 %v4244_v19 }
 0x638   :  { %5986 = vtanh.f32 %v2854_v7 }
 0x640   :  { %v5983_v58 = vpop.eup %5982 }
 0x641   :  { %v2864_v54 = vadd.f32 1.0, %v5983_v58  ;;  %v5985_v63 = vpop.eup %5984 }
 0x642   :  { %v2865_v1 = vadd.f32 1.0, %v5985_v63  ;;  %v5987_v28 = vpop.eup %5986 }
 0x643   :  { %5988 = vrcp.f32 %v2864_v54 }
 0x644   :  { %5990 = vrcp.f32 %v2865_v1 }
 0x64d   :  { %v5989_v22 = vpop.eup %5988 }
 0x64e   :  { %v2875_v3 = vmul.f32 %v5989_v22, %v5987_v28  ;;  %v5991_v2 = vpop.eup %5990 }
 0x64f   :  { %v2874_v56 = vmul.f32 %v5991_v2, %v7450_v49 }
 0x651   :  { %v2596_v48 = vpop.f32.mrb[16].mxu0  ;;  %v2667_v20 = vpop.f32.mrb[16].mxu1  ;;  %v7576_v19 = vadd.f32 %v2875_v3, %v2874_v56 }
 0x652   :  { %v2676_v8 = vadd.f32 %v2596_v48, %v7063_v60  ;;  %v2598_v31 = vpop.f32.mrb[17].mxu0  ;;  %v2669_v34 = vpop.f32.mrb[17].mxu1  ;;  %v2678_v1 = vadd.f32 %v2667_v20, %v7072_v30 }
 0x653   :  { %v2677_v58 = vadd.f32 %v2598_v31, %v7066_v55  ;;  %v2679_v63 = vadd.f32 %v2669_v34, %v7074_v62  ;;  %v4241_v34 = vld [vmem:[%s7921_s0 + $0xb0] sm:$0xff] }
 0x654   :  { %v4236_v7 = vmul.f32 -1.442695, %v2676_v8  ;;  %v4238_v28 = vmul.f32 -1.442695, %v2678_v1  ;;  %v2853_v1 = vadd.f32 %v4241_v34, %v2525_v15  ;;  %v8432_v34 = vld [vmem:[#allocation78_spill] sm:$0xff] }
 0x655   :  { %v4237_v54 = vmul.f32 -1.442695, %v2677_v58 }
 0x656   :  { %5992 = vpow2.f32 %v4236_v7 }
 0x657   :  { %5994 = vpow2.f32 %v4237_v54 }
 0x658   :  { %5996 = vtanh.f32 %v2679_v63 }
 0x659   :  { %5998 = vpow2.f32 %v4238_v28 }
 0x660   :  { %v5993_v49 = vpop.eup %5992 }
 0x661   :  { %v2689_v22 = vadd.f32 1.0, %v5993_v49  ;;  %v5995_v3 = vpop.eup %5994  ;;  %v4245_v49 = vmul.f32 -1.442695, %v2853_v1  ;;  %v8433_v1 = vld [vmem:[#allocation79_spill] sm:$0xff] }
 0x662   :  { %v2690_v2 = vadd.f32 1.0, %v5995_v3  ;;  %v5997_v56 = vpop.eup %5996 }
 0x663   :  { %6000 = vrcp.f32 %v2689_v22  ;;  %v5999_v48 = vpop.eup %5998 }
 0x664   :  { %6002 = vrcp.f32 %v2690_v2  ;;  %v2691_v7 = vadd.f32 1.0, %v5999_v48  ;;  %v8426_v48 = vld [vmem:[#allocation72_spill] sm:$0xff] }
 0x666   :  { %6004 = vrcp.f32 %v2691_v7  ;;  %v8430_v7 = vld [vmem:[#allocation76_spill] sm:$0xff] }
 0x66d   :  { %v6001_v31 = vpop.eup %6000 }
 0x66e   :  { %v2700_v8 = vmul.f32 %v6001_v31, %v5997_v56  ;;  %v6003_v58 = vpop.eup %6002  ;;  %v8427_v31 = vld [vmem:[#allocation73_spill] sm:$0xff] }
 0x66f   :  { %v2699_v54 = vmul.f32 %v6003_v58, %v7457_v59  ;;  %v8429_v58 = vld [vmem:[#allocation75_spill] sm:$0xff] }
 0x670   :  { %v6005_v63 = vpop.eup %6004 }
 0x671   :  { %v7583_v20 = vadd.f32 %v2700_v8, %v2699_v54  ;;  %v8428_v8 = vld [vmem:[#allocation74_spill] sm:$0xff]  ;;  %v8431_v54 = vld [vmem:[#allocation77_spill] sm:$0xff] }
 0x673   :  { %6006 = vtanh.f32 %v7583_v20 }
 0x674   :  { %6008 = vpow2.f32 %v4245_v49  ;;  %v8436_v49 = vld [vmem:[#allocation82_spill] sm:$0xff] }
 0x675   :  { %6010 = vtanh.f32 %v7576_v19 }
 0x67d   :  { %v6007_v28 = vpop.eup %6006 }
 0x67e   :  { %v2703_v22 = vmul.f32 %v6007_v28, %v6005_v63  ;;  %v6009_v59 = vpop.eup %6008  ;;  %v8434_v63 = vld [vmem:[#allocation80_spill] sm:$0xff]  ;;  %v8435_v28 = vld [vmem:[#allocation81_spill] sm:$0xff] }
 0x67f   :  { %v2866_v15 = vadd.f32 1.0, %v6009_v59  ;;  %v6011_v3 = vpop.eup %6010  ;;  %v8438_v59 = vld [vmem:[#allocation84_spill] sm:$0xff] }
 0x680   :  { %2769 = vmatmul.mubr.f32.vlgmr.msra.gmra.mrb[20].mxu0 %v2703_v22  ;;  %2840 = vmatmul.mubr.f32.vlgmr.msra.gmra.mrb[20].mxu1 %v2703_v22  ;;  %v8437_v22 = vld [vmem:[#allocation83_spill] sm:$0xff] }
 0x681   :  { %5296 = vmatpush1.bf16.msra.mxu0 %v6449_v10  ;;  %5328 = vmatpush1.bf16.msra.mxu1 %v6453_v11  ;;  %6012 = vrcp.f32 %v2866_v15  ;;  %v8439_v15 = vld [vmem:[#allocation85_spill] sm:$0xff] }
 0x682   :  { %5298 = vmatprep.subr.bf16.mxu0 %v6455_v12  ;;  %5330 = vmatprep.subr.bf16.mxu1 %v6467_v23 }
 0x683   :  { %2943 = vmatprep.mubr.f32.mxu0 %v8179_v5  ;;  %3014 = vmatprep.mubr.f32.mxu1 %v8179_v5 }
 0x685   :  { %5300 = vmatpush1.bf16.msra.mxu0 %v6487_v33  ;;  %5332 = vmatpush1.bf16.msra.mxu1 %v6491_v38 }
 0x686   :  { %5302 = vmatprep.subr.bf16.mxu0 %v6493_v41  ;;  %5334 = vmatprep.subr.bf16.mxu1 %v6505_v47 }
 0x689   :  { %5304 = vmatpush1.bf16.msra.mxu0 %v6525_v61  ;;  %5336 = vmatpush1.bf16.msra.mxu1 %v8202_v50 }
 0x68a   :  { %5306 = vmatprep.subr.bf16.mxu0 %v8203_v36  ;;  %5338 = vmatprep.subr.bf16.mxu1 %v8204_v25 }
 0x68b   :  { %v6013_v2 = vpop.eup %6012 }
 0x68c   :  { %v2878_v56 = vmul.f32 %v6013_v2, %v6011_v3  ;;  %v8440_v3 = vld [vmem:[#allocation86_spill] sm:$0xff]  ;;  %v8441_v2 = vld [vmem:[#allocation87_spill] sm:$0xff] }
 0x68d   :  { %5308 = vmatpush1.bf16.msra.mxu0 %v8205_v16  ;;  %5340 = vmatpush1.bf16.msra.mxu1 %v8206_v21 }
 0x68e   :  { %5310 = vmatprep.subr.bf16.mxu0 %v8207_v37  ;;  %5342 = vmatprep.subr.bf16.mxu1 %v8258_v32 }
 0x691   :  { %5312 = vmatpush1.bf16.msra.mxu0 %v8259_v53  ;;  %5344 = vmatpush1.bf16.msra.mxu1 %v8260_v44 }
 0x692   :  { %5314 = vmatprep.subr.bf16.mxu0 %v8261_v35  ;;  %5346 = vmatprep.subr.bf16.mxu1 %v8262_v39 }
 0x695   :  { %5316 = vmatpush1.bf16.msra.mxu0 %v8314_v24  ;;  %5348 = vmatpush1.bf16.msra.mxu1 %v8315_v42 }
 0x696   :  { %5318 = vmatprep.subr.bf16.mxu0 %v8316_v4  ;;  %5350 = vmatprep.subr.bf16.mxu1 %v8266_v27 }
 0x699   :  { %5320 = vmatpush1.bf16.msra.mxu0 %v8317_v17  ;;  %5352 = vmatpush1.bf16.msra.mxu1 %v8318_v9 }
 0x69a   :  { %5322 = vmatprep.subr.bf16.mxu0 %v8319_v29  ;;  %5354 = vmatprep.subr.bf16.mxu1 %v8320_v14 }
 0x69d   :  { %5324 = vmatpush1.bf16.msra.mxu0 %v8271_v57  ;;  %5356 = vmatpush1.bf16.msra.mxu1 %v8321_v13 }
 0x69e   :  { %5358 = vmatprep.subr.bf16.mxu0 %v8322_v46  ;;  %5390 = vmatprep.subr.bf16.mxu1 %v8323_v45 }
 0x6a0   :  { %2944 = vmatmul.mubr.f32.vlgmr.msra.gmra.mrb[22].mxu0 %v2878_v56  ;;  %3015 = vmatmul.mubr.f32.vlgmr.msra.gmra.mrb[22].mxu1 %v2878_v56 }
 0x6a1   :  { %5360 = vmatpush1.bf16.msra.mxu0 %v8275_v40  ;;  %5392 = vmatpush1.bf16.msra.mxu1 %v8324_v0 }
 0x6a2   :  { %5362 = vmatprep.subr.bf16.mxu0 %v8277_v26  ;;  %5394 = vmatprep.subr.bf16.mxu1 %v8278_v51 }
 0x6a3   :  { %3085 = vmatprep.mubr.f32.mxu0 %v8179_v5  ;;  %3156 = vmatprep.mubr.f32.mxu1 %v8179_v5 }
 0x6a5   :  { %5364 = vmatpush1.bf16.msra.mxu0 %v8279_v18  ;;  %5396 = vmatpush1.bf16.msra.mxu1 %v8280_v43 }
 0x6a6   :  { %5366 = vmatprep.subr.bf16.mxu0 %v8281_v52  ;;  %5398 = vmatprep.subr.bf16.mxu1 %v8282_v6 }
 0x6a9   :  { %5368 = vmatpush1.bf16.msra.mxu0 %v8426_v48  ;;  %5400 = vmatpush1.bf16.msra.mxu1 %v8427_v31 }
 0x6aa   :  { %5370 = vmatprep.subr.bf16.mxu0 %v8428_v8  ;;  %5402 = vmatprep.subr.bf16.mxu1 %v8429_v58 }
 0x6ad   :  { %5372 = vmatpush1.bf16.msra.mxu0 %v8430_v7  ;;  %5404 = vmatpush1.bf16.msra.mxu1 %v8431_v54  ;;  %v8442_v54 = vld [vmem:[#allocation88_spill] sm:$0xff] }
 0x6ae   :  { %5374 = vmatprep.subr.bf16.mxu0 %v8432_v34  ;;  %5406 = vmatprep.subr.bf16.mxu1 %v8433_v1  ;;  %v8443_v34 = vld [vmem:[#allocation89_spill] sm:$0xff]  ;;  %v8444_v1 = vld [vmem:[#allocation90_spill] sm:$0xff] }
 0x6b1   :  { %5376 = vmatpush1.bf16.msra.mxu0 %v8434_v63  ;;  %5408 = vmatpush1.bf16.msra.mxu1 %v8435_v28  ;;  %v8445_v63 = vld [vmem:[#allocation91_spill] sm:$0xff]  ;;  %v8446_v28 = vld [vmem:[#allocation92_spill] sm:$0xff] }
 0x6b2   :  { %5378 = vmatprep.subr.bf16.mxu0 %v8436_v49  ;;  %5410 = vmatprep.subr.bf16.mxu1 %v8437_v22  ;;  %v8447_v49 = vld [vmem:[#allocation93_spill] sm:$0xff]  ;;  %v8448_v22 = vld [vmem:[#allocation7_spill] sm:$0xff] }
 0x6b5   :  { %5380 = vmatpush1.bf16.msra.mxu0 %v8438_v59  ;;  %5412 = vmatpush1.bf16.msra.mxu1 %v8439_v15  ;;  %v8449_v59 = vld [vmem:[#allocation8_spill] sm:$0xff] }
 0x6b6   :  { %5382 = vmatprep.subr.bf16.mxu0 %v8440_v3  ;;  %5414 = vmatprep.subr.bf16.mxu1 %v8441_v2  ;;  %v8450_v3 = vld [vmem:[#allocation9_spill] sm:$0xff]  ;;  %v8451_v2 = vld [vmem:[#allocation10_spill] sm:$0xff] }
 0x6b9   :  { %5384 = vmatpush1.bf16.msra.mxu0 %v8442_v54  ;;  %5416 = vmatpush1.bf16.msra.mxu1 %v8443_v34  ;;  %v8452_v54 = vld [vmem:[#allocation11_spill] sm:$0xff]  ;;  %v8453_v34 = vld [vmem:[#allocation12_spill] sm:$0xff] }
 0x6ba   :  { %5386 = vmatprep.subr.bf16.mxu0 %v8444_v1  ;;  %5418 = vmatprep.subr.bf16.mxu1 %v8445_v63  ;;  %v8463_v63 = vld [vmem:[#allocation22_spill] sm:$0xff]  ;;  %v8464_v1 = vld [vmem:[#allocation23_spill] sm:$0xff] }
 0x6bd   :  { %5388 = vmatpush1.bf16.msra.mxu0 %v8446_v28  ;;  %5420 = vmatpush1.bf16.msra.mxu1 %v8447_v49  ;;  %v8454_v28 = vld [vmem:[#allocation13_spill] sm:$0xff]  ;;  %v8455_v49 = vld [vmem:[#allocation14_spill] sm:$0xff] }
 0x6be   :  { %5422 = vmatprep.subr.bf16.mxu0 %v8448_v22  ;;  %5454 = vmatprep.subr.bf16.mxu1 %v8449_v59  ;;  %v8456_v22 = vld [vmem:[#allocation15_spill] sm:$0xff]  ;;  %v8457_v59 = vld [vmem:[#allocation16_spill] sm:$0xff] }
 0x6c0   :  { %3086 = vmatmul.mubr.f32.vlgmr.msra.gmra.mrb[20].mxu0 %v2878_v56  ;;  %3157 = vmatmul.mubr.f32.vlgmr.msra.gmra.mrb[20].mxu1 %v2878_v56  ;;  %v8458_v56 = vld [vmem:[#allocation17_spill] sm:$0xff] }
 0x6c1   :  { %5424 = vmatpush1.bf16.msra.mxu0 %v8450_v3  ;;  %5456 = vmatpush1.bf16.msra.mxu1 %v8451_v2  ;;  %v8459_v3 = vld [vmem:[#allocation18_spill] sm:$0xff]  ;;  %v8460_v2 = vld [vmem:[#allocation19_spill] sm:$0xff] }
 0x6c2   :  { %5426 = vmatprep.subr.bf16.mxu0 %v8452_v54  ;;  %5458 = vmatprep.subr.bf16.mxu1 %v8453_v34  ;;  %v8461_v54 = vld [vmem:[#allocation20_spill] sm:$0xff]  ;;  %v8462_v34 = vld [vmem:[#allocation21_spill] sm:$0xff] }
 0x6c3   :  { %3259 = vmatprep.mubr.f32.mxu0 %v8179_v5  ;;  %3330 = vmatprep.mubr.f32.mxu1 %v8179_v5 }
 0x6c5   :  { %5428 = vmatpush1.bf16.msra.mxu0 %v8454_v28  ;;  %5460 = vmatpush1.bf16.msra.mxu1 %v8455_v49  ;;  %v8465_v28 = vld [vmem:[#allocation24_spill] sm:$0xff]  ;;  %v8466_v49 = vld [vmem:[#allocation25_spill] sm:$0xff] }
 0x6c6   :  { %5430 = vmatprep.subr.bf16.mxu0 %v8456_v22  ;;  %5462 = vmatprep.subr.bf16.mxu1 %v8457_v59  ;;  %v8467_v22 = vld [vmem:[#allocation26_spill] sm:$0xff]  ;;  %v8468_v59 = vld [vmem:[#allocation27_spill] sm:$0xff] }
 0x6c9   :  { %5432 = vmatpush1.bf16.msra.mxu0 %v8458_v56  ;;  %5464 = vmatpush1.bf16.msra.mxu1 %v8459_v3  ;;  %v8469_v56 = vld [vmem:[#allocation28_spill] sm:$0xff]  ;;  %v8470_v3 = vld [vmem:[#allocation29_spill] sm:$0xff] }
 0x6ca   :  { %5434 = vmatprep.subr.bf16.mxu0 %v8460_v2  ;;  %5466 = vmatprep.subr.bf16.mxu1 %v8461_v54  ;;  %v8471_v2 = vld [vmem:[#allocation30_spill] sm:$0xff]  ;;  %v8472_v54 = vld [vmem:[#allocation31_spill] sm:$0xff] }
 0x6cd   :  { %5436 = vmatpush1.bf16.msra.mxu0 %v8462_v34  ;;  %5468 = vmatpush1.bf16.msra.mxu1 %v8463_v63  ;;  %v8473_v34 = vld [vmem:[#allocation32_spill] sm:$0xff]  ;;  %v8474_v63 = vld [vmem:[#allocation33_spill] sm:$0xff] }
 0x6ce   :  { %5438 = vmatprep.subr.bf16.mxu0 %v8464_v1  ;;  %5470 = vmatprep.subr.bf16.mxu1 %v8465_v28  ;;  %v8475_v1 = vld [vmem:[#allocation34_spill] sm:$0xff]  ;;  %v8476_v28 = vld [vmem:[#allocation35_spill] sm:$0xff] }
 0x6d1   :  { %5440 = vmatpush1.bf16.msra.mxu0 %v8466_v49  ;;  %5472 = vmatpush1.bf16.msra.mxu1 %v8467_v22  ;;  %v8477_v49 = vld [vmem:[#allocation36_spill] sm:$0xff]  ;;  %v8478_v22 = vld [vmem:[#allocation37_spill] sm:$0xff] }
 0x6d2   :  { %5442 = vmatprep.subr.bf16.mxu0 %v8468_v59  ;;  %5474 = vmatprep.subr.bf16.mxu1 %v8469_v56  ;;  %v8479_v59 = vld [vmem:[#allocation38_spill] sm:$0xff]  ;;  %v8480_v56 = vld [vmem:[#allocation39_spill] sm:$0xff] }
 0x6d5   :  { %5444 = vmatpush1.bf16.msra.mxu0 %v8470_v3  ;;  %5476 = vmatpush1.bf16.msra.mxu1 %v8471_v2  ;;  %v8481_v3 = vld [vmem:[#allocation40_spill] sm:$0xff] }
 0x6d6   :  { %5446 = vmatprep.subr.bf16.mxu0 %v8472_v54  ;;  %5478 = vmatprep.subr.bf16.mxu1 %v8473_v34  ;;  %v4249_v34 = vld [vmem:[%s7921_s0 + $0xc0] sm:$0xff] }
 0x6d9   :  { %5448 = vmatpush1.bf16.msra.mxu0 %v8474_v63  ;;  %5480 = vmatpush1.bf16.msra.mxu1 %v8475_v1  ;;  %v4250_v1 = vld [vmem:[%s7921_s0 + $0xc8] sm:$0xff] }
 0x6da   :  { %5450 = vmatprep.subr.bf16.mxu0 %v8476_v28  ;;  %5482 = vmatprep.subr.bf16.mxu1 %v8477_v49 }
 0x6dd   :  { %5452 = vmatpush1.bf16.msra.mxu0 %v8478_v22  ;;  %5484 = vmatpush1.bf16.msra.mxu1 %v8479_v59 }
 0x6de   :  { %5486 = vmatprep.subr.bf16.mxu0 %v8480_v56  ;;  %5518 = vmatprep.subr.bf16.mxu1 %v8481_v3  ;;  %v4252_v3 = vld [vmem:[%s7921_s0 + $0xd8] sm:$0xff] }
 0x773   :  { %v2945_v63 = vpop.f32.mrb[22].mxu0  ;;  %v3016_v28 = vpop.f32.mrb[22].mxu1 }
 0x774   :  { %v3342_v54 = vadd.f32 %v4249_v34, %v2945_v63  ;;  %v2947_v49 = vpop.f32.mrb[23].mxu0  ;;  %v3018_v2 = vpop.f32.mrb[23].mxu1 }
 0x775   :  { %v3343_v22 = vadd.f32 %v4250_v1, %v2947_v49  ;;  %v3345_v56 = vadd.f32 %v4252_v3, %v3018_v2 }
 0x776   :  { %v4253_v15 = vmul.f32 -1.442695, %v3342_v54 }
 0x777   :  { %v4254_v59 = vmul.f32 -1.442695, %v3343_v22 }
 0x778   :  { %6014 = vpow2.f32 %v4253_v15 }
 0x779   :  { %6016 = vpow2.f32 %v4254_v59 }
 0x77a   :  { %6018 = vtanh.f32 %v3345_v56 }
 0x782   :  { %v6015_v7 = vpop.eup %6014 }
 0x783   :  { %v3355_v58 = vadd.f32 1.0, %v6015_v7  ;;  %v6017_v8 = vpop.eup %6016 }
 0x784   :  { %v3356_v31 = vadd.f32 1.0, %v6017_v8  ;;  %v6019_v34 = vpop.eup %6018 }
 0x785   :  { %6020 = vrcp.f32 %v3355_v58 }
 0x786   :  { %6022 = vrcp.f32 %v3356_v31 }
 0x78f   :  { %v6021_v63 = vpop.eup %6020 }
 0x790   :  { %v3366_v48 = vmul.f32 %v6021_v63, %v6019_v34  ;;  %v6023_v1 = vpop.eup %6022 }
 0x791   :  { %v3365_v54 = vmul.f32 %v6023_v1, %v7576_v19 }
 0x793   :  { %v3087_v49 = vpop.f32.mrb[20].mxu0  ;;  %v3158_v22 = vpop.f32.mrb[20].mxu1  ;;  %v7702_v59 = vadd.f32 %v3366_v48, %v3365_v54 }
 0x794   :  { %v3167_v15 = vadd.f32 %v3087_v49, %v7063_v60  ;;  %v3089_v3 = vpop.f32.mrb[21].mxu0  ;;  %v3160_v2 = vpop.f32.mrb[21].mxu1  ;;  %v3169_v31 = vadd.f32 %v3158_v22, %v7072_v30 }
 0x795   :  { %v3168_v7 = vadd.f32 %v3089_v3, %v7066_v55  ;;  %v3170_v8 = vadd.f32 %v3160_v2, %v7074_v62  ;;  %v4251_v2 = vld [vmem:[%s7921_s0 + $0xd0] sm:$0xff] }
 0x796   :  { %v4246_v56 = vmul.f32 -1.442695, %v3167_v15  ;;  %v4248_v34 = vmul.f32 -1.442695, %v3169_v31  ;;  %v3344_v31 = vadd.f32 %v4251_v2, %v3016_v28  ;;  %v8488_v2 = vld [vmem:[#allocation78_spill] sm:$0xff] }
 0x797   :  { %v4247_v58 = vmul.f32 -1.442695, %v3168_v7 }
 0x798   :  { %6024 = vpow2.f32 %v4246_v56 }
 0x799   :  { %6026 = vpow2.f32 %v4247_v58 }
 0x79a   :  { %6028 = vtanh.f32 %v3170_v8 }
 0x79b   :  { %6030 = vpow2.f32 %v4248_v34 }
 0x7a2   :  { %v6025_v19 = vpop.eup %6024 }
 0x7a3   :  { %v3180_v63 = vadd.f32 1.0, %v6025_v19  ;;  %v6027_v48 = vpop.eup %6026  ;;  %v4255_v19 = vmul.f32 -1.442695, %v3344_v31  ;;  %v8489_v31 = vld [vmem:[#allocation79_spill] sm:$0xff] }
 0x7a4   :  { %v3181_v1 = vadd.f32 1.0, %v6027_v48  ;;  %v6029_v54 = vpop.eup %6028 }
 0x7a5   :  { %6032 = vrcp.f32 %v3180_v63  ;;  %v6031_v49 = vpop.eup %6030 }
 0x7a6   :  { %6034 = vrcp.f32 %v3181_v1  ;;  %v3182_v56 = vadd.f32 1.0, %v6031_v49  ;;  %v8482_v49 = vld [vmem:[#allocation72_spill] sm:$0xff] }
 0x7a8   :  { %6036 = vrcp.f32 %v3182_v56  ;;  %v8486_v56 = vld [vmem:[#allocation76_spill] sm:$0xff] }
 0x7af   :  { %v6033_v3 = vpop.eup %6032 }
 0x7b0   :  { %v3191_v15 = vmul.f32 %v6033_v3, %v6029_v54  ;;  %v6035_v7 = vpop.eup %6034  ;;  %v8483_v3 = vld [vmem:[#allocation73_spill] sm:$0xff] }
 0x7b1   :  { %v3190_v58 = vmul.f32 %v6035_v7, %v7583_v20  ;;  %v8485_v7 = vld [vmem:[#allocation75_spill] sm:$0xff] }
 0x7b2   :  { %v6037_v8 = vpop.eup %6036 }
 0x7b3   :  { %v7709_v22 = vadd.f32 %v3191_v15, %v3190_v58  ;;  %v8484_v15 = vld [vmem:[#allocation74_spill] sm:$0xff]  ;;  %v8487_v58 = vld [vmem:[#allocation77_spill] sm:$0xff] }
 0x7b5   :  { %6038 = vtanh.f32 %v7709_v22 }
 0x7b6   :  { %6040 = vpow2.f32 %v4255_v19  ;;  %v8492_v19 = vld [vmem:[#allocation82_spill] sm:$0xff] }
 0x7b7   :  { %6042 = vtanh.f32 %v7702_v59 }
 0x7bf   :  { %v6039_v34 = vpop.eup %6038 }
 0x7c0   :  { %v3194_v63 = vmul.f32 %v6039_v34, %v6037_v8  ;;  %v6041_v20 = vpop.eup %6040  ;;  %v8490_v8 = vld [vmem:[#allocation80_spill] sm:$0xff]  ;;  %v8491_v34 = vld [vmem:[#allocation81_spill] sm:$0xff] }
 0x7c1   :  { %v3357_v28 = vadd.f32 1.0, %v6041_v20  ;;  %v6043_v48 = vpop.eup %6042  ;;  %v8494_v20 = vld [vmem:[#allocation84_spill] sm:$0xff] }
 0x7c2   :  { %3260 = vmatmul.mubr.f32.vlgmr.msra.gmra.mrb[24].mxu0 %v3194_v63  ;;  %3331 = vmatmul.mubr.f32.vlgmr.msra.gmra.mrb[24].mxu1 %v3194_v63  ;;  %v8493_v63 = vld [vmem:[#allocation83_spill] sm:$0xff] }
 0x7c3   :  { %5488 = vmatpush1.bf16.msra.mxu0 %v6449_v10  ;;  %5520 = vmatpush1.bf16.msra.mxu1 %v6453_v11  ;;  %6044 = vrcp.f32 %v3357_v28  ;;  %v8495_v28 = vld [vmem:[#allocation85_spill] sm:$0xff] }
 0x7c4   :  { %5490 = vmatprep.subr.bf16.mxu0 %v6455_v12  ;;  %5522 = vmatprep.subr.bf16.mxu1 %v6467_v23 }
 0x7c5   :  { %3434 = vmatprep.mubr.f32.mxu0 %v8179_v5  ;;  %3505 = vmatprep.mubr.f32.mxu1 %v8179_v5 }
 0x7c7   :  { %5492 = vmatpush1.bf16.msra.mxu0 %v6487_v33  ;;  %5524 = vmatpush1.bf16.msra.mxu1 %v6491_v38 }
 0x7c8   :  { %5494 = vmatprep.subr.bf16.mxu0 %v6493_v41  ;;  %5526 = vmatprep.subr.bf16.mxu1 %v6505_v47 }
 0x7cb   :  { %5496 = vmatpush1.bf16.msra.mxu0 %v6525_v61  ;;  %5528 = vmatpush1.bf16.msra.mxu1 %v8202_v50 }
 0x7cc   :  { %5498 = vmatprep.subr.bf16.mxu0 %v8203_v36  ;;  %5530 = vmatprep.subr.bf16.mxu1 %v8204_v25 }
 0x7cd   :  { %v6045_v1 = vpop.eup %6044 }
 0x7ce   :  { %v3369_v54 = vmul.f32 %v6045_v1, %v6043_v48  ;;  %v8496_v48 = vld [vmem:[#allocation86_spill] sm:$0xff]  ;;  %v8497_v1 = vld [vmem:[#allocation87_spill] sm:$0xff] }
 0x7cf   :  { %5500 = vmatpush1.bf16.msra.mxu0 %v8205_v16  ;;  %5532 = vmatpush1.bf16.msra.mxu1 %v8206_v21 }
 0x7d0   :  { %5502 = vmatprep.subr.bf16.mxu0 %v8207_v37  ;;  %5534 = vmatprep.subr.bf16.mxu1 %v8258_v32 }
 0x7d3   :  { %5504 = vmatpush1.bf16.msra.mxu0 %v8259_v53  ;;  %5536 = vmatpush1.bf16.msra.mxu1 %v8260_v44 }
 0x7d4   :  { %5506 = vmatprep.subr.bf16.mxu0 %v8261_v35  ;;  %5538 = vmatprep.subr.bf16.mxu1 %v8262_v39 }
 0x7d7   :  { %5508 = vmatpush1.bf16.msra.mxu0 %v8314_v24  ;;  %5540 = vmatpush1.bf16.msra.mxu1 %v8315_v42 }
 0x7d8   :  { %5510 = vmatprep.subr.bf16.mxu0 %v8316_v4  ;;  %5542 = vmatprep.subr.bf16.mxu1 %v8266_v27 }
 0x7db   :  { %5512 = vmatpush1.bf16.msra.mxu0 %v8317_v17  ;;  %5544 = vmatpush1.bf16.msra.mxu1 %v8318_v9 }
 0x7dc   :  { %5514 = vmatprep.subr.bf16.mxu0 %v8319_v29  ;;  %5546 = vmatprep.subr.bf16.mxu1 %v8320_v14 }
 0x7df   :  { %5516 = vmatpush1.bf16.msra.mxu0 %v8271_v57  ;;  %5548 = vmatpush1.bf16.msra.mxu1 %v8321_v13 }
 0x7e0   :  { %5550 = vmatprep.subr.bf16.mxu0 %v8322_v46  ;;  %5582 = vmatprep.subr.bf16.mxu1 %v8323_v45 }
 0x7e2   :  { %3435 = vmatmul.mubr.f32.vlgmr.msra.gmra.mrb[26].mxu0 %v3369_v54  ;;  %3506 = vmatmul.mubr.f32.vlgmr.msra.gmra.mrb[26].mxu1 %v3369_v54 }
 0x7e3   :  { %5552 = vmatpush1.bf16.msra.mxu0 %v8275_v40  ;;  %5584 = vmatpush1.bf16.msra.mxu1 %v8324_v0 }
 0x7e4   :  { %5554 = vmatprep.subr.bf16.mxu0 %v8277_v26  ;;  %5586 = vmatprep.subr.bf16.mxu1 %v8278_v51 }
 0x7e5   :  { %3576 = vmatprep.mubr.f32.mxu0 %v8179_v5  ;;  %3647 = vmatprep.mubr.f32.mxu1 %v8179_v5 }
 0x7e7   :  { %5556 = vmatpush1.bf16.msra.mxu0 %v8279_v18  ;;  %5588 = vmatpush1.bf16.msra.mxu1 %v8280_v43 }
 0x7e8   :  { %5558 = vmatprep.subr.bf16.mxu0 %v8281_v52  ;;  %5590 = vmatprep.subr.bf16.mxu1 %v8282_v6 }
 0x7eb   :  { %5560 = vmatpush1.bf16.msra.mxu0 %v8482_v49  ;;  %5592 = vmatpush1.bf16.msra.mxu1 %v8483_v3 }
 0x7ec   :  { %5562 = vmatprep.subr.bf16.mxu0 %v8484_v15  ;;  %5594 = vmatprep.subr.bf16.mxu1 %v8485_v7 }
 0x7ef   :  { %5564 = vmatpush1.bf16.msra.mxu0 %v8486_v56  ;;  %5596 = vmatpush1.bf16.msra.mxu1 %v8487_v58  ;;  %v8498_v58 = vld [vmem:[#allocation88_spill] sm:$0xff]  ;;  %v4262_v56 = vld [vmem:[%s7921_s0 + $0xf8] sm:$0xff] }
 0x7f0   :  { %5566 = vmatprep.subr.bf16.mxu0 %v8488_v2  ;;  %5598 = vmatprep.subr.bf16.mxu1 %v8489_v31  ;;  %v8499_v2 = vld [vmem:[#allocation89_spill] sm:$0xff]  ;;  %v8500_v31 = vld [vmem:[#allocation90_spill] sm:$0xff] }
 0x7f3   :  { %5568 = vmatpush1.bf16.msra.mxu0 %v8490_v8  ;;  %5600 = vmatpush1.bf16.msra.mxu1 %v8491_v34  ;;  %v8501_v8 = vld [vmem:[#allocation91_spill] sm:$0xff]  ;;  %v8502_v34 = vld [vmem:[#allocation92_spill] sm:$0xff] }
 0x7f4   :  { %5570 = vmatprep.subr.bf16.mxu0 %v8492_v19  ;;  %5602 = vmatprep.subr.bf16.mxu1 %v8493_v63  ;;  %v8503_v19 = vld [vmem:[#allocation93_spill] sm:$0xff]  ;;  %v8504_v63 = vld [vmem:[#allocation7_spill] sm:$0xff] }
 0x7f7   :  { %5572 = vmatpush1.bf16.msra.mxu0 %v8494_v20  ;;  %5604 = vmatpush1.bf16.msra.mxu1 %v8495_v28  ;;  %v8505_v20 = vld [vmem:[#allocation8_spill] sm:$0xff] }
 0x7f8   :  { %5574 = vmatprep.subr.bf16.mxu0 %v8496_v48  ;;  %5606 = vmatprep.subr.bf16.mxu1 %v8497_v1  ;;  %v8506_v48 = vld [vmem:[#allocation9_spill] sm:$0xff]  ;;  %v8507_v1 = vld [vmem:[#allocation10_spill] sm:$0xff] }
 0x7fb   :  { %5576 = vmatpush1.bf16.msra.mxu0 %v8498_v58  ;;  %5608 = vmatpush1.bf16.msra.mxu1 %v8499_v2  ;;  %v8508_v58 = vld [vmem:[#allocation11_spill] sm:$0xff]  ;;  %v8509_v2 = vld [vmem:[#allocation12_spill] sm:$0xff] }
 0x7fc   :  { %5578 = vmatprep.subr.bf16.mxu0 %v8500_v31  ;;  %5610 = vmatprep.subr.bf16.mxu1 %v8501_v8  ;;  %v8519_v8 = vld [vmem:[#allocation22_spill] sm:$0xff]  ;;  %v8520_v31 = vld [vmem:[#allocation23_spill] sm:$0xff] }
 0x7ff   :  { %5580 = vmatpush1.bf16.msra.mxu0 %v8502_v34  ;;  %5612 = vmatpush1.bf16.msra.mxu1 %v8503_v19  ;;  %v8510_v34 = vld [vmem:[#allocation13_spill] sm:$0xff]  ;;  %v8511_v19 = vld [vmem:[#allocation14_spill] sm:$0xff] }
 0x800   :  { %5614 = vmatprep.subr.bf16.mxu0 %v8504_v63  ;;  %5646 = vmatprep.subr.bf16.mxu1 %v8505_v20  ;;  %v8512_v63 = vld [vmem:[#allocation15_spill] sm:$0xff]  ;;  %v8513_v20 = vld [vmem:[#allocation16_spill] sm:$0xff] }
 0x802   :  { %3577 = vmatmul.mubr.f32.vlgmr.msra.gmra.mrb[24].mxu0 %v3369_v54  ;;  %3648 = vmatmul.mubr.f32.vlgmr.msra.gmra.mrb[24].mxu1 %v3369_v54  ;;  %v8514_v54 = vld [vmem:[#allocation17_spill] sm:$0xff] }
 0x803   :  { %5616 = vmatpush1.bf16.msra.mxu0 %v8506_v48  ;;  %5648 = vmatpush1.bf16.msra.mxu1 %v8507_v1  ;;  %v8515_v48 = vld [vmem:[#allocation18_spill] sm:$0xff]  ;;  %v8516_v1 = vld [vmem:[#allocation19_spill] sm:$0xff] }
 0x804   :  { %5618 = vmatprep.subr.bf16.mxu0 %v8508_v58  ;;  %5650 = vmatprep.subr.bf16.mxu1 %v8509_v2  ;;  %v8517_v58 = vld [vmem:[#allocation20_spill] sm:$0xff]  ;;  %v8518_v2 = vld [vmem:[#allocation21_spill] sm:$0xff] }
 0x805   :  { %3750 = vmatprep.mubr.f32.mxu0 %v8179_v5  ;;  %3821 = vmatprep.mubr.f32.mxu1 %v8179_v5 }
 0x807   :  { %5620 = vmatpush1.bf16.msra.mxu0 %v8510_v34  ;;  %5652 = vmatpush1.bf16.msra.mxu1 %v8511_v19  ;;  %v8521_v34 = vld [vmem:[#allocation24_spill] sm:$0xff]  ;;  %v8522_v19 = vld [vmem:[#allocation25_spill] sm:$0xff] }
 0x808   :  { %5622 = vmatprep.subr.bf16.mxu0 %v8512_v63  ;;  %5654 = vmatprep.subr.bf16.mxu1 %v8513_v20  ;;  %v8523_v63 = vld [vmem:[#allocation26_spill] sm:$0xff]  ;;  %v8524_v20 = vld [vmem:[#allocation27_spill] sm:$0xff] }
 0x80b   :  { %5624 = vmatpush1.bf16.msra.mxu0 %v8514_v54  ;;  %5656 = vmatpush1.bf16.msra.mxu1 %v8515_v48  ;;  %v8525_v54 = vld [vmem:[#allocation28_spill] sm:$0xff]  ;;  %v8526_v48 = vld [vmem:[#allocation29_spill] sm:$0xff] }
 0x80c   :  { %5626 = vmatprep.subr.bf16.mxu0 %v8516_v1  ;;  %5658 = vmatprep.subr.bf16.mxu1 %v8517_v58  ;;  %v8527_v1 = vld [vmem:[#allocation30_spill] sm:$0xff]  ;;  %v8528_v58 = vld [vmem:[#allocation31_spill] sm:$0xff] }
 0x80f   :  { %5628 = vmatpush1.bf16.msra.mxu0 %v8518_v2  ;;  %5660 = vmatpush1.bf16.msra.mxu1 %v8519_v8  ;;  %v8529_v2 = vld [vmem:[#allocation32_spill] sm:$0xff]  ;;  %v8530_v8 = vld [vmem:[#allocation33_spill] sm:$0xff] }
 0x810   :  { %5630 = vmatprep.subr.bf16.mxu0 %v8520_v31  ;;  %5662 = vmatprep.subr.bf16.mxu1 %v8521_v34  ;;  %v8531_v31 = vld [vmem:[#allocation34_spill] sm:$0xff]  ;;  %v8532_v34 = vld [vmem:[#allocation35_spill] sm:$0xff] }
 0x813   :  { %5632 = vmatpush1.bf16.msra.mxu0 %v8522_v19  ;;  %5664 = vmatpush1.bf16.msra.mxu1 %v8523_v63  ;;  %v8533_v19 = vld [vmem:[#allocation36_spill] sm:$0xff]  ;;  %v8534_v63 = vld [vmem:[#allocation37_spill] sm:$0xff] }
 0x814   :  { %5634 = vmatprep.subr.bf16.mxu0 %v8524_v20  ;;  %5666 = vmatprep.subr.bf16.mxu1 %v8525_v54  ;;  %v8535_v20 = vld [vmem:[#allocation38_spill] sm:$0xff]  ;;  %v8536_v54 = vld [vmem:[#allocation39_spill] sm:$0xff] }
 0x817   :  { %5636 = vmatpush1.bf16.msra.mxu0 %v8526_v48  ;;  %5668 = vmatpush1.bf16.msra.mxu1 %v8527_v1  ;;  %v8537_v48 = vld [vmem:[#allocation40_spill] sm:$0xff]  ;;  %v4259_v1 = vld [vmem:[%s7921_s0 + $0xe0] sm:$0xff] }
 0x818   :  { %5638 = vmatprep.subr.bf16.mxu0 %v8528_v58  ;;  %5670 = vmatprep.subr.bf16.mxu1 %v8529_v2  ;;  %v4260_v58 = vld [vmem:[%s7921_s0 + $0xe8] sm:$0xff] }
 0x81b   :  { %5640 = vmatpush1.bf16.msra.mxu0 %v8530_v8  ;;  %5672 = vmatpush1.bf16.msra.mxu1 %v8531_v31 }
 0x81c   :  { %5642 = vmatprep.subr.bf16.mxu0 %v8532_v34  ;;  %5674 = vmatprep.subr.bf16.mxu1 %v8533_v19 }
 0x81f   :  { %5644 = vmatpush1.bf16.msra.mxu0 %v8534_v63  ;;  %5676 = vmatpush1.bf16.msra.mxu1 %v8535_v20 }
 0x820   :  { %5678 = vmatprep.subr.bf16.mxu0 %v8536_v54  ;;  %5710 = vmatprep.subr.bf16.mxu1 %v8537_v48  ;;  %v4261_v54 = vld [vmem:[%s7921_s0 + $0xf0] sm:$0xff] }
 0x8b5   :  { %v3436_v2 = vpop.f32.mrb[26].mxu0  ;;  %v3507_v8 = vpop.f32.mrb[26].mxu1 }
 0x8b6   :  { %v3833_v31 = vadd.f32 %v4259_v1, %v3436_v2  ;;  %v3438_v34 = vpop.f32.mrb[27].mxu0  ;;  %v3509_v19 = vpop.f32.mrb[27].mxu1  ;;  %v3835_v48 = vadd.f32 %v4261_v54, %v3507_v8 }
 0x8b7   :  { %v3834_v63 = vadd.f32 %v4260_v58, %v3438_v34  ;;  %v3836_v7 = vadd.f32 %v4262_v56, %v3509_v19 }
 0x8b8   :  { %v4263_v28 = vmul.f32 -1.442695, %v3833_v31  ;;  %v4265_v15 = vmul.f32 -1.442695, %v3835_v48 }
 0x8b9   :  { %v4264_v20 = vmul.f32 -1.442695, %v3834_v63 }
 0x8ba   :  { %6046 = vpow2.f32 %v4263_v28 }
 0x8bb   :  { %6048 = vpow2.f32 %v4264_v20 }
 0x8bc   :  { %6050 = vtanh.f32 %v3836_v7 }
 0x8bd   :  { %6052 = vpow2.f32 %v4265_v15 }
 0x8c4   :  { %v6047_v3 = vpop.eup %6046 }
 0x8c5   :  { %v3846_v1 = vadd.f32 1.0, %v6047_v3  ;;  %v6049_v2 = vpop.eup %6048 }
 0x8c6   :  { %v3847_v58 = vadd.f32 1.0, %v6049_v2  ;;  %v6051_v28 = vpop.eup %6050 }
 0x8c7   :  { %6054 = vrcp.f32 %v3846_v1  ;;  %v6053_v31 = vpop.eup %6052 }
 0x8c8   :  { %6056 = vrcp.f32 %v3847_v58  ;;  %v3848_v8 = vadd.f32 1.0, %v6053_v31 }
 0x8ca   :  { %6058 = vrcp.f32 %v3848_v8 }
 0x8d1   :  { %v6055_v34 = vpop.eup %6054 }
 0x8d2   :  { %v3857_v63 = vmul.f32 %v6055_v34, %v6051_v28  ;;  %v6057_v20 = vpop.eup %6056 }
 0x8d3   :  { %v3856_v54 = vmul.f32 %v6057_v20, %v7702_v59 }
 0x8d4   :  { %v6059_v58 = vpop.eup %6058 }
 0x8d5   :  { %v3578_v49 = vpop.f32.mrb[24].mxu0  ;;  %v3649_v6 = vpop.f32.mrb[24].mxu1  ;;  %v3858_v56 = vadd.f32 %v3857_v63, %v3856_v54 }
 0x8d6   :  { %v3658_v19 = vadd.f32 %v3578_v49, %v7063_v60  ;;  %v3580_v3 = vpop.f32.mrb[25].mxu0  ;;  %v3651_v7 = vpop.f32.mrb[25].mxu1  ;;  %v3660_v2 = vadd.f32 %v3649_v6, %v7072_v30 }
 0x8d7   :  { %v3659_v15 = vadd.f32 %v3580_v3, %v7066_v55  ;;  %6060 = vtanh.f32 %v3858_v56  ;;  %v3661_v59 = vadd.f32 %v3651_v7, %v7074_v62 }
 0x8d8   :  { %v4256_v48 = vmul.f32 -1.442695, %v3658_v19  ;;  %v4258_v31 = vmul.f32 -1.442695, %v3660_v2 }
 0x8d9   :  { %v4257_v1 = vmul.f32 -1.442695, %v3659_v15 }
 0x8da   :  { %6062 = vpow2.f32 %v4256_v48 }
 0x8db   :  { %6064 = vpow2.f32 %v4257_v1 }
 0x8dc   :  { %6066 = vtanh.f32 %v3661_v59 }
 0x8dd   :  { %6068 = vpow2.f32 %v4258_v31 }
 0x8e1   :  { %v6061_v28 = vpop.eup %6060 }
 0x8e2   :  { %v7835_v34 = vmul.f32 %v6061_v28, %v6059_v58 }
 0x8e4   :  { %v6063_v49 = vpop.eup %6062 }
 0x8e5   :  { %v3671_v63 = vadd.f32 1.0, %v6063_v49  ;;  %v6065_v20 = vpop.eup %6064 }
 0x8e6   :  { %v3672_v8 = vadd.f32 1.0, %v6065_v20  ;;  %v6067_v54 = vpop.eup %6066 }
 0x8e7   :  { %6070 = vrcp.f32 %v3671_v63  ;;  %v6069_v56 = vpop.eup %6068 }
 0x8e8   :  { %6072 = vrcp.f32 %v3672_v8  ;;  %v3673_v15 = vadd.f32 1.0, %v6069_v56 }
 0x8ea   :  { %6074 = vrcp.f32 %v3673_v15 }
 0x8f1   :  { %v6071_v19 = vpop.eup %6070 }
 0x8f2   :  { %v3682_v3 = vmul.f32 %v6071_v19, %v6067_v54  ;;  %v6073_v6 = vpop.eup %6072 }
 0x8f3   :  { %v3681_v7 = vmul.f32 %v6073_v6, %v7709_v22 }
 0x8f4   :  { %v6075_v1 = vpop.eup %6074 }
 0x8f5   :  { %v7838_v48 = vadd.f32 %v3682_v3, %v3681_v7 }
 0x8f7   :  { %6076 = vtanh.f32 %v7838_v48 }
 0x901   :  { %v6077_v2 = vpop.eup %6076 }
 0x902   :  { %v3685_v58 = vmul.f32 %v6077_v2, %v6075_v1 }
 0x904   :  { %3751 = vmatmul.mubr.f32.vlgmr.msra.gmra.mrb[28].mxu0 %v3685_v58  ;;  %3822 = vmatmul.mubr.f32.vlgmr.msra.gmra.mrb[28].mxu1 %v3685_v58 }
 0x905   :  { %5680 = vmatpush1.bf16.msra.mxu0 %v6449_v10  ;;  %5712 = vmatpush1.bf16.msra.mxu1 %v6453_v11  ;;  %v8538_v10 = vld [vmem:[#allocation71_spill] sm:$0xff]  ;;  %v8539_v11 = vld [vmem:[#allocation72_spill] sm:$0xff] }
 0x906   :  { %5682 = vmatprep.subr.bf16.mxu0 %v6455_v12  ;;  %5714 = vmatprep.subr.bf16.mxu1 %v6467_v23  ;;  %v8540_v12 = vld [vmem:[#allocation73_spill] sm:$0xff]  ;;  %v8541_v23 = vld [vmem:[#allocation74_spill] sm:$0xff] }
 0x907   :  { %3925 = vmatprep.mubr.f32.mxu0 %v8179_v5  ;;  %3996 = vmatprep.mubr.f32.mxu1 %v8179_v5 }
 0x909   :  { %5684 = vmatpush1.bf16.msra.mxu0 %v6487_v33  ;;  %5716 = vmatpush1.bf16.msra.mxu1 %v6491_v38  ;;  %v8542_v33 = vld [vmem:[#allocation75_spill] sm:$0xff]  ;;  %v8543_v38 = vld [vmem:[#allocation76_spill] sm:$0xff] }
 0x90a   :  { %5686 = vmatprep.subr.bf16.mxu0 %v6493_v41  ;;  %5718 = vmatprep.subr.bf16.mxu1 %v6505_v47  ;;  %v8544_v41 = vld [vmem:[#allocation77_spill] sm:$0xff]  ;;  %v8545_v47 = vld [vmem:[#allocation78_spill] sm:$0xff] }
 0x90d   :  { %5688 = vmatpush1.bf16.msra.mxu0 %v6525_v61  ;;  %5720 = vmatpush1.bf16.msra.mxu1 %v8202_v50  ;;  %v8546_v61 = vld [vmem:[#allocation79_spill] sm:$0xff]  ;;  %v8548_v50 = vld [vmem:[#allocation81_spill] sm:$0xff] }
 0x90e   :  { %5690 = vmatprep.subr.bf16.mxu0 %v8203_v36  ;;  %5722 = vmatprep.subr.bf16.mxu1 %v8204_v25  ;;  %v8549_v36 = vld [vmem:[#allocation82_spill] sm:$0xff]  ;;  %v8550_v25 = vld [vmem:[#allocation83_spill] sm:$0xff] }
 0x911   :  { %5692 = vmatpush1.bf16.msra.mxu0 %v8205_v16  ;;  %5724 = vmatpush1.bf16.msra.mxu1 %v8206_v21  ;;  %v8551_v16 = vld [vmem:[#allocation84_spill] sm:$0xff]  ;;  %v8552_v21 = vld [vmem:[#allocation85_spill] sm:$0xff] }
 0x912   :  { %5694 = vmatprep.subr.bf16.mxu0 %v8207_v37  ;;  %5726 = vmatprep.subr.bf16.mxu1 %v8258_v32  ;;  %v8553_v37 = vld [vmem:[#allocation86_spill] sm:$0xff]  ;;  %v8554_v32 = vld [vmem:[#allocation87_spill] sm:$0xff] }
 0x915   :  { %5696 = vmatpush1.bf16.msra.mxu0 %v8259_v53  ;;  %5728 = vmatpush1.bf16.msra.mxu1 %v8260_v44  ;;  %v8555_v53 = vld [vmem:[#allocation88_spill] sm:$0xff]  ;;  %v8556_v44 = vld [vmem:[#allocation89_spill] sm:$0xff] }
 0x916   :  { %5698 = vmatprep.subr.bf16.mxu0 %v8261_v35  ;;  %5730 = vmatprep.subr.bf16.mxu1 %v8262_v39  ;;  %v8557_v35 = vld [vmem:[#allocation90_spill] sm:$0xff]  ;;  %v8558_v39 = vld [vmem:[#allocation91_spill] sm:$0xff] }
 0x919   :  { %5700 = vmatpush1.bf16.msra.mxu0 %v8314_v24  ;;  %5732 = vmatpush1.bf16.msra.mxu1 %v8315_v42 }
 0x91a   :  { %5702 = vmatprep.subr.bf16.mxu0 %v8316_v4  ;;  %5734 = vmatprep.subr.bf16.mxu1 %v8266_v27  ;;  %v8559_v27 = vld [vmem:[#allocation92_spill] sm:$0xff] }
 0x91d   :  { %5704 = vmatpush1.bf16.msra.mxu0 %v8317_v17  ;;  %5736 = vmatpush1.bf16.msra.mxu1 %v8318_v9 }
 0x91e   :  { %5706 = vmatprep.subr.bf16.mxu0 %v8319_v29  ;;  %5738 = vmatprep.subr.bf16.mxu1 %v8320_v14 }
 0x921   :  { %5708 = vmatpush1.bf16.msra.mxu0 %v8271_v57  ;;  %5740 = vmatpush1.bf16.msra.mxu1 %v8321_v13 }
 0x922   :  { %5742 = vmatprep.subr.bf16.mxu0 %v8322_v46  ;;  %5774 = vmatprep.subr.bf16.mxu1 %v8323_v45 }
 0x924   :  { %3926 = vmatmul.mubr.f32.vlgmr.msra.gmra.mrb[30].mxu0 %v7835_v34  ;;  %3997 = vmatmul.mubr.f32.vlgmr.msra.gmra.mrb[30].mxu1 %v7835_v34 }
 0x925   :  { %5744 = vmatpush1.bf16.msra.mxu0 %v8275_v40  ;;  %5776 = vmatpush1.bf16.msra.mxu1 %v8324_v0  ;;  %v8560_v40 = vld [vmem:[#allocation93_spill] sm:$0xff] }
 0x926   :  { %5746 = vmatprep.subr.bf16.mxu0 %v8277_v26  ;;  %5778 = vmatprep.subr.bf16.mxu1 %v8278_v51 }
 0x927   :  { %4067 = vmatprep.mubr.f32.mxu0 %v8179_v5  ;;  %4138 = vmatprep.mubr.f32.mxu1 %v8179_v5  ;;  %v8547_v5 = vld [vmem:[#allocation80_spill] sm:$0xff] }
 0x929   :  { %5748 = vmatpush1.bf16.msra.mxu0 %v8279_v18  ;;  %5780 = vmatpush1.bf16.msra.mxu1 %v8280_v43 }
 0x92a   :  { %5750 = vmatprep.subr.bf16.mxu0 %v8281_v52  ;;  %5782 = vmatprep.subr.bf16.mxu1 %v8538_v10 }
 0x92d   :  { %5752 = vmatpush1.bf16.msra.mxu0 %v8539_v11  ;;  %5784 = vmatpush1.bf16.msra.mxu1 %v8540_v12 }
 0x92e   :  { %5754 = vmatprep.subr.bf16.mxu0 %v8541_v23  ;;  %5786 = vmatprep.subr.bf16.mxu1 %v8542_v33 }
 0x931   :  { %5756 = vmatpush1.bf16.msra.mxu0 %v8543_v38  ;;  %5788 = vmatpush1.bf16.msra.mxu1 %v8544_v41 }
 0x932   :  { %5758 = vmatprep.subr.bf16.mxu0 %v8545_v47  ;;  %5790 = vmatprep.subr.bf16.mxu1 %v8546_v61 }
 0x935   :  { %5760 = vmatpush1.bf16.msra.mxu0 %v8547_v5  ;;  %5792 = vmatpush1.bf16.msra.mxu1 %v8548_v50 }
 0x936   :  { %5762 = vmatprep.subr.bf16.mxu0 %v8549_v36  ;;  %5794 = vmatprep.subr.bf16.mxu1 %v8550_v25 }
 0x939   :  { %5764 = vmatpush1.bf16.msra.mxu0 %v8551_v16  ;;  %5796 = vmatpush1.bf16.msra.mxu1 %v8552_v21 }
 0x93a   :  { %5766 = vmatprep.subr.bf16.mxu0 %v8553_v37  ;;  %5798 = vmatprep.subr.bf16.mxu1 %v8554_v32 }
 0x93d   :  { %5768 = vmatpush1.bf16.msra.mxu0 %v8555_v53  ;;  %5800 = vmatpush1.bf16.msra.mxu1 %v8556_v44 }
 0x93e   :  { %5770 = vmatprep.subr.bf16.mxu0 %v8557_v35  ;;  %5802 = vmatprep.subr.bf16.mxu1 %v8558_v39 }
 0x941   :  { %5772 = vmatpush1.bf16.msra.mxu0 %v8559_v27  ;;  %5804 = vmatpush1.bf16.msra.mxu1 %v8560_v40 }
 0x944   :  { %4068 = vmatmul.mubr.f32.vlgmr.msra.gmra.mrb[28].mxu0 %v7835_v34  ;;  %4139 = vmatmul.mubr.f32.vlgmr.msra.gmra.mrb[28].mxu1 %v7835_v34 }
 0x9f7   :  { %v3927_v26 = vpop.f32.mrb[30].mxu0  ;;  %v3998_v51 = vpop.f32.mrb[30].mxu1 }
 0x9f8   :  { %v3929_v57 = vpop.f32.mrb[31].mxu0  ;;  %v4000_v18 = vpop.f32.mrb[31].mxu1 }
 0xa17   :  { %v4069_v43 = vpop.f32.mrb[28].mxu0  ;;  %v4140_v52 = vpop.f32.mrb[28].mxu1 }
 0xa18   :  { %v4149_v24 = vadd.f32 %v4069_v43, %v7063_v60  ;;  %v4071_v42 = vpop.f32.mrb[29].mxu0  ;;  %v4142_v4 = vpop.f32.mrb[29].mxu1  ;;  %v4151_v14 = vadd.f32 %v4140_v52, %v7072_v30 }
 0xa19   :  { %v4150_v17 = vadd.f32 %v4071_v42, %v7066_v55  ;;  %v4152_v13 = vadd.f32 %v4142_v4, %v7074_v62 }
 0xa1a   :  { %v4266_v9 = vmul.f32 -1.442695, %v4149_v24  ;;  %v4268_v46 = vmul.f32 -1.442695, %v4151_v14 }
 0xa1b   :  { %v4267_v29 = vmul.f32 -1.442695, %v4150_v17 }
 0xa1c   :  { %6078 = vpow2.f32 %v4266_v9 }
 0xa1d   :  { %6080 = vpow2.f32 %v4267_v29 }
 0xa1e   :  { %6082 = vtanh.f32 %v4152_v13 }
 0xa1f   :  { %6084 = vpow2.f32 %v4268_v46 }
 0xa26   :  { %v6079_v45 = vpop.eup %6078 }
 0xa27   :  { %v4162_v0 = vadd.f32 1.0, %v6079_v45  ;;  %v6081_v22 = vpop.eup %6080 }
 0xa28   :  { %v4163_v60 = vadd.f32 1.0, %v6081_v22  ;;  %v6083_v59 = vpop.eup %6082 }
 0xa29   :  { %6086 = vrcp.f32 %v4162_v0  ;;  %v6085_v28 = vpop.eup %6084 }
 0xa2a   :  { %6088 = vrcp.f32 %v4163_v60  ;;  %v4164_v49 = vadd.f32 1.0, %v6085_v28 }
 0xa2c   :  { %6090 = vrcp.f32 %v4164_v49 }
 0xa33   :  { %v6087_v55 = vpop.eup %6086 }
 0xa34   :  { %v4173_v31 = vmul.f32 %v6087_v55, %v6083_v59  ;;  %v6089_v34 = vpop.eup %6088 }
 0xa35   :  { %v4172_v63 = vmul.f32 %v6089_v34, %v7838_v48 }
 0xa36   :  { %v6091_v62 = vpop.eup %6090 }
 0xa37   :  { %v4174_v30 = vadd.f32 %v4173_v31, %v4172_v63 }
 0xa39   :  { %6092 = vtanh.f32 %v4174_v30 }
 0xa43   :  { %v6093_v20 = vpop.eup %6092 }
 0xa44   :  { %v4176_v8 = vmul.f32 %v6093_v20, %v6091_v62 }
 0xa46   :  { %4188 = vst [vmem:[%s7923_s4] sm:$0xff] %v4176_v8 }

</bundles_post_ra>
